<compile_context>
chip_gen: v5e
topology: v5e:2x2
jax: 0.10.0
libtpu: 0.0.40
codegen_flags: <defaults>
</compile_context>

<pallas_src>
import functools

import jax
import jax.numpy as jnp
from jax.experimental import pallas as pl
from jax.experimental.pallas import tpu as pltpu

LRELU_SLOPE = 0.01   # InPlaceABNSync default activation ("leaky_relu", slope 0.01)
BN_EPS = 1e-5


# ---------------------------------------------------------------------------
# Pallas kernel:  (Cout_tile, Cin) @ (Cin, HW)  + folded-BN bias + LeakyReLU(0.01)
# ---------------------------------------------------------------------------
def _conv1x1_abn_kernel(x_ref, w_ref, b_ref, o_ref):
    # In-kernel bf16 cast of the activation tile (f32 in HBM/VMEM); the MXU takes
    # bf16 operands and accumulates in f32.
    x_bf = x_ref[...].astype(jnp.bfloat16)                       # (Cin, HW)
    y = jnp.dot(w_ref[...], x_bf, preferred_element_type=jnp.float32)  # (Ct, HW) f32
    y = y + b_ref[...]                                           # (Ct, 1) broadcast over HW
    o_ref[...] = jnp.where(y > 0, y, LRELU_SLOPE * y).astype(o_ref.dtype)


def _choose_cout_tile(cout, n_batch):
    """Largest Cout tile that divides Cout and still yields enough grid steps
    (>= 8 preferred -> >= 4 per v7x TensorCore; >= 4 acceptable)."""
    for target_blocks in (8, 4, 2, 1):
        for t in (512, 256, 128):
            if cout % t == 0 and n_batch * (cout // t) >= target_blocks:
                return t
    return cout  # fall back to a single full-width block


def conv1x1_abn_nchw(x3d, w_folded, bias, *, out_dtype=jnp.float32):
    """Fused 1x1 conv + folded BatchNorm + LeakyReLU, NCHW-native.

    x3d:      (N, Cin, HW) f32 activations (free reshape of NCHW).
    w_folded: (Cout, Cin) weight with the BN scale folded in (bf16 preferred).
    bias:     (Cout,) folded BN shift (f32).
    Returns   (N, Cout, HW) in out_dtype.
    """
    n, cin, hw = x3d.shape
    cout = w_folded.shape[0]

    w_bf = w_folded.astype(jnp.bfloat16)          # no-op if already bf16
    b2d = bias.reshape(cout, 1).astype(jnp.float32)

    tc = _choose_cout_tile(cout, n)
    grid = (n, cout // tc)                        # Cout axis fastest -> x DMA'd once per batch

    out_itemsize = jnp.dtype(out_dtype).itemsize
    # Double-buffered per-step VMEM footprint (bias is lane-padded to 128).
    vmem_bytes = (2 * cin * hw * 4                # f32 activation block
                  + 2 * tc * cin * 2              # bf16 weight block
                  + 2 * tc * 128 * 4              # bias block (padded)
                  + 2 * tc * hw * out_itemsize)   # output block
    vmem_limit = min(2 * vmem_bytes + (8 << 20), 64 << 20)   # cap at v7x physical VMEM

    cost = pl.CostEstimate(
        flops=2 * n * cout * cin * hw,
        transcendentals=0,
        bytes_accessed=(x3d.size * 4 + w_bf.size * 2 + b2d.size * 4
                        + n * cout * hw * out_itemsize),
    )

    return pl.pallas_call(
        _conv1x1_abn_kernel,
        out_shape=jax.ShapeDtypeStruct((n, cout, hw), out_dtype),
        grid_spec=pltpu.PrefetchScalarGridSpec(
            num_scalar_prefetch=0,
            grid=grid,
            in_specs=[
                pl.BlockSpec((None, cin, hw), lambda b, c: (b, 0, 0)),   # x_n, constant over c
                pl.BlockSpec((tc, cin), lambda b, c: (c, 0)),            # weight rows for block c
                pl.BlockSpec((tc, 1), lambda b, c: (c, 0)),              # folded BN bias
            ],
            out_specs=pl.BlockSpec((None, tc, hw), lambda b, c: (b, c, 0)),
        ),
        compiler_params=pltpu.CompilerParams(
            dimension_semantics=("parallel", "parallel"),
            vmem_limit_bytes=vmem_limit,
        ),
        cost_estimate=cost,
    )(x3d, w_bf, b2d)


# ---------------------------------------------------------------------------
# Check_Module forward (NCHW in / NCHW out, like the PyTorch module)
# ---------------------------------------------------------------------------
def check_module_forward(params, x_nchw, *, out_dtype=jnp.float32):
    n, c, h, w = x_nchw.shape
    x3d = x_nchw.reshape(n, c, h * w)                 # free view — no transpose
    y3d = conv1x1_abn_nchw(x3d, params["w_folded"], params["bias"], out_dtype=out_dtype)
    return y3d.reshape(n, -1, h, w)


def make_params(key, cin, cout):
    kw, kg, kb, km, kv = jax.random.split(key, 5)
    # PyTorch conv weight (Cout, Cin, 1, 1) -> (Cout, Cin) matmul weight.
    w = jax.random.normal(kw, (cout, cin), jnp.float32) * (1.0 / jnp.sqrt(cin))
    gamma = jax.random.uniform(kg, (cout,), jnp.float32, 0.5, 1.5)
    beta = jax.random.normal(kb, (cout,), jnp.float32) * 0.1
    mean = jax.random.normal(km, (cout,), jnp.float32) * 0.1
    var = jax.random.uniform(kv, (cout,), jnp.float32, 0.5, 1.5)
    # TODO(synk): InPlaceABNSync's cross-replica batch-stat sync (training mode)
    # has no single-kernel equivalent; inference-mode BN (running stats) is folded.
    scale = gamma / jnp.sqrt(var + BN_EPS)
    shift = beta - mean * scale
    return {
        # BN scale folded into the weight rows, pre-cast to bf16 for the MXU.
        "w_folded": (w * scale[:, None]).astype(jnp.bfloat16),   # (Cout, Cin)
        "bias": shift.astype(jnp.float32),                       # (Cout,)
    }


if __name__ == "__main__":
    key = jax.random.PRNGKey(0)
    N, C, H, W = 2, 1024, 16, 16        # module mandates 1024 channels; small spatial
    kx, kp = jax.random.split(key)
    x = jax.random.normal(kx, (N, C, H, W), jnp.float32)
    params = make_params(kp, C, C)

    fwd = jax.jit(functools.partial(check_module_forward, params))
    out = fwd(x)
    jax.block_until_ready(out)

    # ---- references ----
    x3d = x.reshape(N, C, H * W)
    b = params["bias"].reshape(1, C, 1)

    # (a) matched-precision reference: same bf16 operands, f32 accumulate.
    ref_m = jnp.einsum("oc,ncs->nos",
                       params["w_folded"],
                       x3d.astype(jnp.bfloat16),
                       preferred_element_type=jnp.float32) + b
    ref_m = jnp.where(ref_m > 0, ref_m, LRELU_SLOPE * ref_m).reshape(N, C, H, W)

    # (b) independent f32-activation reference (validates the in-kernel bf16 cast).
    ref_f = jnp.einsum("oc,ncs->nos",
                       params["w_folded"].astype(jnp.float32),
                       x3d,
                       preferred_element_type=jnp.float32) + b
    ref_f = jnp.where(ref_f > 0, ref_f, LRELU_SLOPE * ref_f).reshape(N, C, H, W)

    assert out.shape == (N, C, H, W), out.shape
    assert bool(jnp.all(jnp.isfinite(out)))
    err_matched = float(jnp.max(jnp.abs(out - ref_m)))
    err_f32 = float(jnp.max(jnp.abs(out - ref_f)))
    assert err_matched < 2e-2, err_matched
    assert err_f32 < 1e-1, err_f32
    print("KERNEL_OK")
</pallas_src>

<mosaic_0001>
module attributes {stable_mosaic.version = 11 : i64} {
  func.func @_conv1x1_abn_kernel(%arg0: i32, %arg1: i32, %arg2: memref<1x1024x256xf32, #tpu.memory_space<vmem>>, %arg3: memref<256x1024xbf16, #tpu.memory_space<vmem>>, %arg4: memref<256x1xf32, #tpu.memory_space<vmem>>, %arg5: memref<1x256x256xf32, #tpu.memory_space<vmem>>) attributes {dimension_semantics = [#tpu.dimension_semantics<parallel>, #tpu.dimension_semantics<parallel>], iteration_bounds = array<i64: 2, 4>, scalar_prefetch = 0 : i64, scratch_operands = 0 : i64, tpu.core_type = #tpu.core_type<tc>, window_params = [{transform_indices = @transform_0, window_bounds = array<i64: 1, 1024, 256>}, {transform_indices = @transform_1, window_bounds = array<i64: 256, 1024>}, {transform_indices = @transform_2, window_bounds = array<i64: 256, 1>}, {transform_indices = @transform_3, window_bounds = array<i64: 1, 256, 256>}]} {
    %c0 = arith.constant 0 : index
    %c0_0 = arith.constant 0 : index
    %c0_1 = arith.constant 0 : index
    %0 = vector.load %arg2[%c0, %c0_0, %c0_1] : memref<1x1024x256xf32, #tpu.memory_space<vmem>>, vector<1x1024x256xf32>
    %1 = vector.shape_cast %0 : vector<1x1024x256xf32> to vector<1024x256xf32>
    %2 = arith.truncf %1 : vector<1024x256xf32> to vector<1024x256xbf16>
    %c0_2 = arith.constant 0 : index
    %c0_3 = arith.constant 0 : index
    %3 = vector.load %arg3[%c0_2, %c0_3] : memref<256x1024xbf16, #tpu.memory_space<vmem>>, vector<256x1024xbf16>
    %cst = arith.constant dense<0.000000e+00> : vector<256x256xf32>
    %4 = tpu.matmul %3, %2, %cst {dimension_numbers = #tpu.dot_dimension_numbers<[1], [0], [0], [1], [0, 0, 1, 1], [], []>} : vector<256x1024xbf16>, vector<1024x256xbf16>, vector<256x256xf32> -> vector<256x256xf32>
    %c0_4 = arith.constant 0 : index
    %c0_5 = arith.constant 0 : index
    %5 = vector.load %arg4[%c0_4, %c0_5] : memref<256x1xf32, #tpu.memory_space<vmem>>, vector<256x1xf32>
    %6 = vector.broadcast %5 : vector<256x1xf32> to vector<256x256xf32>
    %7 = arith.addf %4, %6 : vector<256x256xf32>
    %cst_6 = arith.constant 0.000000e+00 : f32
    %8 = vector.broadcast %cst_6 : f32 to vector<256x256xf32>
    %9 = arith.cmpf ogt, %7, %8 : vector<256x256xf32>
    %cst_7 = arith.constant 0.00999999977 : f32
    %10 = vector.broadcast %cst_7 : f32 to vector<256x256xf32>
    %11 = arith.mulf %10, %7 : vector<256x256xf32>
    %12 = arith.select %9, %7, %11 : vector<256x256xi1>, vector<256x256xf32>
    %c0_8 = arith.constant 0 : index
    %c0_9 = arith.constant 0 : index
    %c0_10 = arith.constant 0 : index
    %13 = vector.load %arg5[%c0_8, %c0_9, %c0_10] : memref<1x256x256xf32, #tpu.memory_space<vmem>>, vector<1x256x256xf32>
    %14 = vector.shape_cast %13 : vector<1x256x256xf32> to vector<256x256xf32>
    %15 = vector.shape_cast %12 : vector<256x256xf32> to vector<1x256x256xf32>
    tpu.vector_store %arg5[%c0_8, %c0_9, %c0_10], %15 {strides = array<i32>} : memref<1x256x256xf32, #tpu.memory_space<vmem>>, vector<1x256x256xf32>,
    return
  }
  func.func @transform_0(%arg0: i32, %arg1: i32) -> (i32, i32, i32) {
    %c0_i32 = arith.constant 0 : i32
    %c0_i32_0 = arith.constant 0 : i32
    %c0_i32_1 = arith.constant 0 : i32
    return %arg0, %c0_i32, %c0_i32_0 : i32, i32, i32
  }
  func.func @transform_1(%arg0: i32, %arg1: i32) -> (i32, i32) {
    %c0_i32 = arith.constant 0 : i32
    %c0_i32_0 = arith.constant 0 : i32
    return %arg1, %c0_i32 : i32, i32
  }
  func.func @transform_2(%arg0: i32, %arg1: i32) -> (i32, i32) {
    %c0_i32 = arith.constant 0 : i32
    %c0_i32_0 = arith.constant 0 : i32
    return %arg1, %c0_i32 : i32, i32
  }
  func.func @transform_3(%arg0: i32, %arg1: i32) -> (i32, i32, i32) {
    %c0_i32 = arith.constant 0 : i32
    %c0_i32_0 = arith.constant 0 : i32
    return %arg0, %arg1, %c0_i32 : i32, i32, i32
  }
}

</mosaic_0001>

<bundles_post_ra>
// kernel: check_module_forward.1
= control target key start
LH: loop header
LB: loop body
LE: loop exit
PB: predicated region body
PF: predicated region fallthrough
CT: control target
= control target key end

     0   :  { %s4146_s12 = smov 0   ;;  %s4148_s13 = smov 0   ;;  %s5669_s0 = inlined_call_operand.vmem [shape: f32[2,1024,256], index: 0, kind: input, shape index: {}]   ;;  %s5670_s1 = inlined_call_operand.vmem [shape: bf16[1024,1024], index: 1, kind: input, shape index: {}]   ;;  %s5671_s2 = inlined_call_operand.vmem [shape: f32[1024,1], index: 2, kind: input, shape index: {}]   ;;  %s5672_s3 = inlined_call_operand.vmem [shape: f32[2,1024,256], index: 3, kind: output, shape index: {}]  }
   0x1   :  { %s4150_s14 = smov 0   ;;  %s4152_s15 = smov 0  }
   0x2   :  { %s4154_s16 = smov 0  }
   0x3 LB: > { %s22_s17 = sadd.s32 1, %s4115_s14  ;;  %s25_s18 = sadd.s32 1, %s4119_s15  ;;  %s4123_s16 = sphi %s4154_s16, %s13_s16   ;;  %s4119_s15 = sphi %s4152_s15, %s6077_s15   ;;  %s4115_s14 = sphi %s4150_s14, %s6076_s14   ;;  %s4111_s13 = sphi %s4148_s13, %s6075_s13   ;;  %s4107_s12 = sphi %s4146_s12, %s6074_s12  }
   0x4   : > { %p23_p0 = scmp.ge.s32.totalorder %s22_s17, 4  ;;  %p3385_p1 = scmp.ge.s32.totalorder %s4123_s16, 1 }
   0x5   : > { %p174_p2 = scmp.lt.s32.totalorder %s4123_s16, 9 }
   0x6   : > { %s6079_s17 = smov (%p23_p0, %s22_s17), 0  ;;  %s6081_s18 = smov (!%p23_p0, %s25_s18), %s4119_s15 }
   0x7   : > { %p175_p3 = pnand %p3385_p1, %p174_p2  ;;  %p27_p4 = scmp.ge.s32.totalorder %s6081_s18, 2 }
   0x9   : > { %s6083_s18 = smov (%p27_p4, %s6081_s18), 0  ;;  %178 = sbr.rel (%p175_p3) target bundleno = 1213 (0x4bd), region = 32 }
   0xe   : > { %p214_p5 = scmp.lt.s32.totalorder %s4111_s13, 1  ;;  %v4125_v29 = vmov 0   ;;  %s3388_s23 = sshll.u32 %s4107_s12, 5 }
   0xf   : > { %4082 = vset.pattern.permute.xlu0 %v4125_v29  ;;  %4083 = vset.pattern.permute.xlu1 %v4125_v29  ;;  %p4219_p6 = scmp.lt.s32.totalorder %s3388_s23, 127 }
  0x10   : > { %s6085_s13 = smov (!%p214_p5, %s4111_s13), 1  ;;  %4084 = vset.pattern.permute.xlu2 %v4125_v29 }
  0x11   : > { %s3911_s19 = sshll.u32 %s6085_s13, 11  ;;  %s6087_s23 = smov (!%p4219_p6, %s3388_s23), 127 }
  0x12   : > { %s4184_s22 = scalar_lea.vmem %s5669_s0, %s3911_s19  ;;  %s3912_s25 = sshll.u32 %s6087_s23, 5 }
  0x13   : > { %v271_v0 = vld [vmem:[%s4184_s22 + $0xe0] sm:$0xff]  ;;  %v273_v1 = vld [vmem:[%s4184_s22 + $0xf0] sm:$0xff]  ;;  %s3392_s26 = sshll.u32 %s6087_s23, 3  ;;  %s4257_s29 = scalar_lea.vmem %s5670_s1, %s3912_s25 }
  0x14   : > { %v303_v2 = vld [vmem:[%s4184_s22 + $0x1e0] sm:$0xff]  ;;  %v513_v3 = vpack.c.bf16 %v273_v1, %v271_v0  ;;  %v305_v4 = vld [vmem:[%s4184_s22 + $0x1f0] sm:$0xff]  ;;  %s4265_s5 = scalar_lea.vmem %s5671_s2, %s3392_s26  ;;  %s3394_s6 = sshll.u32 %s6087_s23, 1 }
  0x15   : > { %v335_v5 = vld [vmem:[%s4184_s22 + $0x2e0] sm:$0xff]  ;;  %v337_v6 = vld [vmem:[%s4184_s22 + $0x2f0] sm:$0xff]  ;;  %v529_v7 = vpack.c.bf16 %v305_v4, %v303_v2  ;;  %s3395_s7 = sshll.u32 %s6085_s13, 8 }
  0x16   : > { %v545_v8 = vpack.c.bf16 %v337_v6, %v335_v5  ;;  %v367_v9 = vld [vmem:[%s4184_s22 + $0x3e0] sm:$0xff]  ;;  %v369_v10 = vld [vmem:[%s4184_s22 + $0x3f0] sm:$0xff]  ;;  %1587 = vmatpush.bf16.msra.mxu0 %v513_v3  ;;  %s239_s8 = sadd.s32 %s3395_s7, %s3394_s6 }
  0x17   : > { %v267_v11 = vld [vmem:[%s4184_s22 + $0xc0] sm:$0xff]  ;;  %v561_v12 = vpack.c.bf16 %v369_v10, %v367_v9  ;;  %v269_v13 = vld [vmem:[%s4184_s22 + $0xd0] sm:$0xff]  ;;  %1676 = vmatpush.bf16.msra.mxu1 %v529_v7  ;;  %s3396_s9 = sshll.u32 %s239_s8, 3 }
  0x18   : > { %v299_v14 = vld [vmem:[%s4184_s22 + $0x1c0] sm:$0xff]  ;;  %v301_v15 = vld [vmem:[%s4184_s22 + $0x1d0] sm:$0xff]  ;;  %1765 = vmatpush.bf16.msra.mxu2 %v545_v8  ;;  %v511_v16 = vpack.c.bf16 %v269_v13, %v267_v11  ;;  %s5082_s12 = scalar_lea.vmem %s5672_s3, %s3396_s9 }
  0x19   : > { %v527_v17 = vpack.c.bf16 %v301_v15, %v299_v14  ;;  %v331_v18 = vld [vmem:[%s4184_s22 + $0x2c0] sm:$0xff]  ;;  %v333_v19 = vld [vmem:[%s4184_s22 + $0x2d0] sm:$0xff]  ;;  %1854 = vmatpush.bf16.msra.mxu3 %v561_v12 }
  0x1a   : > { %v363_v20 = vld [vmem:[%s4184_s22 + $0x3c0] sm:$0xff]  ;;  %v543_v21 = vpack.c.bf16 %v333_v19, %v331_v18  ;;  %v365_v22 = vld [vmem:[%s4184_s22 + $0x3d0] sm:$0xff]  ;;  %1588 = vmatpush.bf16.msra.mxu0 %v511_v16 }
  0x1b   : > { %v263_v23 = vld [vmem:[%s4184_s22 + $0xa0] sm:$0xff]  ;;  %v265_v24 = vld [vmem:[%s4184_s22 + $0xb0] sm:$0xff]  ;;  %v559_v25 = vpack.c.bf16 %v365_v22, %v363_v20  ;;  %1677 = vmatpush.bf16.msra.mxu1 %v527_v17 }
  0x1c   : > { %v295_v26 = vld [vmem:[%s4184_s22 + $0x1a0] sm:$0xff]  ;;  %v297_v27 = vld [vmem:[%s4184_s22 + $0x1b0] sm:$0xff]  ;;  %v509_v30 = vpack.c.bf16 %v265_v24, %v263_v23  ;;  %1766 = vmatpush.bf16.msra.mxu2 %v543_v21 }
  0x1d   : > { %v327_v28 = vld [vmem:[%s4184_s22 + $0x2a0] sm:$0xff]  ;;  %v329_v31 = vld [vmem:[%s4184_s22 + $0x2b0] sm:$0xff]  ;;  %v525_v34 = vpack.c.bf16 %v297_v27, %v295_v26  ;;  %1855 = vmatpush.bf16.msra.mxu3 %v559_v25 }
  0x1e   : > { %v359_v32 = vld [vmem:[%s4184_s22 + $0x3a0] sm:$0xff]  ;;  %v361_v33 = vld [vmem:[%s4184_s22 + $0x3b0] sm:$0xff]  ;;  %v541_v35 = vpack.c.bf16 %v329_v31, %v327_v28  ;;  %1589 = vmatpush.bf16.msra.mxu0 %v509_v30 }
  0x1f   : > { %v259_v36 = vld [vmem:[%s4184_s22 + $0x80] sm:$0xff]  ;;  %v261_v37 = vld [vmem:[%s4184_s22 + $0x90] sm:$0xff]  ;;  %v557_v39 = vpack.c.bf16 %v361_v33, %v359_v32  ;;  %1678 = vmatpush.bf16.msra.mxu1 %v525_v34 }
  0x20   : > { %v291_v38 = vld [vmem:[%s4184_s22 + $0x180] sm:$0xff]  ;;  %v293_v40 = vld [vmem:[%s4184_s22 + $0x190] sm:$0xff]  ;;  %v507_v45 = vpack.c.bf16 %v261_v37, %v259_v36  ;;  %1767 = vmatpush.bf16.msra.mxu2 %v541_v35 }
  0x21   : > { %v323_v41 = vld [vmem:[%s4184_s22 + $0x280] sm:$0xff]  ;;  %v325_v42 = vld [vmem:[%s4184_s22 + $0x290] sm:$0xff]  ;;  %v523_v46 = vpack.c.bf16 %v293_v40, %v291_v38  ;;  %1856 = vmatpush.bf16.msra.mxu3 %v557_v39 }
  0x22   : > { %v355_v43 = vld [vmem:[%s4184_s22 + $0x380] sm:$0xff]  ;;  %v357_v44 = vld [vmem:[%s4184_s22 + $0x390] sm:$0xff]  ;;  %v539_v47 = vpack.c.bf16 %v325_v42, %v323_v41  ;;  %1590 = vmatpush.bf16.msra.mxu0 %v507_v45  ;;  %v3407_v41 = vld [vmem:[%s4257_s29 + $0x8] sm:$0xf] }
  0x23   : > { %v255_v48 = vld [vmem:[%s4184_s22 + $0x60] sm:$0xff]  ;;  %v257_v49 = vld [vmem:[%s4184_s22 + $0x70] sm:$0xff]  ;;  %v555_v51 = vpack.c.bf16 %v357_v44, %v355_v43  ;;  %1679 = vmatpush.bf16.msra.mxu1 %v523_v46  ;;  %v3918_v42 = vld [vmem:[%s4257_s29 + $0x24] sm:$0xf0] }
  0x24   : > { %v287_v50 = vld [vmem:[%s4184_s22 + $0x160] sm:$0xff]  ;;  %v289_v52 = vld [vmem:[%s4184_s22 + $0x170] sm:$0xff]  ;;  %v505_v57 = vpack.c.bf16 %v257_v49, %v255_v48  ;;  %1768 = vmatpush.bf16.msra.mxu2 %v539_v47  ;;  %v3914_v43 = vld [vmem:[%s4257_s29 + $0xc] sm:$0xf] }
  0x25   : > { %v319_v53 = vld [vmem:[%s4184_s22 + $0x260] sm:$0xff]  ;;  %v321_v54 = vld [vmem:[%s4184_s22 + $0x270] sm:$0xff]  ;;  %v521_v58 = vpack.c.bf16 %v289_v52, %v287_v50  ;;  %1857 = vmatpush.bf16.msra.mxu3 %v555_v51  ;;  %v3409_v45 = vld [vmem:[%s4257_s29 + $0x28] sm:$0xf0] }
  0x26   : > { %v351_v55 = vld [vmem:[%s4184_s22 + $0x360] sm:$0xff]  ;;  %v353_v56 = vld [vmem:[%s4184_s22 + $0x370] sm:$0xff]  ;;  %v537_v59 = vpack.c.bf16 %v321_v54, %v319_v53  ;;  %1591 = vmatpush.bf16.msra.mxu0 %v505_v57 }
  0x27   : > { %v251_v60 = vld [vmem:[%s4184_s22 + $0x40] sm:$0xff]  ;;  %v253_v61 = vld [vmem:[%s4184_s22 + $0x50] sm:$0xff]  ;;  %v553_v63 = vpack.c.bf16 %v353_v56, %v351_v55  ;;  %1680 = vmatpush.bf16.msra.mxu1 %v521_v58  ;;  %v4293_v55 = vor.u32 %v3918_v42, %v3407_v41  ;;  %v4295_v56 = vor.u32 %v3914_v43, %v3409_v45 }
  0x28   : > { %v283_v62 = vld [vmem:[%s4184_s22 + $0x140] sm:$0xff]  ;;  %v285_v0 = vld [vmem:[%s4184_s22 + $0x150] sm:$0xff]  ;;  %v503_v5 = vpack.c.bf16 %v253_v61, %v251_v60  ;;  %1769 = vmatpush.bf16.msra.mxu2 %v537_v59  ;;  %v756_v59 = vld [vmem:[%s4265_s5 + $0x8] sm:$0xff] }
  0x29   : > { %v315_v1 = vld [vmem:[%s4184_s22 + $0x240] sm:$0xff]  ;;  %v317_v2 = vld [vmem:[%s4184_s22 + $0x250] sm:$0xff]  ;;  %v519_v6 = vpack.c.bf16 %v285_v0, %v283_v62  ;;  %1858 = vmatpush.bf16.msra.mxu3 %v553_v63 }
  0x2a   : > { %v347_v3 = vld [vmem:[%s4184_s22 + $0x340] sm:$0xff]  ;;  %v349_v4 = vld [vmem:[%s4184_s22 + $0x350] sm:$0xff]  ;;  %v535_v7 = vpack.c.bf16 %v317_v2, %v315_v1  ;;  %1592 = vmatpush.bf16.msra.mxu0 %v503_v5  ;;  %v758_v5 = vld [vmem:[%s4265_s5 + $0x18] sm:$0xff] }
  0x2b   : > { %v247_v8 = vld [vmem:[%s4184_s22 + $0x20] sm:$0xff]  ;;  %v249_v9 = vld [vmem:[%s4184_s22 + $0x30] sm:$0xff]  ;;  %v551_v11 = vpack.c.bf16 %v349_v4, %v347_v3  ;;  %1681 = vmatpush.bf16.msra.mxu1 %v519_v6 }
  0x2c   : > { %v279_v10 = vld [vmem:[%s4184_s22 + $0x120] sm:$0xff]  ;;  %v281_v12 = vld [vmem:[%s4184_s22 + $0x130] sm:$0xff]  ;;  %v501_v18 = vpack.c.bf16 %v249_v9, %v247_v8  ;;  %1770 = vmatpush.bf16.msra.mxu2 %v535_v7 }
  0x2d   : > { %v311_v13 = vld [vmem:[%s4184_s22 + $0x220] sm:$0xff]  ;;  %v313_v14 = vld [vmem:[%s4184_s22 + $0x230] sm:$0xff]  ;;  %v517_v22 = vpack.c.bf16 %v281_v12, %v279_v10  ;;  %1859 = vmatpush.bf16.msra.mxu3 %v551_v11 }
  0x2e   : > { %v343_v15 = vld [vmem:[%s4184_s22 + $0x320] sm:$0xff]  ;;  %v345_v16 = vld [vmem:[%s4184_s22 + $0x330] sm:$0xff]  ;;  %v533_v23 = vpack.c.bf16 %v313_v14, %v311_v13  ;;  %1593 = vmatpush.bf16.msra.mxu0 %v501_v18  ;;  %v3439_v13 = vld [vmem:[%s4257_s29 + $0x48] sm:$0xf] }
  0x2f   : > { %v243_v17 = vld [vmem:[%s4184_s22] sm:$0xff]  ;;  %v245_v19 = vld [vmem:[%s4184_s22 + $0x10] sm:$0xff]  ;;  %v549_v27 = vpack.c.bf16 %v345_v16, %v343_v15  ;;  %1682 = vmatpush.bf16.msra.mxu1 %v517_v22  ;;  %v3926_v14 = vld [vmem:[%s4257_s29 + $0x64] sm:$0xf0] }
  0x30   : > { %v275_v20 = vld [vmem:[%s4184_s22 + $0x100] sm:$0xff]  ;;  %v277_v21 = vld [vmem:[%s4184_s22 + $0x110] sm:$0xff]  ;;  %v499_v35 = vpack.c.bf16 %v245_v19, %v243_v17  ;;  %1771 = vmatpush.bf16.msra.mxu2 %v533_v23  ;;  %v3922_v15 = vld [vmem:[%s4257_s29 + $0x4c] sm:$0xf]  ;;  %v4323_v19 = vor.u32 %v3926_v14, %v3439_v13 }
  0x31   : > { %v307_v24 = vld [vmem:[%s4184_s22 + $0x200] sm:$0xff]  ;;  %v309_v25 = vld [vmem:[%s4184_s22 + $0x210] sm:$0xff]  ;;  %v515_v39 = vpack.c.bf16 %v277_v21, %v275_v20  ;;  %1860 = vmatpush.bf16.msra.mxu3 %v549_v27  ;;  %v3441_v16 = vld [vmem:[%s4257_s29 + $0x68] sm:$0xf0] }
  0x32   : > { %v339_v26 = vld [vmem:[%s4184_s22 + $0x300] sm:$0xff]  ;;  %v341_v28 = vld [vmem:[%s4184_s22 + $0x310] sm:$0xff]  ;;  %v531_v40 = vpack.c.bf16 %v309_v25, %v307_v24  ;;  %1594 = vmatpush.bf16.msra.mxu0 %v499_v35  ;;  %v4325_v20 = vor.u32 %v3922_v15, %v3441_v16  ;;  %v3934_v27 = vld [vmem:[%s4257_s29 + $0xa4] sm:$0xf0] }
  0x33   : > { %v3399_v29 = vld [vmem:[%s4257_s29] sm:$0xf]  ;;  %v3913_v31 = vld [vmem:[%s4257_s29 + $0x4] sm:$0xf]  ;;  %v465_v33 = vld [vmem:[%s4184_s22 + $0x6f0] sm:$0xff]  ;;  %v547_v44 = vpack.c.bf16 %v341_v28, %v339_v26  ;;  %1683 = vmatpush.bf16.msra.mxu1 %v515_v39 }
  0x34   : > { %v3917_v30 = vld [vmem:[%s4257_s29 + $0x1c] sm:$0xf0]  ;;  %v3401_v36 = vld [vmem:[%s4257_s29 + $0x20] sm:$0xf0]  ;;  %v497_v38 = vld [vmem:[%s4184_s22 + $0x7f0] sm:$0xff]  ;;  %1772 = vmatpush.bf16.msra.mxu2 %v531_v40 }
  0x35   : > { %v463_v32 = vld [vmem:[%s4184_s22 + $0x6e0] sm:$0xff]  ;;  %v401_v48 = vld [vmem:[%s4184_s22 + $0x4f0] sm:$0xff]  ;;  %v4286_v49 = vor.u32 %v3917_v30, %v3399_v29  ;;  %v4291_v54 = vor.u32 %v3913_v31, %v3401_v36  ;;  %1861 = vmatpush.bf16.msra.mxu3 %v547_v44  ;;  %v3471_v26 = vld [vmem:[%s4257_s29 + $0x88] sm:$0xf] }
  0x36   : > { %v755_v34 = vld [vmem:[%s4265_s5] sm:$0xff]  ;;  %v609_v46 = vpack.c.bf16 %v465_v33, %v463_v32  ;;  %v433_v52 = vld [vmem:[%s4184_s22 + $0x5f0] sm:$0xff]  ;;  %v3930_v28 = vld [vmem:[%s4257_s29 + $0x8c] sm:$0xf]  ;;  %v4344_v32 = vor.u32 %v3934_v27, %v3471_v26 }
  0x37   : > { %v495_v37 = vld [vmem:[%s4184_s22 + $0x7e0] sm:$0xff]  ;;  %789 = vperm.xlu0 %4082, %v755_v34   ;;  %v757_v53 = vld [vmem:[%s4265_s5 + $0x10] sm:$0xff]  ;;  %1595 = vmatmul.bf16.vlgmr.msra.gmra.mxu0 %v4286_v49  ;;  %v3473_v29 = vld [vmem:[%s4257_s29 + $0xa8] sm:$0xf0] }
  0x38   : > { %v399_v47 = vld [vmem:[%s4184_s22 + $0x4e0] sm:$0xff]  ;;  %v625_v50 = vpack.c.bf16 %v497_v38, %v495_v37  ;;  %799 = vperm.xlu1 %4083, %v757_v53   ;;  %2121 = vmatpush.bf16.msrb.mxu2 %v609_v46  ;;  %v461_v61 = vld [vmem:[%s4184_s22 + $0x6d0] sm:$0xff]  ;;  %v4346_v33 = vor.u32 %v3930_v28, %v3473_v29  ;;  %v762_v44 = vld [vmem:[%s4265_s5 + $0x38] sm:$0xff] }
  0x39   : > { %v431_v51 = vld [vmem:[%s4184_s22 + $0x5e0] sm:$0xff]  ;;  %v577_v57 = vpack.c.bf16 %v401_v48, %v399_v47  ;;  %1684 = vmatmul.bf16.vlgmr.msra.gmra.mxu1 %v4291_v54  ;;  %1773 = vmatmul.bf16.vlgmr.msra.gmra.mxu2 %v4293_v55  ;;  %v397_v0 = vld [vmem:[%s4184_s22 + $0x4d0] sm:$0xff]  ;;  %v3503_v53 = vld [vmem:[%s4257_s29 + $0xc8] sm:$0xf] }
  0x3a   : > { %v593_v58 = vpack.c.bf16 %v433_v52, %v431_v51  ;;  %2210 = vmatpush.bf16.msrb.mxu3 %v625_v50  ;;  %v459_v60 = vld [vmem:[%s4184_s22 + $0x6c0] sm:$0xff]  ;;  %v493_v2 = vld [vmem:[%s4184_s22 + $0x7d0] sm:$0xff] }
  0x3b   : > { %1862 = vmatmul.bf16.vlgmr.msra.gmra.mxu3 %v4295_v56  ;;  %1943 = vmatpush.bf16.msrb.mxu0 %v577_v57  ;;  %v395_v62 = vld [vmem:[%s4184_s22 + $0x4c0] sm:$0xff]  ;;  %v607_v63 = vpack.c.bf16 %v461_v61, %v459_v60  ;;  %v429_v7 = vld [vmem:[%s4184_s22 + $0x5d0] sm:$0xff]  ;;  %v3942_v57 = vld [vmem:[%s4257_s29 + $0xe4] sm:$0xf0] }
  0x3c   : > { %2032 = vmatpush.bf16.msrb.mxu1 %v593_v58  ;;  %v491_v1 = vld [vmem:[%s4184_s22 + $0x7c0] sm:$0xff]  ;;  %v575_v3 = vpack.c.bf16 %v397_v0, %v395_v62  ;;  %v761_v21 = vld [vmem:[%s4265_s5 + $0x30] sm:$0xff]  ;;  %v760_v58 = vld [vmem:[%s4265_s5 + $0x28] sm:$0xff] }
  0x3d   : > { %v623_v4 = vpack.c.bf16 %v493_v2, %v491_v1  ;;  %v427_v6 = vld [vmem:[%s4184_s22 + $0x5c0] sm:$0xff]  ;;  %2122 = vmatpush.bf16.msrb.mxu2 %v607_v63  ;;  %v457_v35 = vld [vmem:[%s4184_s22 + $0x6b0] sm:$0xff]  ;;  %v3505_v60 = vld [vmem:[%s4257_s29 + $0xe8] sm:$0xf0]  ;;  %v4375_v63 = vor.u32 %v3942_v57, %v3503_v53 }
  0x3e   : > { %v591_v8 = vpack.c.bf16 %v429_v7, %v427_v6  ;;  %v3431_v9 = vld [vmem:[%s4257_s29 + $0x40] sm:$0xf]  ;;  %v3921_v11 = vld [vmem:[%s4257_s29 + $0x44] sm:$0xf]  ;;  %v393_v38 = vld [vmem:[%s4184_s22 + $0x4b0] sm:$0xff] }
  0x3f   : > { %794 = vperm.xlu0 %4082, %v756_v59   ;;  %1944 = vmatpush.bf16.msrb.mxu0 %v575_v3  ;;  %v3925_v10 = vld [vmem:[%s4257_s29 + $0x5c] sm:$0xf0]  ;;  %v3433_v12 = vld [vmem:[%s4257_s29 + $0x60] sm:$0xf0]  ;;  %v489_v40 = vld [vmem:[%s4184_s22 + $0x7b0] sm:$0xff] }
  0x40   : > { %804 = vperm.xlu1 %4083, %v758_v5   ;;  %2211 = vmatpush.bf16.msrb.mxu3 %v623_v4  ;;  %v4319_v17 = vor.u32 %v3925_v10, %v3431_v9  ;;  %v4321_v18 = vor.u32 %v3921_v11, %v3433_v12  ;;  %v3463_v22 = vld [vmem:[%s4257_s29 + $0x80] sm:$0xf]  ;;  %v3929_v24 = vld [vmem:[%s4257_s29 + $0x84] sm:$0xf]  ;;  %v425_v46 = vld [vmem:[%s4184_s22 + $0x5b0] sm:$0xff] }
  0x41   : > { %2033 = vmatpush.bf16.msrb.mxu1 %v591_v8  ;;  %v3933_v23 = vld [vmem:[%s4257_s29 + $0x9c] sm:$0xf0]  ;;  %v3465_v25 = vld [vmem:[%s4257_s29 + $0xa0] sm:$0xf0]  ;;  %v3938_v59 = vld [vmem:[%s4257_s29 + $0xcc] sm:$0xf] }
  0x42   : > { %v4340_v30 = vor.u32 %v3933_v23, %v3463_v22  ;;  %v4342_v31 = vor.u32 %v3929_v24, %v3465_v25  ;;  %v455_v34 = vld [vmem:[%s4184_s22 + $0x6a0] sm:$0xff]  ;;  %v4377_v0 = vor.u32 %v3938_v59, %v3505_v60  ;;  %v764_v1 = vld [vmem:[%s4265_s5 + $0x48] sm:$0xff]  ;;  %v765_v2 = vld [vmem:[%s4265_s5 + $0x50] sm:$0xff] }
  0x43   : > { %v391_v36 = vld [vmem:[%s4184_s22 + $0x4a0] sm:$0xff]  ;;  %v605_v37 = vpack.c.bf16 %v457_v35, %v455_v34  ;;  %v3535_v7 = vld [vmem:[%s4257_s29 + $0x108] sm:$0xf]  ;;  %v3946_v9 = vld [vmem:[%s4257_s29 + $0x10c] sm:$0xf] }
  0x44   : > { %v487_v39 = vld [vmem:[%s4184_s22 + $0x7a0] sm:$0xff]  ;;  %v573_v41 = vpack.c.bf16 %v393_v38, %v391_v36  ;;  %v3950_v8 = vld [vmem:[%s4257_s29 + $0x124] sm:$0xf0]  ;;  %v3537_v10 = vld [vmem:[%s4257_s29 + $0x128] sm:$0xf0] }
  0x45   : > { %v621_v42 = vpack.c.bf16 %v489_v40, %v487_v39  ;;  %v759_v43 = vld [vmem:[%s4265_s5 + $0x20] sm:$0xff]  ;;  %2123 = vmatpush.bf16.msrb.mxu2 %v605_v37  ;;  %v4397_v13 = vor.u32 %v3950_v8, %v3535_v7  ;;  %v4399_v14 = vor.u32 %v3946_v9, %v3537_v10  ;;  %v453_v16 = vld [vmem:[%s4184_s22 + $0x690] sm:$0xff]  ;;  %v3599_v59 = vld [vmem:[%s4257_s29 + $0x188] sm:$0xf] }
  0x46   : > { %v423_v45 = vld [vmem:[%s4184_s22 + $0x5a0] sm:$0xff]  ;;  %809 = vperm.xlu2 %4084, %v759_v43   ;;  %1945 = vmatpush.bf16.msrb.mxu0 %v573_v41  ;;  %v389_v23 = vld [vmem:[%s4184_s22 + $0x490] sm:$0xff]  ;;  %v3567_v41 = vld [vmem:[%s4257_s29 + $0x148] sm:$0xf] }
  0x47   : > { %1600 = vmatmul.bf16.gmra.mxu0 %v4319_v17  ;;  %819 = vperm.xlu0 %4082, %v761_v21   ;;  %v589_v47 = vpack.c.bf16 %v425_v46, %v423_v45  ;;  %v3495_v48 = vld [vmem:[%s4257_s29 + $0xc0] sm:$0xf]  ;;  %v3937_v51 = vld [vmem:[%s4257_s29 + $0xc4] sm:$0xf]  ;;  %5804 = vst [vmem:[#allocation4_spill] sm:$0xff] %v4397_v13  ;;  %v485_v25 = vld [vmem:[%s4184_s22 + $0x790] sm:$0xff] }
  0x48   : > { %2212 = vmatpush.bf16.msrb.mxu3 %v621_v42  ;;  %824 = vperm.xlu1 %4083, %v762_v44   ;;  %v3941_v50 = vld [vmem:[%s4257_s29 + $0xdc] sm:$0xf0]  ;;  %v3497_v52 = vld [vmem:[%s4257_s29 + $0xe0] sm:$0xf0]  ;;  %5805 = vst [vmem:[#allocation5_spill] sm:$0xff] %v4399_v14  ;;  %v421_v29 = vld [vmem:[%s4184_s22 + $0x590] sm:$0xff] }
  0x49   : > { %1689 = vmatmul.bf16.gmra.mxu1 %v4321_v18  ;;  %1778 = vmatmul.bf16.gmra.mxu2 %v4323_v19  ;;  %v4371_v61 = vor.u32 %v3941_v50, %v3495_v48  ;;  %v4373_v62 = vor.u32 %v3937_v51, %v3497_v52  ;;  %v3527_v3 = vld [vmem:[%s4257_s29 + $0x100] sm:$0xf]  ;;  %v3945_v5 = vld [vmem:[%s4257_s29 + $0x104] sm:$0xf]  ;;  %v3958_v42 = vld [vmem:[%s4257_s29 + $0x164] sm:$0xf0] }
  0x4a   : > { %2034 = vmatpush.bf16.msrb.mxu1 %v589_v47  ;;  %v3949_v4 = vld [vmem:[%s4257_s29 + $0x11c] sm:$0xf0]  ;;  %v3529_v6 = vld [vmem:[%s4257_s29 + $0x120] sm:$0xf0]  ;;  %v3954_v43 = vld [vmem:[%s4257_s29 + $0x14c] sm:$0xf]  ;;  %v4427_v47 = vor.u32 %v3958_v42, %v3567_v41 }
  0x4b   : > { %1867 = vmatmul.bf16.gmra.mxu3 %v4325_v20  ;;  %v4393_v11 = vor.u32 %v3949_v4, %v3527_v3  ;;  %v4395_v12 = vor.u32 %v3945_v5, %v3529_v6  ;;  %v451_v15 = vld [vmem:[%s4184_s22 + $0x680] sm:$0xff]  ;;  %v3569_v44 = vld [vmem:[%s4257_s29 + $0x168] sm:$0xf0]  ;;  %v766_v51 = vld [vmem:[%s4265_s5 + $0x58] sm:$0xff] }
  0x4c   : > { %v387_v21 = vld [vmem:[%s4184_s22 + $0x480] sm:$0xff]  ;;  %v603_v22 = vpack.c.bf16 %v453_v16, %v451_v15  ;;  %5808 = vst [vmem:[#allocation8_spill] sm:$0xff] %v4427_v47  ;;  %v4429_v48 = vor.u32 %v3954_v43, %v3569_v44  ;;  %v768_v50 = vld [vmem:[%s4265_s5 + $0x68] sm:$0xff]  ;;  %v449_v8 = vld [vmem:[%s4184_s22 + $0x670] sm:$0xff] }
  0x4d   : > { %5802 = vst [vmem:[#allocation2_spill] sm:$0xff] %v4393_v11  ;;  %v483_v24 = vld [vmem:[%s4184_s22 + $0x780] sm:$0xff]  ;;  %v571_v26 = vpack.c.bf16 %v389_v23, %v387_v21  ;;  %v3966_v60 = vld [vmem:[%s4257_s29 + $0x1a4] sm:$0xf0]  ;;  %v385_v15 = vld [vmem:[%s4184_s22 + $0x470] sm:$0xff] }
  0x4e   : > { %814 = vperm.xlu2 %4084, %v760_v58   ;;  %5803 = vst [vmem:[#allocation3_spill] sm:$0xff] %v4395_v12  ;;  %v619_v27 = vpack.c.bf16 %v485_v25, %v483_v24  ;;  %v419_v28 = vld [vmem:[%s4184_s22 + $0x580] sm:$0xff]  ;;  %2124 = vmatpush.bf16.msrb.mxu2 %v603_v22  ;;  %v4449_v5 = vor.u32 %v3966_v60, %v3599_v59  ;;  %v481_v21 = vld [vmem:[%s4184_s22 + $0x770] sm:$0xff]  ;;  %v770_v24 = vld [vmem:[%s4265_s5 + $0x78] sm:$0xff] }
  0x4f   : > { %834 = vperm.xlu0 %4082, %v764_v1   ;;  %v763_v34 = vld [vmem:[%s4265_s5 + $0x40] sm:$0xff]  ;;  %v587_v35 = vpack.c.bf16 %v421_v29, %v419_v28  ;;  %1946 = vmatpush.bf16.msrb.mxu0 %v571_v26  ;;  %5809 = vst [vmem:[#allocation9_spill] sm:$0xff] %v4429_v48  ;;  %v3962_v1 = vld [vmem:[%s4257_s29 + $0x18c] sm:$0xf]  ;;  %v417_v26 = vld [vmem:[%s4184_s22 + $0x570] sm:$0xff] }
  0x50   : > { %839 = vperm.xlu1 %4083, %v765_v2   ;;  %v767_v36 = vld [vmem:[%s4265_s5 + $0x60] sm:$0xff]  ;;  %2213 = vmatpush.bf16.msrb.mxu3 %v619_v27  ;;  %v3601_v2 = vld [vmem:[%s4257_s29 + $0x1a8] sm:$0xf0]  ;;  %5812 = vst [vmem:[#allocation12_spill] sm:$0xff] %v4449_v5  ;;  %v3663_v59 = vld [vmem:[%s4257_s29 + $0x208] sm:$0xf] }
  0x51   : > { %2035 = vmatpush.bf16.msrb.mxu1 %v587_v35  ;;  %v3559_v37 = vld [vmem:[%s4257_s29 + $0x140] sm:$0xf]  ;;  %v3953_v39 = vld [vmem:[%s4257_s29 + $0x144] sm:$0xf]  ;;  %v4451_v6 = vor.u32 %v3962_v1, %v3601_v2  ;;  %v3982_v60 = vld [vmem:[%s4257_s29 + $0x224] sm:$0xf0] }
  0x52   : > { %v3957_v38 = vld [vmem:[%s4257_s29 + $0x15c] sm:$0xf0]  ;;  %v3561_v40 = vld [vmem:[%s4257_s29 + $0x160] sm:$0xf0]  ;;  %v3978_v1 = vld [vmem:[%s4257_s29 + $0x20c] sm:$0xf] }
  0x53   : > { %v4423_v45 = vor.u32 %v3957_v38, %v3559_v37  ;;  %v4425_v46 = vor.u32 %v3953_v39, %v3561_v40  ;;  %v3591_v52 = vld [vmem:[%s4257_s29 + $0x180] sm:$0xf]  ;;  %v3961_v57 = vld [vmem:[%s4257_s29 + $0x184] sm:$0xf]  ;;  %5813 = vst [vmem:[#allocation13_spill] sm:$0xff] %v4451_v6 }
  0x54   : > { %v3965_v53 = vld [vmem:[%s4257_s29 + $0x19c] sm:$0xf0]  ;;  %v3593_v58 = vld [vmem:[%s4257_s29 + $0x1a0] sm:$0xf0]  ;;  %v3974_v37 = vld [vmem:[%s4257_s29 + $0x1e4] sm:$0xf0] }
  0x55   : > { %5806 = vst [vmem:[#allocation6_spill] sm:$0xff] %v4423_v45  ;;  %v4445_v3 = vor.u32 %v3965_v53, %v3591_v52  ;;  %v4447_v4 = vor.u32 %v3961_v57, %v3593_v58  ;;  %v447_v7 = vld [vmem:[%s4184_s22 + $0x660] sm:$0xff]  ;;  %v3970_v38 = vld [vmem:[%s4257_s29 + $0x1cc] sm:$0xf] }
  0x56   : > { %829 = vperm.xlu2 %4084, %v763_v34   ;;  %5807 = vst [vmem:[#allocation7_spill] sm:$0xff] %v4425_v46  ;;  %v383_v9 = vld [vmem:[%s4184_s22 + $0x460] sm:$0xff]  ;;  %v601_v10 = vpack.c.bf16 %v449_v8, %v447_v7  ;;  %v3633_v39 = vld [vmem:[%s4257_s29 + $0x1e8] sm:$0xf0] }
  0x57   : > { %1605 = vmatmul.bf16.gmra.mxu0 %v4340_v30  ;;  %849 = vperm.xlu0 %4082, %v767_v36   ;;  %5810 = vst [vmem:[#allocation10_spill] sm:$0xff] %v4445_v3  ;;  %v479_v16 = vld [vmem:[%s4184_s22 + $0x760] sm:$0xff]  ;;  %v569_v22 = vpack.c.bf16 %v385_v15, %v383_v9  ;;  %v3631_v36 = vld [vmem:[%s4257_s29 + $0x1c8] sm:$0xf]  ;;  %v4480_v43 = vor.u32 %v3970_v38, %v3633_v39  ;;  %v3665_v2 = vld [vmem:[%s4257_s29 + $0x228] sm:$0xf0] }
  0x58   : > { %854 = vperm.xlu1 %4083, %v768_v50   ;;  %5811 = vst [vmem:[#allocation11_spill] sm:$0xff] %v4447_v4  ;;  %v617_v23 = vpack.c.bf16 %v481_v21, %v479_v16  ;;  %2125 = vmatpush.bf16.msrb.mxu2 %v601_v10  ;;  %v415_v25 = vld [vmem:[%s4184_s22 + $0x560] sm:$0xff]  ;;  %v4478_v42 = vor.u32 %v3974_v37, %v3631_v36  ;;  %v769_v50 = vld [vmem:[%s4265_s5 + $0x70] sm:$0xff]  ;;  %v774_v39 = vld [vmem:[%s4265_s5 + $0x98] sm:$0xff] }
  0x59   : > { %1694 = vmatmul.bf16.gmra.mxu1 %v4342_v31  ;;  %1783 = vmatmul.bf16.gmra.mxu2 %v4344_v32  ;;  %v585_v27 = vpack.c.bf16 %v417_v26, %v415_v25  ;;  %v3623_v28 = vld [vmem:[%s4257_s29 + $0x1c0] sm:$0xf]  ;;  %v3969_v34 = vld [vmem:[%s4257_s29 + $0x1c4] sm:$0xf]  ;;  %5817 = vst [vmem:[#allocation17_spill] sm:$0xff] %v4480_v43  ;;  %v4502_v10 = vor.u32 %v3982_v60, %v3663_v59  ;;  %v445_v25 = vld [vmem:[%s4184_s22 + $0x650] sm:$0xff] }
  0x5a   : > { %1947 = vmatpush.bf16.msrb.mxu0 %v569_v22  ;;  %2214 = vmatpush.bf16.msrb.mxu3 %v617_v23  ;;  %v3973_v29 = vld [vmem:[%s4257_s29 + $0x1dc] sm:$0xf0]  ;;  %v3625_v35 = vld [vmem:[%s4257_s29 + $0x1e0] sm:$0xf0]  ;;  %5816 = vst [vmem:[#allocation16_spill] sm:$0xff] %v4478_v42  ;;  %v4505_v21 = vor.u32 %v3978_v1, %v3665_v2  ;;  %v773_v22 = vld [vmem:[%s4265_s5 + $0x90] sm:$0xff] }
  0x5b   : > { %1872 = vmatmul.bf16.gmra.mxu3 %v4346_v33  ;;  %2036 = vmatpush.bf16.msrb.mxu1 %v585_v27  ;;  %v4474_v40 = vor.u32 %v3973_v29, %v3623_v28  ;;  %v4476_v41 = vor.u32 %v3969_v34, %v3625_v35  ;;  %v771_v44 = vld [vmem:[%s4265_s5 + $0x80] sm:$0xff]  ;;  %5821 = vst [vmem:[#allocation21_spill] sm:$0xff] %v4502_v10  ;;  %v381_v29 = vld [vmem:[%s4184_s22 + $0x450] sm:$0xff] }
  0x5c   : > { %v3655_v52 = vld [vmem:[%s4257_s29 + $0x200] sm:$0xf]  ;;  %v3977_v57 = vld [vmem:[%s4257_s29 + $0x204] sm:$0xf]  ;;  %5822 = vst [vmem:[#allocation22_spill] sm:$0xff] %v4505_v21  ;;  %v477_v35 = vld [vmem:[%s4184_s22 + $0x750] sm:$0xff] }
  0x5d   : > { %5814 = vst [vmem:[#allocation14_spill] sm:$0xff] %v4474_v40  ;;  %v3981_v53 = vld [vmem:[%s4257_s29 + $0x21c] sm:$0xf0]  ;;  %v3657_v58 = vld [vmem:[%s4257_s29 + $0x220] sm:$0xf0]  ;;  %v413_v60 = vld [vmem:[%s4184_s22 + $0x550] sm:$0xff] }
  0x5e   : > { %844 = vperm.xlu2 %4084, %v766_v51   ;;  %5815 = vst [vmem:[#allocation15_spill] sm:$0xff] %v4476_v41  ;;  %v4498_v7 = vor.u32 %v3981_v53, %v3655_v52  ;;  %v4500_v9 = vor.u32 %v3977_v57, %v3657_v58  ;;  %v379_v26 = vld [vmem:[%s4184_s22 + $0x440] sm:$0xff] }
  0x5f   : > { %864 = vperm.xlu0 %4082, %v770_v24   ;;  %v443_v24 = vld [vmem:[%s4184_s22 + $0x640] sm:$0xff]  ;;  %v567_v37 = vpack.c.bf16 %v381_v29, %v379_v26  ;;  %v3990_v26 = vld [vmem:[%s4257_s29 + $0x264] sm:$0xf0]  ;;  %v3697_v29 = vld [vmem:[%s4257_s29 + $0x268] sm:$0xf0] }
  0x60   : > { %869 = vperm.xlu1 %4083, %v771_v44   ;;  %5819 = vst [vmem:[#allocation19_spill] sm:$0xff] %v4498_v7  ;;  %v599_v28 = vpack.c.bf16 %v445_v25, %v443_v24  ;;  %v475_v34 = vld [vmem:[%s4184_s22 + $0x740] sm:$0xff]  ;;  %v3695_v25 = vld [vmem:[%s4257_s29 + $0x248] sm:$0xf] }
  0x61   : > { %5820 = vst [vmem:[#allocation20_spill] sm:$0xff] %v4500_v9  ;;  %v615_v38 = vpack.c.bf16 %v477_v35, %v475_v34  ;;  %1948 = vmatpush.bf16.msrb.mxu0 %v567_v37  ;;  %v411_v59 = vld [vmem:[%s4184_s22 + $0x540] sm:$0xff] }
  0x62   : > { %2126 = vmatpush.bf16.msrb.mxu2 %v599_v28  ;;  %v583_v2 = vpack.c.bf16 %v413_v60, %v411_v59  ;;  %v3689_v24 = vld [vmem:[%s4257_s29 + $0x260] sm:$0xf0]  ;;  %v3986_v28 = vld [vmem:[%s4257_s29 + $0x24c] sm:$0xf] }
  0x63   : > { %2215 = vmatpush.bf16.msrb.mxu3 %v615_v38  ;;  %v776_v60 = vld [vmem:[%s4265_s5 + $0xa8] sm:$0xff] }
  0x64   : > { %2037 = vmatpush.bf16.msrb.mxu1 %v583_v2 }
  0x66   : > { %859 = vperm.xlu2 %4084, %v769_v50  }
  0x67   : > { %1610 = vmatmul.bf16.gmra.mxu0 %v4371_v61  ;;  %879 = vperm.xlu0 %4082, %v773_v22   ;;  %v3989_v22 = vld [vmem:[%s4257_s29 + $0x25c] sm:$0xf0] }
  0x68   : > { %884 = vperm.xlu1 %4083, %v774_v39  }
  0x69   : > { %1699 = vmatmul.bf16.gmra.mxu1 %v4373_v62  ;;  %1788 = vmatmul.bf16.gmra.mxu2 %v4375_v63 }
  0x6b   : > { %1877 = vmatmul.bf16.gmra.mxu3 %v4377_v0 }
  0x6f   : > { %894 = vperm.xlu0 %4082, %v776_v60   ;;  %v3729_v60 = vld [vmem:[%s4257_s29 + $0x2a8] sm:$0xf0] }
  0x77   : > { %1615 = vmatmul.bf16.gmra.mxu0 %v4393_v11 }
  0x79   : > { %1704 = vmatmul.bf16.gmra.mxu1 %v4395_v12  ;;  %1793 = vmatmul.bf16.gmra.mxu2 %v4397_v13 }
  0x7b   : > { %1882 = vmatmul.bf16.gmra.mxu3 %v4399_v14 }
  0x87   : > { %1620 = vmatmul.bf16.gmra.mxu0 %v4423_v45 }
  0x89   : > { %1709 = vmatmul.bf16.gmra.mxu1 %v4425_v46  ;;  %1798 = vmatmul.bf16.gmra.mxu2 %v4427_v47 }
  0x8b   : > { %1887 = vmatmul.bf16.gmra.mxu3 %v4429_v48 }
  0x97   : > { %1625 = vmatmul.bf16.gmra.mxu0 %v4445_v3 }
  0x99   : > { %1714 = vmatmul.bf16.gmra.mxu1 %v4447_v4  ;;  %1803 = vmatmul.bf16.gmra.mxu2 %v4449_v5 }
  0x9b   : > { %1892 = vmatmul.bf16.gmra.mxu3 %v4451_v6 }
  0xa7   : > { %1630 = vmatmul.bf16.gmra.mxu0 %v4474_v40 }
  0xa9   : > { %1719 = vmatmul.bf16.gmra.mxu1 %v4476_v41  ;;  %1808 = vmatmul.bf16.gmra.mxu2 %v4478_v42  ;;  %v4488_v51 = vpop.permute.xlu0 %789 }
  0xaa   : > { %5818 = vst [vmem:[#allocation18_spill] sm:$0xff] %v4488_v51 }
  0xab   : > { %1897 = vmatmul.bf16.gmra.mxu3 %v4480_v43 }
  0xb1   : > { %v4515_v27 = vpop.permute.xlu0 %794 }
  0xb2   : > { %5823 = vst [vmem:[#allocation23_spill] sm:$0xff] %v4515_v27 }
  0xb4   : > { %v1596_v8 = vpop.f32.mrf.mxu0 }
  0xb5   : > { %v1597_v15 = vadd.f32 %v1596_v8, %v4488_v51  ;;  %v772_v8 = vld [vmem:[%s4265_s5 + $0x88] sm:$0xff] }
  0xb6   : > { %v1685_v16 = vpop.f32.mrf.mxu1  ;;  %874 = vperm.xlu2 %4084, %v772_v8  }
  0xb7   : > { %v1686_v23 = vadd.f32 %v1685_v16, %v1597_v15  ;;  %1635 = vmatmul.bf16.gmra.mxu0 %v4498_v7  ;;  %v4527_v15 = vpop.permute.xlu1 %799  ;;  %v3687_v16 = vld [vmem:[%s4257_s29 + $0x240] sm:$0xf] }
  0xb8   : > { %5824 = vst [vmem:[#allocation24_spill] sm:$0xff] %v4527_v15  ;;  %v4537_v35 = vor.u32 %v3989_v22, %v3687_v16 }
  0xb9   : > { %1724 = vmatmul.bf16.gmra.mxu1 %v4500_v9  ;;  %1813 = vmatmul.bf16.gmra.mxu2 %v4502_v10 }
  0xba   : > { %5825 = vst [vmem:[#allocation25_spill] sm:$0xff] %v4537_v35 }
  0xbb   : > { %1902 = vmatmul.bf16.gmra.mxu3 %v4505_v21 }
  0xbc   : > { %v1774_v36 = vpop.f32.mrf.mxu2  ;;  %v1598_v52 = vpop.f32.mrf.mxu0 }
  0xbd   : > { %v1775_v44 = vadd.f32 %v1774_v36, %v1686_v23  ;;  %v1599_v53 = vadd.f32 %v1598_v52, %v4515_v27  ;;  %v3985_v23 = vld [vmem:[%s4257_s29 + $0x244] sm:$0xf] }
  0xbe   : > { %v1863_v50 = vpop.f32.mrf.mxu3  ;;  %v1687_v57 = vpop.f32.mrf.mxu1  ;;  %v4539_v39 = vor.u32 %v3985_v23, %v3689_v24 }
  0xbf   : > { %v4522_v58 = vadd.f32 %v1863_v50, %v1775_v44  ;;  %v1688_v1 = vadd.f32 %v1687_v57, %v1599_v53  ;;  %v4541_v44 = vor.u32 %v3990_v26, %v3695_v25  ;;  %v4544_v53 = vor.u32 %v3986_v28, %v3697_v29  ;;  %v4558_v28 = vpop.permute.xlu2 %809  ;;  %v3719_v29 = vld [vmem:[%s4257_s29 + $0x280] sm:$0xf] }
  0xc0   : > { %5826 = vst [vmem:[#allocation26_spill] sm:$0xff] %v4539_v39 }
  0xc1   : > { %5827 = vst [vmem:[#allocation27_spill] sm:$0xff] %v4541_v44 }
  0xc2   : > { %5828 = vst [vmem:[#allocation28_spill] sm:$0xff] %v4544_v53 }
  0xc3   : > { %5830 = vst [vmem:[#allocation30_spill] sm:$0xff] %v4558_v28 }
  0xc4   : > { %v1776_v34 = vpop.f32.mrf.mxu2  ;;  %v1601_v38 = vpop.f32.mrf.mxu0 }
  0xc5   : > { %v1777_v36 = vadd.f32 %v1776_v34, %v1688_v1  ;;  %v1602_v50 = vadd.f32 %v1601_v38, %v4527_v15  ;;  %v4553_v1 = vpop.permute.xlu1 %804  ;;  %v3997_v34 = vld [vmem:[%s4257_s29 + $0x29c] sm:$0xf0]  ;;  %v3727_v38 = vld [vmem:[%s4257_s29 + $0x288] sm:$0xf] }
  0xc6   : > { %v1865_v37 = vpop.f32.mrf.mxu3  ;;  %v1690_v52 = vpop.f32.mrf.mxu1  ;;  %5829 = vst [vmem:[#allocation29_spill] sm:$0xff] %v4553_v1 }
  0xc7   : > { %v4546_v57 = vadd.f32 %v1865_v37, %v1777_v36  ;;  %v1691_v59 = vadd.f32 %v1690_v52, %v1602_v50  ;;  %1640 = vmatmul.bf16.gmra.mxu0 %v4537_v35  ;;  %v3993_v36 = vld [vmem:[%s4257_s29 + $0x284] sm:$0xf]  ;;  %v3998_v50 = vld [vmem:[%s4257_s29 + $0x2a4] sm:$0xf0]  ;;  %v3994_v52 = vld [vmem:[%s4257_s29 + $0x28c] sm:$0xf] }
  0xc8   : > { %v3721_v37 = vld [vmem:[%s4257_s29 + $0x2a0] sm:$0xf0] }
  0xc9   : > { %1729 = vmatmul.bf16.gmra.mxu1 %v4539_v39  ;;  %1818 = vmatmul.bf16.gmra.mxu2 %v4541_v44  ;;  %v4575_v44 = vor.u32 %v3994_v52, %v3729_v60  ;;  %v377_v60 = vld [vmem:[%s4184_s22 + $0x430] sm:$0xff] }
  0xcb   : > { %1907 = vmatmul.bf16.gmra.mxu3 %v4544_v53  ;;  %5834 = vst [vmem:[#allocation34_spill] sm:$0xff] %v4575_v44 }
  0xcc   : > { %v1779_v2 = vpop.f32.mrf.mxu2  ;;  %v1603_v22 = vpop.f32.mrf.mxu0 }
  0xcd   : > { %v1780_v8 = vadd.f32 %v1779_v2, %v1691_v59  ;;  %v1604_v23 = vadd.f32 %v1603_v22, %v4553_v1  ;;  %v4568_v2 = vor.u32 %v3997_v34, %v3719_v29  ;;  %v777_v29 = vld [vmem:[%s4265_s5 + $0xb0] sm:$0xff] }
  0xce   : > { %v1868_v16 = vpop.f32.mrf.mxu3  ;;  %v1692_v24 = vpop.f32.mrf.mxu1  ;;  %899 = vperm.xlu1 %4083, %v777_v29  }
  0xcf   : > { %v4556_v25 = vadd.f32 %v1868_v16, %v1780_v8  ;;  %v1693_v26 = vadd.f32 %v1692_v24, %v1604_v23  ;;  %5831 = vst [vmem:[#allocation31_spill] sm:$0xff] %v4568_v2  ;;  %v4570_v16 = vor.u32 %v3993_v36, %v3721_v37  ;;  %v4572_v23 = vor.u32 %v3998_v50, %v3727_v38  ;;  %v439_v36 = vld [vmem:[%s4184_s22 + $0x620] sm:$0xff]  ;;  %v441_v37 = vld [vmem:[%s4184_s22 + $0x630] sm:$0xff]  ;;  %v4587_v50 = vpop.permute.xlu2 %814 }
  0xd0   : > { %v375_v38 = vld [vmem:[%s4184_s22 + $0x420] sm:$0xff]  ;;  %5835 = vst [vmem:[#allocation35_spill] sm:$0xff] %v4587_v50  ;;  %v597_v52 = vpack.c.bf16 %v441_v37, %v439_v36 }
  0xd1   : > { %5832 = vst [vmem:[#allocation32_spill] sm:$0xff] %v4570_v16  ;;  %v775_v37 = vld [vmem:[%s4265_s5 + $0xa0] sm:$0xff] }
  0xd2   : > { %5833 = vst [vmem:[#allocation33_spill] sm:$0xff] %v4572_v23  ;;  %2127 = vmatpush.bf16.msrb.mxu2 %v597_v52  ;;  %889 = vperm.xlu2 %4084, %v775_v37   ;;  %v4001_v52 = vld [vmem:[%s4257_s29 + $0x2c4] sm:$0xf] }
  0xd4   : > { %v1781_v59 = vpop.f32.mrf.mxu2  ;;  %v1606_v8 = vpop.f32.mrf.mxu0 }
  0xd5   : > { %v1782_v53 = vadd.f32 %v1781_v59, %v1693_v26  ;;  %v1607_v24 = vadd.f32 %v1606_v8, %v4558_v28  ;;  %v3759_v28 = vld [vmem:[%s4257_s29 + $0x2c8] sm:$0xf] }
  0xd6   : > { %v1870_v22 = vpop.f32.mrf.mxu3  ;;  %v1695_v1 = vpop.f32.mrf.mxu1 }
  0xd7   : > { %v4578_v34 = vadd.f32 %v1870_v22, %v1782_v53  ;;  %v1696_v26 = vadd.f32 %v1695_v1, %v1607_v24  ;;  %1645 = vmatmul.bf16.gmra.mxu0 %v4568_v2  ;;  %v471_v53 = vld [vmem:[%s4184_s22 + $0x720] sm:$0xff]  ;;  %v473_v1 = vld [vmem:[%s4184_s22 + $0x730] sm:$0xff]  ;;  %v565_v22 = vpack.c.bf16 %v377_v60, %v375_v38 }
  0xd8   : > { %v613_v8 = vpack.c.bf16 %v473_v1, %v471_v53  ;;  %v407_v60 = vld [vmem:[%s4184_s22 + $0x520] sm:$0xff] }
  0xd9   : > { %1734 = vmatmul.bf16.gmra.mxu1 %v4570_v16  ;;  %1823 = vmatmul.bf16.gmra.mxu2 %v4572_v23  ;;  %v4005_v16 = vld [vmem:[%s4257_s29 + $0x2dc] sm:$0xf0]  ;;  %v3753_v2 = vld [vmem:[%s4257_s29 + $0x2e0] sm:$0xf0] }
  0xda   : > { %1949 = vmatpush.bf16.msrb.mxu0 %v565_v22  ;;  %2216 = vmatpush.bf16.msrb.mxu3 %v613_v8  ;;  %v4604_v22 = vpop.permute.xlu0 %819  ;;  %v4002_v8 = vld [vmem:[%s4257_s29 + $0x2cc] sm:$0xf] }
  0xdb   : > { %1912 = vmatmul.bf16.gmra.mxu3 %v4575_v44  ;;  %5836 = vst [vmem:[#allocation36_spill] sm:$0xff] %v4604_v22 }
  0xdc   : > { %v1784_v59 = vpop.f32.mrf.mxu2  ;;  %v1608_v44 = vpop.f32.mrf.mxu0 }
  0xdd   : > { %v1785_v24 = vadd.f32 %v1784_v59, %v1696_v26  ;;  %v1609_v23 = vadd.f32 %v1608_v44, %v4587_v50  ;;  %v409_v26 = vld [vmem:[%s4184_s22 + $0x530] sm:$0xff]  ;;  %v3751_v59 = vld [vmem:[%s4257_s29 + $0x2c0] sm:$0xf]  ;;  %v4006_v44 = vld [vmem:[%s4257_s29 + $0x2e4] sm:$0xf0] }
  0xde   : > { %v1873_v29 = vpop.f32.mrf.mxu3  ;;  %v1697_v36 = vpop.f32.mrf.mxu1  ;;  %v581_v1 = vpack.c.bf16 %v409_v26, %v407_v60  ;;  %v3761_v50 = vld [vmem:[%s4257_s29 + $0x2e8] sm:$0xf0]  ;;  %v4612_v60 = vor.u32 %v4006_v44, %v3759_v28 }
  0xdf   : > { %v4594_v38 = vadd.f32 %v1873_v29, %v1785_v24  ;;  %v1698_v53 = vadd.f32 %v1697_v36, %v1609_v23  ;;  %v4608_v24 = vor.u32 %v4005_v16, %v3751_v59  ;;  %v4610_v36 = vor.u32 %v4001_v52, %v3753_v2  ;;  %v780_v28 = vld [vmem:[%s4265_s5 + $0xc8] sm:$0xff]  ;;  %v4625_v2 = vpop.permute.xlu1 %824 }
  0xe0   : > { %2038 = vmatpush.bf16.msrb.mxu1 %v581_v1  ;;  %5839 = vst [vmem:[#allocation39_spill] sm:$0xff] %v4612_v60  ;;  %v4615_v15 = vor.u32 %v4002_v8, %v3761_v50  ;;  %v779_v1 = vld [vmem:[%s4265_s5 + $0xc0] sm:$0xff]  ;;  %914 = vperm.xlu1 %4083, %v780_v28   ;;  %v3791_v28 = vld [vmem:[%s4257_s29 + $0x308] sm:$0xf] }
  0xe1   : > { %5837 = vst [vmem:[#allocation37_spill] sm:$0xff] %v4608_v24  ;;  %909 = vperm.xlu0 %4082, %v779_v1   ;;  %v3785_v1 = vld [vmem:[%s4257_s29 + $0x320] sm:$0xf0] }
  0xe2   : > { %5838 = vst [vmem:[#allocation38_spill] sm:$0xff] %v4610_v36 }
  0xe3   : > { %5840 = vst [vmem:[#allocation40_spill] sm:$0xff] %v4615_v15 }
  0xe4   : > { %v1786_v39 = vpop.f32.mrf.mxu2  ;;  %v1611_v23 = vpop.f32.mrf.mxu0  ;;  %5841 = vst [vmem:[#allocation41_spill] sm:$0xff] %v4625_v2 }
  0xe5   : > { %v1787_v29 = vadd.f32 %v1786_v39, %v1698_v53  ;;  %v1612_v35 = vadd.f32 %v1611_v23, %v4604_v22  ;;  %v4013_v23 = vld [vmem:[%s4257_s29 + $0x31c] sm:$0xf0] }
  0xe6   : > { %v1875_v37 = vpop.f32.mrf.mxu3  ;;  %v1700_v26 = vpop.f32.mrf.mxu1 }
  0xe7   : > { %v4618_v27 = vadd.f32 %v1875_v37, %v1787_v29  ;;  %1650 = vmatmul.bf16.gmra.mxu0 %v4608_v24  ;;  %v1701_v39 = vadd.f32 %v1700_v26, %v1612_v35  ;;  %v778_v29 = vld [vmem:[%s4265_s5 + $0xb8] sm:$0xff]  ;;  %v3783_v37 = vld [vmem:[%s4257_s29 + $0x300] sm:$0xf]  ;;  %v4009_v26 = vld [vmem:[%s4257_s29 + $0x304] sm:$0xf] }
  0xe8   : > { %904 = vperm.xlu2 %4084, %v778_v29   ;;  %v4641_v24 = vor.u32 %v4013_v23, %v3783_v37  ;;  %v371_v37 = vld [vmem:[%s4184_s22 + $0x400] sm:$0xff]  ;;  %v4659_v23 = vpop.permute.xlu0 %834 }
  0xe9   : > { %1739 = vmatmul.bf16.gmra.mxu1 %v4610_v36  ;;  %1828 = vmatmul.bf16.gmra.mxu2 %v4612_v60  ;;  %v4637_v60 = vpop.permute.xlu2 %829  ;;  %5847 = vst [vmem:[#allocation47_spill] sm:$0xff] %v4659_v23 }
  0xea   : > { %5842 = vst [vmem:[#allocation42_spill] sm:$0xff] %v4637_v60 }
  0xeb   : > { %1917 = vmatmul.bf16.gmra.mxu3 %v4615_v15  ;;  %v4014_v15 = vld [vmem:[%s4257_s29 + $0x324] sm:$0xf0]  ;;  %5843 = vst [vmem:[#allocation43_spill] sm:$0xff] %v4641_v24 }
  0xec   : > { %v1789_v16 = vpop.f32.mrf.mxu2  ;;  %v1613_v53 = vpop.f32.mrf.mxu0 }
  0xed   : > { %v1790_v50 = vadd.f32 %v1789_v16, %v1701_v39  ;;  %v1614_v59 = vadd.f32 %v1613_v53, %v4625_v2  ;;  %v4010_v39 = vld [vmem:[%s4257_s29 + $0x30c] sm:$0xf] }
  0xee   : > { %v1878_v35 = vpop.f32.mrf.mxu3  ;;  %v1702_v52 = vpop.f32.mrf.mxu1  ;;  %v3793_v16 = vld [vmem:[%s4257_s29 + $0x328] sm:$0xf0] }
  0xef   : > { %v4628_v44 = vadd.f32 %v1878_v35, %v1790_v50  ;;  %v1703_v8 = vadd.f32 %v1702_v52, %v1614_v59  ;;  %v4643_v59 = vor.u32 %v4009_v26, %v3785_v1  ;;  %v4645_v52 = vor.u32 %v4014_v15, %v3791_v28  ;;  %v435_v15 = vld [vmem:[%s4184_s22 + $0x600] sm:$0xff]  ;;  %v373_v1 = vld [vmem:[%s4184_s22 + $0x410] sm:$0xff] }
  0xf0   : > { %v4648_v22 = vor.u32 %v4010_v39, %v3793_v16  ;;  %v467_v28 = vld [vmem:[%s4184_s22 + $0x700] sm:$0xff]  ;;  %v469_v39 = vld [vmem:[%s4184_s22 + $0x710] sm:$0xff] }
  0xf1   : > { %5844 = vst [vmem:[#allocation44_spill] sm:$0xff] %v4643_v59 }
  0xf2   : > { %5845 = vst [vmem:[#allocation45_spill] sm:$0xff] %v4645_v52 }
  0xf3   : > { %5846 = vst [vmem:[#allocation46_spill] sm:$0xff] %v4648_v22 }
  0xf4   : > { %v1791_v36 = vpop.f32.mrf.mxu2  ;;  %v1616_v53 = vpop.f32.mrf.mxu0 }
  0xf5   : > { %v1792_v50 = vadd.f32 %v1791_v36, %v1703_v8  ;;  %v1617_v2 = vadd.f32 %v1616_v53, %v4637_v60  ;;  %v437_v8 = vld [vmem:[%s4184_s22 + $0x610] sm:$0xff] }
  0xf6   : > { %v1880_v35 = vpop.f32.mrf.mxu3  ;;  %v1705_v29 = vpop.f32.mrf.mxu1  ;;  %v595_v26 = vpack.c.bf16 %v437_v8, %v435_v15 }
  0xf7   : > { %v4650_v21 = vadd.f32 %v1880_v35, %v1792_v50  ;;  %1655 = vmatmul.bf16.gmra.mxu0 %v4641_v24  ;;  %v1706_v36 = vadd.f32 %v1705_v29, %v1617_v2  ;;  %v563_v50 = vpack.c.bf16 %v373_v1, %v371_v37  ;;  %v611_v2 = vpack.c.bf16 %v469_v39, %v467_v28  ;;  %v782_v35 = vld [vmem:[%s4265_s5 + $0xd8] sm:$0xff]  ;;  %v403_v1 = vld [vmem:[%s4184_s22 + $0x500] sm:$0xff]  ;;  %v405_v28 = vld [vmem:[%s4184_s22 + $0x510] sm:$0xff] }
  0xf8   : > { %2128 = vmatpush.bf16.msrb.mxu2 %v595_v26  ;;  %924 = vperm.xlu0 %4082, %v782_v35   ;;  %v579_v39 = vpack.c.bf16 %v405_v28, %v403_v1  ;;  %v3817_v24 = vld [vmem:[%s4257_s29 + $0x360] sm:$0xf0]  ;;  %v3823_v26 = vld [vmem:[%s4257_s29 + $0x348] sm:$0xf] }
  0xf9   : > { %1744 = vmatmul.bf16.gmra.mxu1 %v4643_v59  ;;  %1833 = vmatmul.bf16.gmra.mxu2 %v4645_v52  ;;  %v4021_v52 = vld [vmem:[%s4257_s29 + $0x35c] sm:$0xf0]  ;;  %v4017_v59 = vld [vmem:[%s4257_s29 + $0x344] sm:$0xf]  ;;  %v4022_v35 = vld [vmem:[%s4257_s29 + $0x364] sm:$0xf0] }
  0xfa   : > { %1950 = vmatpush.bf16.msrb.mxu0 %v563_v50  ;;  %2217 = vmatpush.bf16.msrb.mxu3 %v611_v2  ;;  %v3825_v50 = vld [vmem:[%s4257_s29 + $0x368] sm:$0xf0] }
  0xfb   : > { %1922 = vmatmul.bf16.gmra.mxu3 %v4648_v22  ;;  %2039 = vmatpush.bf16.msrb.mxu1 %v579_v39  ;;  %v783_v39 = vld [vmem:[%s4265_s5 + $0xe0] sm:$0xff] }
  0xfc   : > { %v1794_v16 = vpop.f32.mrf.mxu2  ;;  %v1618_v22 = vpop.f32.mrf.mxu0  ;;  %929 = vperm.xlu1 %4083, %v783_v39   ;;  %v3855_v39 = vld [vmem:[%s4257_s29 + $0x388] sm:$0xf] }
  0xfd   : > { %v1795_v53 = vadd.f32 %v1794_v16, %v1706_v36  ;;  %v1619_v15 = vadd.f32 %v1618_v22, %v4659_v23  ;;  %v3815_v16 = vld [vmem:[%s4257_s29 + $0x340] sm:$0xf]  ;;  %v4676_v22 = vpop.permute.xlu1 %839  ;;  %v4018_v23 = vld [vmem:[%s4257_s29 + $0x34c] sm:$0xf] }
  0xfe   : > { %v1883_v29 = vpop.f32.mrf.mxu3  ;;  %v1707_v8 = vpop.f32.mrf.mxu1  ;;  %5848 = vst [vmem:[#allocation48_spill] sm:$0xff] %v4676_v22  ;;  %v4680_v2 = vor.u32 %v4021_v52, %v3815_v16  ;;  %v4687_v9 = vor.u32 %v4018_v23, %v3825_v50 }
  0xff   : > { %v4666_v37 = vadd.f32 %v1883_v29, %v1795_v53  ;;  %v1708_v36 = vadd.f32 %v1707_v8, %v1619_v15  ;;  %v4682_v15 = vor.u32 %v4017_v59, %v3817_v24  ;;  %v4684_v8 = vor.u32 %v4022_v35, %v3823_v26  ;;  %v781_v26 = vld [vmem:[%s4265_s5 + $0xd0] sm:$0xff] }
 0x100   : > { %5849 = vst [vmem:[#allocation49_spill] sm:$0xff] %v4680_v2  ;;  %919 = vperm.xlu2 %4084, %v781_v26  }
 0x101   : > { %5850 = vst [vmem:[#allocation50_spill] sm:$0xff] %v4682_v15 }
 0x102   : > { %5851 = vst [vmem:[#allocation51_spill] sm:$0xff] %v4684_v8 }
 0x103   : > { %5852 = vst [vmem:[#allocation52_spill] sm:$0xff] %v4687_v9 }
 0x104   : > { %v1796_v60 = vpop.f32.mrf.mxu2  ;;  %v1621_v10 = vpop.f32.mrf.mxu0 }
 0x105   : > { %v1797_v53 = vadd.f32 %v1796_v60, %v1708_v36  ;;  %v1622_v28 = vadd.f32 %v1621_v10, %v4676_v22  ;;  %v4696_v10 = vpop.permute.xlu2 %844 }
 0x106   : > { %v1885_v29 = vpop.f32.mrf.mxu3  ;;  %v1710_v1 = vpop.f32.mrf.mxu1  ;;  %5853 = vst [vmem:[#allocation53_spill] sm:$0xff] %v4696_v10 }
 0x107   : > { %v4690_v7 = vadd.f32 %v1885_v29, %v1797_v53  ;;  %1660 = vmatmul.bf16.gmra.mxu0 %v4680_v2  ;;  %v1711_v60 = vadd.f32 %v1710_v1, %v1622_v28  ;;  %v3847_v53 = vld [vmem:[%s4257_s29 + $0x380] sm:$0xf]  ;;  %v4025_v1 = vld [vmem:[%s4257_s29 + $0x384] sm:$0xf] }
 0x108   : > { %v4029_v29 = vld [vmem:[%s4257_s29 + $0x39c] sm:$0xf0]  ;;  %v3849_v28 = vld [vmem:[%s4257_s29 + $0x3a0] sm:$0xf0] }
 0x109   : > { %1749 = vmatmul.bf16.gmra.mxu1 %v4682_v15  ;;  %1838 = vmatmul.bf16.gmra.mxu2 %v4684_v8  ;;  %v3857_v8 = vld [vmem:[%s4257_s29 + $0x3a8] sm:$0xf0]  ;;  %v4712_v2 = vor.u32 %v4029_v29, %v3847_v53  ;;  %v785_v53 = vld [vmem:[%s4265_s5 + $0xf0] sm:$0xff] }
 0x10a   : > { %939 = vperm.xlu0 %4082, %v785_v53  }
 0x10b   : > { %1927 = vmatmul.bf16.gmra.mxu3 %v4687_v9  ;;  %v4030_v9 = vld [vmem:[%s4257_s29 + $0x3a4] sm:$0xf0]  ;;  %5855 = vst [vmem:[#allocation55_spill] sm:$0xff] %v4712_v2 }
 0x10c   : > { %v1799_v24 = vpop.f32.mrf.mxu2  ;;  %v1623_v23 = vpop.f32.mrf.mxu0 }
 0x10d   : > { %v1800_v59 = vadd.f32 %v1799_v24, %v1711_v60  ;;  %v1624_v36 = vadd.f32 %v1623_v23, %v4696_v10  ;;  %v4708_v60 = vpop.permute.xlu0 %849  ;;  %v4026_v24 = vld [vmem:[%s4257_s29 + $0x38c] sm:$0xf] }
 0x10e   : > { %v1888_v52 = vpop.f32.mrf.mxu3  ;;  %v1712_v16 = vpop.f32.mrf.mxu1  ;;  %5854 = vst [vmem:[#allocation54_spill] sm:$0xff] %v4708_v60  ;;  %v4719_v22 = vor.u32 %v4026_v24, %v3857_v8  ;;  %v368_v24 = vld [vmem:[%s4184_s22 + $0x3e8] sm:$0xff] }
 0x10f   : > { %v4700_v35 = vadd.f32 %v1888_v52, %v1800_v59  ;;  %v1713_v50 = vadd.f32 %v1712_v16, %v1624_v36  ;;  %v4714_v36 = vor.u32 %v4025_v1, %v3849_v28  ;;  %v4716_v16 = vor.u32 %v4030_v9, %v3855_v39  ;;  %v336_v9 = vld [vmem:[%s4184_s22 + $0x2e8] sm:$0xff]  ;;  %v4731_v8 = vpop.permute.xlu1 %854  ;;  %v274_v39 = vld [vmem:[%s4184_s22 + $0xf8] sm:$0xff] }
 0x110   : > { %5858 = vst [vmem:[#allocation58_spill] sm:$0xff] %v4719_v22  ;;  %v272_v1 = vld [vmem:[%s4184_s22 + $0xe8] sm:$0xff] }
 0x111   : > { %5856 = vst [vmem:[#allocation56_spill] sm:$0xff] %v4714_v36 }
 0x112   : > { %5857 = vst [vmem:[#allocation57_spill] sm:$0xff] %v4716_v16 }
 0x113   : > { %5859 = vst [vmem:[#allocation59_spill] sm:$0xff] %v4731_v8 }
 0x114   : > { %v1801_v15 = vpop.f32.mrf.mxu2  ;;  %v1626_v52 = vpop.f32.mrf.mxu0 }
 0x115   : > { %v1802_v23 = vadd.f32 %v1801_v15, %v1713_v50  ;;  %v1627_v10 = vadd.f32 %v1626_v52, %v4708_v60  ;;  %v338_v50 = vld [vmem:[%s4184_s22 + $0x2f8] sm:$0xff]  ;;  %v514_v52 = vpack.c.bf16 %v274_v39, %v272_v1  ;;  %v304_v39 = vld [vmem:[%s4184_s22 + $0x1e8] sm:$0xff] }
 0x116   : > { %v1890_v59 = vpop.f32.mrf.mxu3  ;;  %v1715_v26 = vpop.f32.mrf.mxu1  ;;  %v546_v28 = vpack.c.bf16 %v338_v50, %v336_v9  ;;  %v3887_v60 = vld [vmem:[%s4257_s29 + $0x3c8] sm:$0xf] }
 0x117   : > { %v4722_v29 = vadd.f32 %v1890_v59, %v1802_v23  ;;  %1665 = vmatmul.bf16.gmra.mxu0 %v4712_v2  ;;  %v1716_v15 = vadd.f32 %v1715_v26, %v1627_v10  ;;  %v370_v23 = vld [vmem:[%s4184_s22 + $0x3f8] sm:$0xff]  ;;  %v4033_v2 = vld [vmem:[%s4257_s29 + $0x3c4] sm:$0xf] }
 0x118   : > { %v562_v10 = vpack.c.bf16 %v370_v23, %v368_v24  ;;  %v786_v26 = vld [vmem:[%s4265_s5 + $0xf8] sm:$0xff]  ;;  %2477 = vmatpush.bf16.msra.mxu2 %v546_v28  ;;  %2299 = vmatpush.bf16.msra.mxu0 %v514_v52  ;;  %v4037_v28 = vld [vmem:[%s4257_s29 + $0x3dc] sm:$0xf0]  ;;  %v4034_v52 = vld [vmem:[%s4257_s29 + $0x3cc] sm:$0xf] }
 0x119   : > { %1754 = vmatmul.bf16.gmra.mxu1 %v4714_v36  ;;  %1843 = vmatmul.bf16.gmra.mxu2 %v4716_v16  ;;  %v3879_v36 = vld [vmem:[%s4257_s29 + $0x3c0] sm:$0xf] }
 0x11a   : > { %944 = vperm.xlu1 %4083, %v786_v26   ;;  %2566 = vmatpush.bf16.msra.mxu3 %v562_v10  ;;  %v3881_v26 = vld [vmem:[%s4257_s29 + $0x3e0] sm:$0xf0]  ;;  %v3889_v10 = vld [vmem:[%s4257_s29 + $0x3e8] sm:$0xf0] }
 0x11b   : > { %1932 = vmatmul.bf16.gmra.mxu3 %v4719_v22  ;;  %v4760_v42 = vor.u32 %v4034_v52, %v3889_v10  ;;  %v3415_v10 = vld [vmem:[%s4257_s29 + $0x10] sm:$0xf] }
 0x11c   : > { %v1804_v59 = vpop.f32.mrf.mxu2  ;;  %v1628_v16 = vpop.f32.mrf.mxu0 }
 0x11d   : > { %v1805_v53 = vadd.f32 %v1804_v59, %v1716_v15  ;;  %v1629_v9 = vadd.f32 %v1628_v16, %v4731_v8  ;;  %v306_v15 = vld [vmem:[%s4184_s22 + $0x1f8] sm:$0xff]  ;;  %v784_v59 = vld [vmem:[%s4265_s5 + $0xe8] sm:$0xff]  ;;  %v4749_v8 = vpop.permute.xlu2 %859  ;;  %5864 = vst [vmem:[#allocation64_spill] sm:$0xff] %v4760_v42 }
 0x11e   : > { %v1893_v22 = vpop.f32.mrf.mxu3  ;;  %v1717_v50 = vpop.f32.mrf.mxu1  ;;  %v530_v23 = vpack.c.bf16 %v306_v15, %v304_v39  ;;  %934 = vperm.xlu2 %4084, %v784_v59   ;;  %v4038_v16 = vld [vmem:[%s4257_s29 + $0x3e4] sm:$0xf0]  ;;  %5860 = vst [vmem:[#allocation60_spill] sm:$0xff] %v4749_v8 }
 0x11f   : > { %v4738_v1 = vadd.f32 %v1893_v22, %v1805_v53  ;;  %v1718_v24 = vadd.f32 %v1717_v50, %v1629_v9  ;;  %v4753_v53 = vor.u32 %v4037_v28, %v3879_v36  ;;  %v4755_v50 = vor.u32 %v4033_v2, %v3881_v26  ;;  %v4768_v2 = vpop.permute.xlu0 %864 }
 0x120   : > { %2388 = vmatpush.bf16.msra.mxu1 %v530_v23  ;;  %v4757_v39 = vor.u32 %v4038_v16, %v3887_v60  ;;  %5865 = vst [vmem:[#allocation65_spill] sm:$0xff] %v4768_v2 }
 0x121   : > { %5861 = vst [vmem:[#allocation61_spill] sm:$0xff] %v4753_v53 }
 0x122   : > { %5862 = vst [vmem:[#allocation62_spill] sm:$0xff] %v4755_v50 }
 0x123   : > { %5863 = vst [vmem:[#allocation63_spill] sm:$0xff] %v4757_v39 }
 0x124   : > { %v1806_v22 = vpop.f32.mrf.mxu2  ;;  %v1631_v9 = vpop.f32.mrf.mxu0 }
 0x125   : > { %v1807_v51 = vadd.f32 %v1806_v22, %v1718_v24  ;;  %v1632_v59 = vadd.f32 %v1631_v9, %v4749_v8  ;;  %v3919_v22 = vld [vmem:[%s4257_s29 + $0x2c] sm:$0xf0]  ;;  %v3915_v9 = vld [vmem:[%s4257_s29 + $0x14] sm:$0xf] }
 0x126   : > { %v1895_v43 = vpop.f32.mrf.mxu3  ;;  %v1720_v15 = vpop.f32.mrf.mxu1 }
 0x127   : > { %v4762_v23 = vadd.f32 %v1895_v43, %v1807_v51  ;;  %1670 = vmatmul.bf16.gmra.mxu0 %v4753_v53  ;;  %v1721_v36 = vadd.f32 %v1720_v15, %v1632_v59  ;;  %v3417_v15 = vld [vmem:[%s4257_s29 + $0x30] sm:$0xf0]  ;;  %v3423_v59 = vld [vmem:[%s4257_s29 + $0x18] sm:$0xf]  ;;  %v3425_v53 = vld [vmem:[%s4257_s29 + $0x38] sm:$0xf0] }
 0x129   : > { %1759 = vmatmul.bf16.gmra.mxu1 %v4755_v50  ;;  %1848 = vmatmul.bf16.gmra.mxu2 %v4757_v39  ;;  %v4779_v39 = vpop.permute.xlu1 %869  ;;  %v3916_v50 = vld [vmem:[%s4257_s29 + $0x1c] sm:$0xf] }
 0x12a   : > { %5866 = vst [vmem:[#allocation66_spill] sm:$0xff] %v4779_v39  ;;  %v4790_v41 = vor.u32 %v3916_v50, %v3425_v53  ;;  %v270_v53 = vld [vmem:[%s4184_s22 + $0xd8] sm:$0xff]  ;;  %v364_v50 = vld [vmem:[%s4184_s22 + $0x3c8] sm:$0xff] }
 0x12b   : > { %1937 = vmatmul.bf16.gmra.mxu3 %v4760_v42  ;;  %v3920_v42 = vld [vmem:[%s4257_s29 + $0x34] sm:$0xf0] }
 0x12c   : > { %v1809_v60 = vpop.f32.mrf.mxu2  ;;  %v1633_v24 = vpop.f32.mrf.mxu0  ;;  %5870 = vst [vmem:[#allocation70_spill] sm:$0xff] %v4790_v41 }
 0x12d   : > { %v1810_v43 = vadd.f32 %v1809_v60, %v1721_v36  ;;  %v1634_v28 = vadd.f32 %v1633_v24, %v4768_v2  ;;  %v4783_v36 = vor.u32 %v3919_v22, %v3415_v10  ;;  %v4785_v24 = vor.u32 %v3915_v9, %v3417_v15  ;;  %v268_v10 = vld [vmem:[%s4184_s22 + $0xc8] sm:$0xff]  ;;  %v4801_v22 = vpop.permute.xlu2 %874  ;;  %v366_v15 = vld [vmem:[%s4184_s22 + $0x3d8] sm:$0xff] }
 0x12e   : > { %v1898_v51 = vpop.f32.mrf.mxu3  ;;  %v1722_v26 = vpop.f32.mrf.mxu1  ;;  %5871 = vst [vmem:[#allocation71_spill] sm:$0xff] %v4801_v22 }
 0x12f   : > { %v4771_v16 = vadd.f32 %v1898_v51, %v1810_v43  ;;  %v1723_v52 = vadd.f32 %v1722_v26, %v1634_v28  ;;  %5867 = vst [vmem:[#allocation67_spill] sm:$0xff] %v4783_v36  ;;  %v4787_v28 = vor.u32 %v3920_v42, %v3423_v59  ;;  %v332_v42 = vld [vmem:[%s4184_s22 + $0x2c8] sm:$0xff] }
 0x130   : > { %5868 = vst [vmem:[#allocation68_spill] sm:$0xff] %v4785_v24 }
 0x131   : > { %5869 = vst [vmem:[#allocation69_spill] sm:$0xff] %v4787_v28 }
 0x134   : > { %v1811_v8 = vpop.f32.mrf.mxu2  ;;  %v1636_v51 = vpop.f32.mrf.mxu0 }
 0x135   : > { %v1812_v60 = vadd.f32 %v1811_v8, %v1723_v52  ;;  %v1637_v2 = vadd.f32 %v1636_v51, %v4779_v39  ;;  %v334_v52 = vld [vmem:[%s4184_s22 + $0x2d8] sm:$0xff] }
 0x136   : > { %v1900_v43 = vpop.f32.mrf.mxu3  ;;  %v1725_v26 = vpop.f32.mrf.mxu1  ;;  %v544_v9 = vpack.c.bf16 %v334_v52, %v332_v42  ;;  %v3928_v39 = vld [vmem:[%s4257_s29 + $0x74] sm:$0xf0] }
 0x137   : > { %v4792_v40 = vadd.f32 %v1900_v43, %v1812_v60  ;;  %1951 = vmatmul.bf16.vlgmr.msrb.gmra.mxu0 %v4783_v36  ;;  %v1726_v8 = vadd.f32 %v1725_v26, %v1637_v2  ;;  %v512_v2 = vpack.c.bf16 %v270_v53, %v268_v10  ;;  %v560_v60 = vpack.c.bf16 %v366_v15, %v364_v50  ;;  %v300_v10 = vld [vmem:[%s4184_s22 + $0x1c8] sm:$0xff]  ;;  %v302_v53 = vld [vmem:[%s4184_s22 + $0x1d8] sm:$0xff] }
 0x138   : > { %2478 = vmatpush.bf16.msra.mxu2 %v544_v9  ;;  %v528_v15 = vpack.c.bf16 %v302_v53, %v300_v10  ;;  %v3455_v36 = vld [vmem:[%s4257_s29 + $0x58] sm:$0xf]  ;;  %v4817_v9 = vpop.permute.xlu0 %879 }
 0x139   : > { %2040 = vmatmul.bf16.vlgmr.msrb.gmra.mxu1 %v4785_v24  ;;  %2129 = vmatmul.bf16.vlgmr.msrb.gmra.mxu2 %v4787_v28  ;;  %v3923_v28 = vld [vmem:[%s4257_s29 + $0x54] sm:$0xf]  ;;  %5872 = vst [vmem:[#allocation72_spill] sm:$0xff] %v4817_v9 }
 0x13a   : > { %2300 = vmatpush.bf16.msra.mxu0 %v512_v2  ;;  %2567 = vmatpush.bf16.msra.mxu3 %v560_v60  ;;  %v3449_v24 = vld [vmem:[%s4257_s29 + $0x70] sm:$0xf0] }
 0x13b   : > { %2218 = vmatmul.bf16.vlgmr.msrb.gmra.mxu3 %v4790_v41  ;;  %2389 = vmatpush.bf16.msra.mxu1 %v528_v15  ;;  %v4823_v5 = vor.u32 %v3923_v28, %v3449_v24 }
 0x13c   : > { %v1814_v59 = vpop.f32.mrf.mxu2  ;;  %v1638_v26 = vpop.f32.mrf.mxu0 }
 0x13d   : > { %v1815_v43 = vadd.f32 %v1814_v59, %v1726_v8  ;;  %v1639_v42 = vadd.f32 %v1638_v26, %v4801_v22  ;;  %v3447_v8 = vld [vmem:[%s4257_s29 + $0x50] sm:$0xf]  ;;  %v3924_v26 = vld [vmem:[%s4257_s29 + $0x5c] sm:$0xf]  ;;  %5874 = vst [vmem:[#allocation74_spill] sm:$0xff] %v4823_v5 }
 0x13e   : > { %v1903_v51 = vpop.f32.mrf.mxu3  ;;  %v1727_v52 = vpop.f32.mrf.mxu1  ;;  %v3927_v59 = vld [vmem:[%s4257_s29 + $0x6c] sm:$0xf0]  ;;  %v3457_v22 = vld [vmem:[%s4257_s29 + $0x78] sm:$0xf0] }
 0x13f   : > { %v4807_v41 = vadd.f32 %v1903_v51, %v1815_v43  ;;  %v1728_v50 = vadd.f32 %v1727_v52, %v1639_v42  ;;  %v4821_v6 = vor.u32 %v3927_v59, %v3447_v8  ;;  %v4825_v42 = vor.u32 %v3928_v39, %v3455_v36  ;;  %v4836_v39 = vpop.permute.xlu1 %884 }
 0x140   : > { %v4828_v53 = vor.u32 %v3924_v26, %v3457_v22  ;;  %5877 = vst [vmem:[#allocation77_spill] sm:$0xff] %v4836_v39 }
 0x141   : > { %5873 = vst [vmem:[#allocation73_spill] sm:$0xff] %v4821_v6 }
 0x142   : > { %5875 = vst [vmem:[#allocation75_spill] sm:$0xff] %v4825_v42 }
 0x143   : > { %5876 = vst [vmem:[#allocation76_spill] sm:$0xff] %v4828_v53 }
 0x144   : > { %v1816_v2 = vpop.f32.mrf.mxu2  ;;  %v1641_v51 = vpop.f32.mrf.mxu0 }
 0x145   : > { %v1817_v60 = vadd.f32 %v1816_v2, %v1728_v50  ;;  %v1642_v10 = vadd.f32 %v1641_v51, %v4817_v9  ;;  %v3931_v51 = vld [vmem:[%s4257_s29 + $0x94] sm:$0xf] }
 0x146   : > { %v1905_v43 = vpop.f32.mrf.mxu3  ;;  %v1730_v52 = vpop.f32.mrf.mxu1 }
 0x147   : > { %v4830_v15 = vadd.f32 %v1905_v43, %v1817_v60  ;;  %1956 = vmatmul.bf16.gmra.mxu0 %v4821_v6  ;;  %v1731_v8 = vadd.f32 %v1730_v52, %v1642_v10  ;;  %v3479_v60 = vld [vmem:[%s4257_s29 + $0x90] sm:$0xf]  ;;  %v3481_v52 = vld [vmem:[%s4257_s29 + $0xb0] sm:$0xf0]  ;;  %v3487_v10 = vld [vmem:[%s4257_s29 + $0x98] sm:$0xf] }
 0x148   : > { %v3935_v43 = vld [vmem:[%s4257_s29 + $0xac] sm:$0xf0]  ;;  %v3489_v6 = vld [vmem:[%s4257_s29 + $0xb8] sm:$0xf0] }
 0x149   : > { %2045 = vmatmul.bf16.gmra.mxu1 %v4823_v5  ;;  %2134 = vmatmul.bf16.gmra.mxu2 %v4825_v42  ;;  %v4847_v42 = vpop.permute.xlu2 %889  ;;  %v3932_v5 = vld [vmem:[%s4257_s29 + $0x9c] sm:$0xf] }
 0x14a   : > { %5878 = vst [vmem:[#allocation78_spill] sm:$0xff] %v4847_v42  ;;  %v4858_v4 = vor.u32 %v3932_v5, %v3489_v6  ;;  %v266_v5 = vld [vmem:[%s4184_s22 + $0xb8] sm:$0xff]  ;;  %v360_v6 = vld [vmem:[%s4184_s22 + $0x3a8] sm:$0xff] }
 0x14b   : > { %2223 = vmatmul.bf16.gmra.mxu3 %v4828_v53  ;;  %v3936_v53 = vld [vmem:[%s4257_s29 + $0xb4] sm:$0xf0] }
 0x14c   : > { %v1819_v36 = vpop.f32.mrf.mxu2  ;;  %v1643_v22 = vpop.f32.mrf.mxu0  ;;  %5882 = vst [vmem:[#allocation82_spill] sm:$0xff] %v4858_v4 }
 0x14d   : > { %v1820_v24 = vadd.f32 %v1819_v36, %v1731_v8  ;;  %v1644_v50 = vadd.f32 %v1643_v22, %v4836_v39  ;;  %v4851_v8 = vor.u32 %v3935_v43, %v3479_v60  ;;  %v4853_v22 = vor.u32 %v3931_v51, %v3481_v52  ;;  %v264_v60 = vld [vmem:[%s4184_s22 + $0xa8] sm:$0xff]  ;;  %v4869_v43 = vpop.permute.xlu0 %894  ;;  %v362_v52 = vld [vmem:[%s4184_s22 + $0x3b8] sm:$0xff] }
 0x14e   : > { %v1908_v28 = vpop.f32.mrf.mxu3  ;;  %v1732_v59 = vpop.f32.mrf.mxu1  ;;  %5883 = vst [vmem:[#allocation83_spill] sm:$0xff] %v4869_v43 }
 0x14f   : > { %v4839_v26 = vadd.f32 %v1908_v28, %v1820_v24  ;;  %v1733_v2 = vadd.f32 %v1732_v59, %v1644_v50  ;;  %5879 = vst [vmem:[#allocation79_spill] sm:$0xff] %v4851_v8  ;;  %v4855_v50 = vor.u32 %v3936_v53, %v3487_v10  ;;  %v328_v53 = vld [vmem:[%s4184_s22 + $0x2a8] sm:$0xff] }
 0x150   : > { %5880 = vst [vmem:[#allocation80_spill] sm:$0xff] %v4853_v22 }
 0x151   : > { %5881 = vst [vmem:[#allocation81_spill] sm:$0xff] %v4855_v50 }
 0x154   : > { %v1821_v9 = vpop.f32.mrf.mxu2  ;;  %v1646_v28 = vpop.f32.mrf.mxu0 }
 0x155   : > { %v1822_v36 = vadd.f32 %v1821_v9, %v1733_v2  ;;  %v1647_v39 = vadd.f32 %v1646_v28, %v4847_v42  ;;  %v330_v2 = vld [vmem:[%s4184_s22 + $0x2b8] sm:$0xff] }
 0x156   : > { %v1910_v24 = vpop.f32.mrf.mxu3  ;;  %v1735_v59 = vpop.f32.mrf.mxu1  ;;  %v542_v51 = vpack.c.bf16 %v330_v2, %v328_v53  ;;  %v3944_v42 = vld [vmem:[%s4257_s29 + $0xf4] sm:$0xf0] }
 0x157   : > { %v4860_v3 = vadd.f32 %v1910_v24, %v1822_v36  ;;  %1961 = vmatmul.bf16.gmra.mxu0 %v4851_v8  ;;  %v1736_v9 = vadd.f32 %v1735_v59, %v1647_v39  ;;  %v510_v39 = vpack.c.bf16 %v266_v5, %v264_v60  ;;  %v558_v36 = vpack.c.bf16 %v362_v52, %v360_v6  ;;  %v296_v60 = vld [vmem:[%s4184_s22 + $0x1a8] sm:$0xff]  ;;  %v298_v5 = vld [vmem:[%s4184_s22 + $0x1b8] sm:$0xff] }
 0x158   : > { %2479 = vmatpush.bf16.msra.mxu2 %v542_v51  ;;  %v526_v52 = vpack.c.bf16 %v298_v5, %v296_v60  ;;  %v3519_v8 = vld [vmem:[%s4257_s29 + $0xd8] sm:$0xf]  ;;  %v4885_v51 = vpop.permute.xlu1 %899 }
 0x159   : > { %2050 = vmatmul.bf16.gmra.mxu1 %v4853_v22  ;;  %2139 = vmatmul.bf16.gmra.mxu2 %v4855_v50  ;;  %v3939_v50 = vld [vmem:[%s4257_s29 + $0xd4] sm:$0xf]  ;;  %5884 = vst [vmem:[#allocation84_spill] sm:$0xff] %v4885_v51 }
 0x15a   : > { %2301 = vmatpush.bf16.msra.mxu0 %v510_v39  ;;  %2568 = vmatpush.bf16.msra.mxu3 %v558_v36  ;;  %v3513_v22 = vld [vmem:[%s4257_s29 + $0xf0] sm:$0xf0] }
 0x15b   : > { %2228 = vmatmul.bf16.gmra.mxu3 %v4858_v4  ;;  %2390 = vmatpush.bf16.msra.mxu1 %v526_v52  ;;  %v4891_v47 = vor.u32 %v3939_v50, %v3513_v22 }
 0x15c   : > { %v1824_v10 = vpop.f32.mrf.mxu2  ;;  %v1648_v59 = vpop.f32.mrf.mxu0 }
 0x15d   : > { %v1825_v24 = vadd.f32 %v1824_v10, %v1736_v9  ;;  %v1649_v53 = vadd.f32 %v1648_v59, %v4869_v43  ;;  %v3511_v9 = vld [vmem:[%s4257_s29 + $0xd0] sm:$0xf]  ;;  %v3940_v59 = vld [vmem:[%s4257_s29 + $0xdc] sm:$0xf]  ;;  %5886 = vst [vmem:[#allocation86_spill] sm:$0xff] %v4891_v47 }
 0x15e   : > { %v1913_v28 = vpop.f32.mrf.mxu3  ;;  %v1737_v2 = vpop.f32.mrf.mxu1  ;;  %v3943_v10 = vld [vmem:[%s4257_s29 + $0xec] sm:$0xf0]  ;;  %v3521_v43 = vld [vmem:[%s4257_s29 + $0xf8] sm:$0xf0] }
 0x15f   : > { %v4875_v4 = vadd.f32 %v1913_v28, %v1825_v24  ;;  %v1738_v6 = vadd.f32 %v1737_v2, %v1649_v53  ;;  %v4889_v48 = vor.u32 %v3943_v10, %v3511_v9  ;;  %v4893_v53 = vor.u32 %v3944_v42, %v3519_v8  ;;  %v4904_v42 = vpop.permute.xlu2 %904 }
 0x160   : > { %v4896_v5 = vor.u32 %v3940_v59, %v3521_v43  ;;  %5889 = vst [vmem:[#allocation89_spill] sm:$0xff] %v4904_v42 }
 0x161   : > { %5885 = vst [vmem:[#allocation85_spill] sm:$0xff] %v4889_v48 }
 0x162   : > { %5887 = vst [vmem:[#allocation87_spill] sm:$0xff] %v4893_v53 }
 0x163   : > { %5888 = vst [vmem:[#allocation88_spill] sm:$0xff] %v4896_v5 }
 0x164   : > { %v1826_v39 = vpop.f32.mrf.mxu2  ;;  %v1651_v28 = vpop.f32.mrf.mxu0 }
 0x165   : > { %v1827_v36 = vadd.f32 %v1826_v39, %v1738_v6  ;;  %v1652_v60 = vadd.f32 %v1651_v28, %v4885_v51  ;;  %v3947_v28 = vld [vmem:[%s4257_s29 + $0x114] sm:$0xf] }
 0x166   : > { %v1915_v24 = vpop.f32.mrf.mxu3  ;;  %v1740_v2 = vpop.f32.mrf.mxu1 }
 0x167   : > { %v4898_v52 = vadd.f32 %v1915_v24, %v1827_v36  ;;  %1966 = vmatmul.bf16.gmra.mxu0 %v4889_v48  ;;  %v1741_v9 = vadd.f32 %v1740_v2, %v1652_v60  ;;  %v3543_v36 = vld [vmem:[%s4257_s29 + $0x110] sm:$0xf]  ;;  %v3545_v2 = vld [vmem:[%s4257_s29 + $0x130] sm:$0xf0]  ;;  %v3551_v60 = vld [vmem:[%s4257_s29 + $0x118] sm:$0xf] }
 0x168   : > { %v3951_v24 = vld [vmem:[%s4257_s29 + $0x12c] sm:$0xf0]  ;;  %v3553_v48 = vld [vmem:[%s4257_s29 + $0x138] sm:$0xf0] }
 0x169   : > { %2055 = vmatmul.bf16.gmra.mxu1 %v4891_v47  ;;  %2144 = vmatmul.bf16.gmra.mxu2 %v4893_v53  ;;  %v4915_v53 = vpop.permute.xlu0 %909  ;;  %v3948_v47 = vld [vmem:[%s4257_s29 + $0x11c] sm:$0xf] }
 0x16a   : > { %5890 = vst [vmem:[#allocation90_spill] sm:$0xff] %v4915_v53  ;;  %v4926_v46 = vor.u32 %v3948_v47, %v3553_v48  ;;  %v262_v47 = vld [vmem:[%s4184_s22 + $0x98] sm:$0xff]  ;;  %v356_v48 = vld [vmem:[%s4184_s22 + $0x388] sm:$0xff] }
 0x16b   : > { %2233 = vmatmul.bf16.gmra.mxu3 %v4896_v5  ;;  %v3952_v5 = vld [vmem:[%s4257_s29 + $0x134] sm:$0xf0] }
 0x16c   : > { %v1829_v8 = vpop.f32.mrf.mxu2  ;;  %v1653_v43 = vpop.f32.mrf.mxu0  ;;  %5894 = vst [vmem:[#allocation94_spill] sm:$0xff] %v4926_v46 }
 0x16d   : > { %v1830_v22 = vadd.f32 %v1829_v8, %v1741_v9  ;;  %v1654_v6 = vadd.f32 %v1653_v43, %v4904_v42  ;;  %v4919_v9 = vor.u32 %v3951_v24, %v3543_v36  ;;  %v4921_v43 = vor.u32 %v3947_v28, %v3545_v2  ;;  %v260_v36 = vld [vmem:[%s4184_s22 + $0x88] sm:$0xff]  ;;  %v4937_v24 = vpop.permute.xlu1 %914  ;;  %v358_v2 = vld [vmem:[%s4184_s22 + $0x398] sm:$0xff] }
 0x16e   : > { %v1918_v50 = vpop.f32.mrf.mxu3  ;;  %v1742_v10 = vpop.f32.mrf.mxu1  ;;  %5895 = vst [vmem:[#allocation95_spill] sm:$0xff] %v4937_v24 }
 0x16f   : > { %v4907_v59 = vadd.f32 %v1918_v50, %v1830_v22  ;;  %v1743_v39 = vadd.f32 %v1742_v10, %v1654_v6  ;;  %5891 = vst [vmem:[#allocation91_spill] sm:$0xff] %v4919_v9  ;;  %v4923_v6 = vor.u32 %v3952_v5, %v3551_v60  ;;  %v324_v5 = vld [vmem:[%s4184_s22 + $0x288] sm:$0xff] }
 0x170   : > { %5892 = vst [vmem:[#allocation92_spill] sm:$0xff] %v4921_v43 }
 0x171   : > { %5893 = vst [vmem:[#allocation93_spill] sm:$0xff] %v4923_v6 }
 0x174   : > { %v1831_v51 = vpop.f32.mrf.mxu2  ;;  %v1656_v50 = vpop.f32.mrf.mxu0 }
 0x175   : > { %v1832_v8 = vadd.f32 %v1831_v51, %v1743_v39  ;;  %v1657_v42 = vadd.f32 %v1656_v50, %v4915_v53  ;;  %v326_v39 = vld [vmem:[%s4184_s22 + $0x298] sm:$0xff] }
 0x176   : > { %v1920_v22 = vpop.f32.mrf.mxu3  ;;  %v1745_v10 = vpop.f32.mrf.mxu1  ;;  %v540_v28 = vpack.c.bf16 %v326_v39, %v324_v5  ;;  %v3960_v53 = vld [vmem:[%s4257_s29 + $0x174] sm:$0xf0] }
 0x177   : > { %v4928_v45 = vadd.f32 %v1920_v22, %v1832_v8  ;;  %1971 = vmatmul.bf16.gmra.mxu0 %v4919_v9  ;;  %v1746_v51 = vadd.f32 %v1745_v10, %v1657_v42  ;;  %v508_v42 = vpack.c.bf16 %v262_v47, %v260_v36  ;;  %v556_v8 = vpack.c.bf16 %v358_v2, %v356_v48  ;;  %v292_v36 = vld [vmem:[%s4184_s22 + $0x188] sm:$0xff]  ;;  %v294_v47 = vld [vmem:[%s4184_s22 + $0x198] sm:$0xff] }
 0x178   : > { %2480 = vmatpush.bf16.msra.mxu2 %v540_v28  ;;  %v524_v2 = vpack.c.bf16 %v294_v47, %v292_v36  ;;  %v3583_v9 = vld [vmem:[%s4257_s29 + $0x158] sm:$0xf]  ;;  %v4953_v28 = vpop.permute.xlu2 %919 }
 0x179   : > { %2060 = vmatmul.bf16.gmra.mxu1 %v4921_v43  ;;  %2149 = vmatmul.bf16.gmra.mxu2 %v4923_v6  ;;  %v3955_v6 = vld [vmem:[%s4257_s29 + $0x154] sm:$0xf]  ;;  %5897 = vst [vmem:[#allocation97_spill] sm:$0xff] %v4953_v28 }
 0x17a   : > { %2302 = vmatpush.bf16.msra.mxu0 %v508_v42  ;;  %2569 = vmatpush.bf16.msra.mxu3 %v556_v8  ;;  %v3577_v43 = vld [vmem:[%s4257_s29 + $0x170] sm:$0xf0] }
 0x17b   : > { %2238 = vmatmul.bf16.gmra.mxu3 %v4926_v46  ;;  %2391 = vmatpush.bf16.msra.mxu1 %v524_v2  ;;  %v4959_v13 = vor.u32 %v3955_v6, %v3577_v43 }
 0x17c   : > { %v1834_v60 = vpop.f32.mrf.mxu2  ;;  %v1658_v10 = vpop.f32.mrf.mxu0 }
 0x17d   : > { %v1835_v22 = vadd.f32 %v1834_v60, %v1746_v51  ;;  %v1659_v5 = vadd.f32 %v1658_v10, %v4937_v24  ;;  %v3575_v51 = vld [vmem:[%s4257_s29 + $0x150] sm:$0xf]  ;;  %v3956_v10 = vld [vmem:[%s4257_s29 + $0x15c] sm:$0xf]  ;;  %5899 = vst [vmem:[#allocation99_spill] sm:$0xff] %v4959_v13 }
 0x17e   : > { %v1923_v50 = vpop.f32.mrf.mxu3  ;;  %v1747_v39 = vpop.f32.mrf.mxu1  ;;  %v3959_v60 = vld [vmem:[%s4257_s29 + $0x16c] sm:$0xf0]  ;;  %v3585_v24 = vld [vmem:[%s4257_s29 + $0x178] sm:$0xf0] }
 0x17f   : > { %v4943_v46 = vadd.f32 %v1923_v50, %v1835_v22  ;;  %v1748_v48 = vadd.f32 %v1747_v39, %v1659_v5  ;;  %v4957_v14 = vor.u32 %v3959_v60, %v3575_v51  ;;  %v4961_v5 = vor.u32 %v3960_v53, %v3583_v9  ;;  %v4972_v53 = vpop.permute.xlu0 %924 }
 0x180   : > { %v4964_v47 = vor.u32 %v3956_v10, %v3585_v24  ;;  %5903 = vst [vmem:[#allocation103_spill] sm:$0xff] %v4972_v53 }
 0x181   : > { %5896 = vst [vmem:[#allocation96_spill] sm:$0xff] %v4943_v46 }
 0x182   : > { %5898 = vst [vmem:[#allocation98_spill] sm:$0xff] %v4957_v14 }
 0x183   : > { %5900 = vst [vmem:[#allocation100_spill] sm:$0xff] %v4961_v5 }
 0x184   : > { %v1836_v42 = vpop.f32.mrf.mxu2  ;;  %v1661_v50 = vpop.f32.mrf.mxu0  ;;  %5901 = vst [vmem:[#allocation101_spill] sm:$0xff] %v4964_v47 }
 0x185   : > { %v1837_v8 = vadd.f32 %v1836_v42, %v1748_v48  ;;  %v1662_v36 = vadd.f32 %v1661_v50, %v4953_v28  ;;  %v3963_v50 = vld [vmem:[%s4257_s29 + $0x194] sm:$0xf] }
 0x186   : > { %v1925_v22 = vpop.f32.mrf.mxu3  ;;  %v1750_v39 = vpop.f32.mrf.mxu1 }
 0x187   : > { %v4966_v2 = vadd.f32 %v1925_v22, %v1837_v8  ;;  %1976 = vmatmul.bf16.gmra.mxu0 %v4957_v14  ;;  %v1751_v51 = vadd.f32 %v1750_v39, %v1662_v36  ;;  %v3607_v8 = vld [vmem:[%s4257_s29 + $0x190] sm:$0xf]  ;;  %v3609_v39 = vld [vmem:[%s4257_s29 + $0x1b0] sm:$0xf0]  ;;  %v3615_v36 = vld [vmem:[%s4257_s29 + $0x198] sm:$0xf] }
 0x188   : > { %v3967_v22 = vld [vmem:[%s4257_s29 + $0x1ac] sm:$0xf0]  ;;  %v3617_v14 = vld [vmem:[%s4257_s29 + $0x1b8] sm:$0xf0] }
 0x189   : > { %5902 = vst [vmem:[#allocation102_spill] sm:$0xff] %v4966_v2  ;;  %2065 = vmatmul.bf16.gmra.mxu1 %v4959_v13  ;;  %2154 = vmatmul.bf16.gmra.mxu2 %v4961_v5  ;;  %v4983_v5 = vpop.permute.xlu1 %929  ;;  %v3964_v13 = vld [vmem:[%s4257_s29 + $0x19c] sm:$0xf] }
 0x18a   : > { %5905 = vst [vmem:[#allocation105_spill] sm:$0xff] %v4983_v5 }
 0x18b   : > { %2243 = vmatmul.bf16.gmra.mxu3 %v4964_v47  ;;  %v3968_v47 = vld [vmem:[%s4257_s29 + $0x1b4] sm:$0xf0] }
 0x18c   : > { %v1839_v9 = vpop.f32.mrf.mxu2  ;;  %v1663_v24 = vpop.f32.mrf.mxu0 }
 0x18d   : > { %v1840_v43 = vadd.f32 %v1839_v9, %v1751_v51  ;;  %v1664_v48 = vadd.f32 %v1663_v24, %v4972_v53  ;;  %v4987_v51 = vor.u32 %v3967_v22, %v3607_v8  ;;  %v4989_v24 = vor.u32 %v3963_v50, %v3609_v39  ;;  %v256_v8 = vld [vmem:[%s4184_s22 + $0x68] sm:$0xff]  ;;  %v5005_v22 = vpop.permute.xlu2 %934  ;;  %v258_v39 = vld [vmem:[%s4184_s22 + $0x78] sm:$0xff] }
 0x18e   : > { %v1928_v6 = vpop.f32.mrf.mxu3  ;;  %v1752_v60 = vpop.f32.mrf.mxu1  ;;  %5911 = vst [vmem:[#allocation111_spill] sm:$0xff] %v5005_v22 }
 0x18f   : > { %v4975_v10 = vadd.f32 %v1928_v6, %v1840_v43  ;;  %v1753_v42 = vadd.f32 %v1752_v60, %v1664_v48  ;;  %5906 = vst [vmem:[#allocation106_spill] sm:$0xff] %v4987_v51  ;;  %v4991_v48 = vor.u32 %v3968_v47, %v3615_v36  ;;  %v320_v47 = vld [vmem:[%s4184_s22 + $0x268] sm:$0xff] }
 0x190   : > { %5907 = vst [vmem:[#allocation107_spill] sm:$0xff] %v4989_v24 }
 0x191   : > { %5904 = vst [vmem:[#allocation104_spill] sm:$0xff] %v4975_v10  ;;  %v4994_v10 = vor.u32 %v3964_v13, %v3617_v14  ;;  %v352_v13 = vld [vmem:[%s4184_s22 + $0x368] sm:$0xff]  ;;  %v354_v14 = vld [vmem:[%s4184_s22 + $0x378] sm:$0xff] }
 0x192   : > { %5908 = vst [vmem:[#allocation108_spill] sm:$0xff] %v4991_v48 }
 0x193   : > { %5909 = vst [vmem:[#allocation109_spill] sm:$0xff] %v4994_v10 }
 0x194   : > { %v1841_v28 = vpop.f32.mrf.mxu2  ;;  %v1666_v6 = vpop.f32.mrf.mxu0 }
 0x195   : > { %v1842_v9 = vadd.f32 %v1841_v28, %v1753_v42  ;;  %v1667_v53 = vadd.f32 %v1666_v6, %v4983_v5  ;;  %v322_v42 = vld [vmem:[%s4184_s22 + $0x278] sm:$0xff] }
 0x196   : > { %v1930_v43 = vpop.f32.mrf.mxu3  ;;  %v1755_v60 = vpop.f32.mrf.mxu1  ;;  %v538_v50 = vpack.c.bf16 %v322_v42, %v320_v47 }
 0x197   : > { %v4996_v2 = vadd.f32 %v1930_v43, %v1842_v9  ;;  %1981 = vmatmul.bf16.gmra.mxu0 %v4987_v51  ;;  %v1756_v28 = vadd.f32 %v1755_v60, %v1667_v53  ;;  %v506_v53 = vpack.c.bf16 %v258_v39, %v256_v8  ;;  %v554_v9 = vpack.c.bf16 %v354_v14, %v352_v13  ;;  %v3639_v8 = vld [vmem:[%s4257_s29 + $0x1d0] sm:$0xf]  ;;  %v3971_v13 = vld [vmem:[%s4257_s29 + $0x1d4] sm:$0xf]  ;;  %v3972_v51 = vld [vmem:[%s4257_s29 + $0x1dc] sm:$0xf] }
 0x198   : > { %2481 = vmatpush.bf16.msra.mxu2 %v538_v50  ;;  %v3975_v39 = vld [vmem:[%s4257_s29 + $0x1ec] sm:$0xf0]  ;;  %v3641_v14 = vld [vmem:[%s4257_s29 + $0x1f0] sm:$0xf0]  ;;  %v3649_v50 = vld [vmem:[%s4257_s29 + $0x1f8] sm:$0xf0] }
 0x199   : > { %5910 = vst [vmem:[#allocation110_spill] sm:$0xff] %v4996_v2  ;;  %2070 = vmatmul.bf16.gmra.mxu1 %v4989_v24  ;;  %2159 = vmatmul.bf16.gmra.mxu2 %v4991_v48  ;;  %v5019_v24 = vpop.permute.xlu0 %939  ;;  %v5032_v11 = vor.u32 %v3972_v51, %v3649_v50  ;;  %v5040_v51 = vpop.permute.xlu1 %944  ;;  %v3673_v50 = vld [vmem:[%s4257_s29 + $0x230] sm:$0xf0] }
 0x19a   : > { %2303 = vmatpush.bf16.msra.mxu0 %v506_v53  ;;  %2570 = vmatpush.bf16.msra.mxu3 %v554_v9  ;;  %5913 = vst [vmem:[#allocation113_spill] sm:$0xff] %v5019_v24  ;;  %v290_v53 = vld [vmem:[%s4184_s22 + $0x178] sm:$0xff] }
 0x19b   : > { %2248 = vmatmul.bf16.gmra.mxu3 %v4994_v10  ;;  %5917 = vst [vmem:[#allocation117_spill] sm:$0xff] %v5032_v11 }
 0x19c   : > { %v1844_v36 = vpop.f32.mrf.mxu2  ;;  %v1668_v60 = vpop.f32.mrf.mxu0  ;;  %5918 = vst [vmem:[#allocation118_spill] sm:$0xff] %v5040_v51 }
 0x19d   : > { %v1845_v43 = vadd.f32 %v1844_v36, %v1756_v28  ;;  %v1669_v47 = vadd.f32 %v1668_v60, %v5005_v22  ;;  %v3647_v28 = vld [vmem:[%s4257_s29 + $0x1d8] sm:$0xf]  ;;  %v5023_v60 = vor.u32 %v3975_v39, %v3639_v8  ;;  %v288_v22 = vld [vmem:[%s4184_s22 + $0x168] sm:$0xff] }
 0x19e   : > { %v1933_v6 = vpop.f32.mrf.mxu3  ;;  %v1757_v42 = vpop.f32.mrf.mxu1  ;;  %v3976_v36 = vld [vmem:[%s4257_s29 + $0x1f4] sm:$0xf0] }
 0x19f   : > { %v5011_v10 = vadd.f32 %v1933_v6, %v1845_v43  ;;  %v1758_v48 = vadd.f32 %v1757_v42, %v1669_v47  ;;  %5914 = vst [vmem:[#allocation114_spill] sm:$0xff] %v5023_v60  ;;  %v5027_v6 = vor.u32 %v3971_v13, %v3641_v14  ;;  %v5029_v47 = vor.u32 %v3976_v36, %v3647_v28  ;;  %v3671_v14 = vld [vmem:[%s4257_s29 + $0x210] sm:$0xf]  ;;  %v3979_v36 = vld [vmem:[%s4257_s29 + $0x214] sm:$0xf] }
 0x1a0   : > { %v522_v42 = vpack.c.bf16 %v290_v53, %v288_v22  ;;  %v3983_v28 = vld [vmem:[%s4257_s29 + $0x22c] sm:$0xf0]  ;;  %v3679_v53 = vld [vmem:[%s4257_s29 + $0x218] sm:$0xf] }
 0x1a1   : > { %5912 = vst [vmem:[#allocation112_spill] sm:$0xff] %v5011_v10 }
 0x1a2   : > { %5915 = vst [vmem:[#allocation115_spill] sm:$0xff] %v5027_v6  ;;  %2392 = vmatpush.bf16.msra.mxu1 %v522_v42  ;;  %v3681_v42 = vld [vmem:[%s4257_s29 + $0x238] sm:$0xf0] }
 0x1a3   : > { %5916 = vst [vmem:[#allocation116_spill] sm:$0xff] %v5029_v47 }
 0x1a4   : > { %v1846_v5 = vpop.f32.mrf.mxu2  ;;  %v1671_v43 = vpop.f32.mrf.mxu0 }
 0x1a5   : > { %v1847_v2 = vadd.f32 %v1846_v5, %v1758_v48  ;;  %v1672_v12 = vadd.f32 %v1671_v43, %v5019_v24  ;;  %v3980_v43 = vld [vmem:[%s4257_s29 + $0x21c] sm:$0xf] }
 0x1a6   : > { %v1935_v9 = vpop.f32.mrf.mxu3  ;;  %v1760_v10 = vpop.f32.mrf.mxu1 }
 0x1a7   : > { %v5034_v46 = vadd.f32 %v1935_v9, %v1847_v2  ;;  %1986 = vmatmul.bf16.gmra.mxu0 %v5023_v60  ;;  %v1761_v5 = vadd.f32 %v1760_v10, %v1672_v12  ;;  %v3984_v9 = vld [vmem:[%s4257_s29 + $0x234] sm:$0xf0] }
 0x1a9   : > { %2075 = vmatmul.bf16.gmra.mxu1 %v5027_v6  ;;  %2164 = vmatmul.bf16.gmra.mxu2 %v5029_v47 }
 0x1ab   : > { %2253 = vmatmul.bf16.gmra.mxu3 %v5032_v11 }
 0x1ac   : > { %v1849_v2 = vpop.f32.mrf.mxu2  ;;  %v1673_v8 = vpop.f32.mrf.mxu0 }
 0x1ad   : > { %v1850_v48 = vadd.f32 %v1849_v2, %v1761_v5  ;;  %v1674_v39 = vadd.f32 %v1673_v8, %v5040_v51  ;;  %v5053_v5 = vor.u32 %v3983_v28, %v3671_v14  ;;  %v318_v14 = vld [vmem:[%s4184_s22 + $0x258] sm:$0xff] }
 0x1ae   : > { %v1938_v22 = vpop.f32.mrf.mxu3  ;;  %v1762_v12 = vpop.f32.mrf.mxu1 }
 0x1af   : > { %v5043_v10 = vadd.f32 %v1938_v22, %v1850_v48  ;;  %v1763_v13 = vadd.f32 %v1762_v12, %v1674_v39  ;;  %5920 = vst [vmem:[#allocation120_spill] sm:$0xff] %v5053_v5  ;;  %v5055_v48 = vor.u32 %v3979_v36, %v3673_v50  ;;  %v5057_v22 = vor.u32 %v3984_v9, %v3679_v53  ;;  %v254_v9 = vld [vmem:[%s4184_s22 + $0x58] sm:$0xff] }
 0x1b0   : > { %v5059_v12 = vor.u32 %v3980_v43, %v3681_v42  ;;  %v348_v43 = vld [vmem:[%s4184_s22 + $0x348] sm:$0xff]  ;;  %v350_v42 = vld [vmem:[%s4184_s22 + $0x358] sm:$0xff] }
 0x1b1   : > { %5919 = vst [vmem:[#allocation119_spill] sm:$0xff] %v5043_v10 }
 0x1b2   : > { %5921 = vst [vmem:[#allocation121_spill] sm:$0xff] %v5055_v48 }
 0x1b3   : > { %5922 = vst [vmem:[#allocation122_spill] sm:$0xff] %v5057_v22 }
 0x1b4   : > { %v1851_v11 = vpop.f32.mrf.mxu2  ;;  %v1952_v8 = vpop.f32.mrf.mxu0  ;;  %5923 = vst [vmem:[#allocation123_spill] sm:$0xff] %v5059_v12 }
 0x1b5   : > { %v1852_v2 = vadd.f32 %v1851_v11, %v1763_v13  ;;  %v1953_v6 = vadd.f32 %v1952_v8, %v4522_v58  ;;  %v252_v58 = vld [vmem:[%s4184_s22 + $0x48] sm:$0xff]  ;;  %v552_v8 = vpack.c.bf16 %v350_v42, %v348_v43 }
 0x1b6   : > { %v1940_v47 = vpop.f32.mrf.mxu3  ;;  %v2041_v39 = vpop.f32.mrf.mxu1 }
 0x1b7   : > { %v5061_v51 = vadd.f32 %v1940_v47, %v1852_v2  ;;  %1991 = vmatmul.bf16.gmra.mxu0 %v5053_v5  ;;  %v2042_v11 = vadd.f32 %v2041_v39, %v1953_v6  ;;  %v316_v47 = vld [vmem:[%s4184_s22 + $0x248] sm:$0xff]  ;;  %v504_v6 = vpack.c.bf16 %v254_v9, %v252_v58  ;;  %2571 = vmatpush.bf16.msra.mxu3 %v552_v8  ;;  %v3705_v58 = vld [vmem:[%s4257_s29 + $0x270] sm:$0xf0]  ;;  %v3713_v9 = vld [vmem:[%s4257_s29 + $0x278] sm:$0xf0] }
 0x1b8   : > { %v536_v53 = vpack.c.bf16 %v318_v14, %v316_v47  ;;  %v3987_v14 = vld [vmem:[%s4257_s29 + $0x254] sm:$0xf]  ;;  %v286_v8 = vld [vmem:[%s4184_s22 + $0x158] sm:$0xff] }
 0x1b9   : > { %5924 = vst [vmem:[#allocation124_spill] sm:$0xff] %v5061_v51  ;;  %2080 = vmatmul.bf16.gmra.mxu1 %v5055_v48  ;;  %2169 = vmatmul.bf16.gmra.mxu2 %v5057_v22  ;;  %v5095_v60 = vor.u32 %v3987_v14, %v3705_v58 }
 0x1ba   : > { %2482 = vmatpush.bf16.msra.mxu2 %v536_v53  ;;  %2304 = vmatpush.bf16.msra.mxu0 %v504_v6  ;;  %v3988_v53 = vld [vmem:[%s4257_s29 + $0x25c] sm:$0xf]  ;;  %v284_v6 = vld [vmem:[%s4184_s22 + $0x148] sm:$0xff] }
 0x1bb   : > { %2258 = vmatmul.bf16.gmra.mxu3 %v5059_v12  ;;  %v520_v51 = vpack.c.bf16 %v286_v8, %v284_v6  ;;  %v3996_v8 = vld [vmem:[%s4257_s29 + $0x29c] sm:$0xf] }
 0x1bc   : > { %v2130_v13 = vpop.f32.mrf.mxu2  ;;  %v1954_v50 = vpop.f32.mrf.mxu0 }
 0x1bd   : > { %v2131_v28 = vadd.f32 %v2130_v13, %v2042_v11  ;;  %v1955_v12 = vadd.f32 %v1954_v50, %v4546_v57  ;;  %v3703_v11 = vld [vmem:[%s4257_s29 + $0x250] sm:$0xf]  ;;  %v3992_v57 = vld [vmem:[%s4257_s29 + $0x274] sm:$0xf0]  ;;  %2393 = vmatpush.bf16.msra.mxu1 %v520_v51 }
 0x1be   : > { %v2219_v36 = vpop.f32.mrf.mxu3  ;;  %v2043_v2 = vpop.f32.mrf.mxu1  ;;  %v3991_v13 = vld [vmem:[%s4257_s29 + $0x26c] sm:$0xf0] }
 0x1bf   : > { %v2220_v39 = vadd.f32 %v2219_v36, %v2131_v28  ;;  %v3711_v28 = vld [vmem:[%s4257_s29 + $0x258] sm:$0xf]  ;;  %v2044_v50 = vadd.f32 %v2043_v2, %v1955_v12  ;;  %v5091_v42 = vor.u32 %v3991_v13, %v3703_v11 }
 0x1c0   : > { %v5097_v24 = vor.u32 %v3992_v57, %v3711_v28  ;;  %v3735_v28 = vld [vmem:[%s4257_s29 + $0x290] sm:$0xf] }
 0x1c1   : > { %vm3011_vm0 = vcmp.gt.f32.partialorder %v2220_v39, 0.0  ;;  %v3075_v47 = vmul.f32 0.01, %v2220_v39  ;;  %v3999_v57 = vld [vmem:[%s4257_s29 + $0x2ac] sm:$0xf0] }
 0x1c3   : > { %v3139_v36 = vsel %vm3011_vm0, %v2220_v39, %v3075_v47  ;;  %v5099_v39 = vor.u32 %v3988_v53, %v3713_v9  ;;  %v3737_v53 = vld [vmem:[%s4257_s29 + $0x2b0] sm:$0xf0]  ;;  %v4000_v9 = vld [vmem:[%s4257_s29 + $0x2b4] sm:$0xf0] }
 0x1c4   : > { %3203 = vst [vmem:[%s5082_s12] sm:$0xff] %v3139_v36  ;;  %v2132_v43 = vpop.f32.mrf.mxu2  ;;  %v1957_v5 = vpop.f32.mrf.mxu0 }
 0x1c5   : > { %v2133_v22 = vadd.f32 %v2132_v43, %v2044_v50  ;;  %v1958_v2 = vadd.f32 %v1957_v5, %v4556_v25  ;;  %v3995_v50 = vld [vmem:[%s4257_s29 + $0x294] sm:$0xf] }
 0x1c6   : > { %v2221_v48 = vpop.f32.mrf.mxu3  ;;  %v2046_v10 = vpop.f32.mrf.mxu1 }
 0x1c7   : > { %v2222_v12 = vadd.f32 %v2221_v48, %v2133_v22  ;;  %1996 = vmatmul.bf16.gmra.mxu0 %v5091_v42  ;;  %v2047_v48 = vadd.f32 %v2046_v10, %v1958_v2  ;;  %v3743_v10 = vld [vmem:[%s4257_s29 + $0x298] sm:$0xf] }
 0x1c9   : > { %vm3013_vm1 = vcmp.gt.f32.partialorder %v2222_v12, 0.0  ;;  %v3077_v11 = vmul.f32 0.01, %v2222_v12  ;;  %2085 = vmatmul.bf16.gmra.mxu1 %v5095_v60  ;;  %2174 = vmatmul.bf16.gmra.mxu2 %v5097_v24 }
 0x1cb   : > { %2263 = vmatmul.bf16.gmra.mxu3 %v5099_v39  ;;  %v3141_v13 = vsel %vm3013_vm1, %v2222_v12, %v3077_v11  ;;  %v3745_v12 = vld [vmem:[%s4257_s29 + $0x2b8] sm:$0xf0]  ;;  %v5117_v11 = vor.u32 %v3999_v57, %v3735_v28 }
 0x1cc   : > { %3205 = vst [vmem:[%s5082_s12 + $0x10] sm:$0xff] %v3141_v13  ;;  %v2135_v25 = vpop.f32.mrf.mxu2  ;;  %v1959_v22 = vpop.f32.mrf.mxu0 }
 0x1cd   : > { %v2136_v51 = vadd.f32 %v2135_v25, %v2047_v48  ;;  %v1960_v58 = vadd.f32 %v1959_v22, %v4578_v34  ;;  %5925 = vst [vmem:[#allocation125_spill] sm:$0xff] %v5117_v11  ;;  %v5119_v25 = vor.u32 %v3995_v50, %v3737_v53  ;;  %v5123_v22 = vor.u32 %v3996_v8, %v3745_v12  ;;  %v312_v50 = vld [vmem:[%s4184_s22 + $0x228] sm:$0xff]  ;;  %v250_v8 = vld [vmem:[%s4184_s22 + $0x38] sm:$0xff] }
 0x1ce   : > { %v2224_v5 = vpop.f32.mrf.mxu3  ;;  %v2048_v47 = vpop.f32.mrf.mxu1  ;;  %v248_v53 = vld [vmem:[%s4184_s22 + $0x28] sm:$0xff] }
 0x1cf   : > { %v2225_v14 = vadd.f32 %v2224_v5, %v2136_v51  ;;  %v2049_v6 = vadd.f32 %v2048_v47, %v1960_v58  ;;  %5926 = vst [vmem:[#allocation126_spill] sm:$0xff] %v5119_v25  ;;  %v5121_v51 = vor.u32 %v4000_v9, %v3743_v10  ;;  %v344_v12 = vld [vmem:[%s4184_s22 + $0x328] sm:$0xff] }
 0x1d0   : > { %5928 = vst [vmem:[#allocation128_spill] sm:$0xff] %v5123_v22 }
 0x1d1   : > { %vm3015_vm2 = vcmp.gt.f32.partialorder %v2225_v14, 0.0  ;;  %v3079_v36 = vmul.f32 0.01, %v2225_v14  ;;  %5927 = vst [vmem:[#allocation127_spill] sm:$0xff] %v5121_v51 }
 0x1d3   : > { %v3143_v43 = vsel %vm3015_vm2, %v2225_v14, %v3079_v36 }
 0x1d4   : > { %3207 = vst [vmem:[%s5082_s12 + $0x20] sm:$0xff] %v3143_v43  ;;  %v2137_v2 = vpop.f32.mrf.mxu2  ;;  %v1962_v34 = vpop.f32.mrf.mxu0 }
 0x1d5   : > { %v2138_v13 = vadd.f32 %v2137_v2, %v2049_v6  ;;  %v1963_v14 = vadd.f32 %v1962_v34, %v4594_v38  ;;  %v314_v38 = vld [vmem:[%s4184_s22 + $0x238] sm:$0xff] }
 0x1d6   : > { %v2226_v48 = vpop.f32.mrf.mxu3  ;;  %v2051_v5 = vpop.f32.mrf.mxu1  ;;  %v534_v6 = vpack.c.bf16 %v314_v38, %v312_v50  ;;  %v346_v2 = vld [vmem:[%s4184_s22 + $0x338] sm:$0xff] }
 0x1d7   : > { %v2227_v47 = vadd.f32 %v2226_v48, %v2138_v13  ;;  %2001 = vmatmul.bf16.gmra.mxu0 %v5117_v11  ;;  %v2052_v57 = vadd.f32 %v2051_v5, %v1963_v14  ;;  %v502_v48 = vpack.c.bf16 %v250_v8, %v248_v53  ;;  %v550_v34 = vpack.c.bf16 %v346_v2, %v344_v12  ;;  %v3767_v14 = vld [vmem:[%s4257_s29 + $0x2d0] sm:$0xf]  ;;  %v3775_v50 = vld [vmem:[%s4257_s29 + $0x2d8] sm:$0xf] }
 0x1d8   : > { %2483 = vmatpush.bf16.msra.mxu2 %v534_v6  ;;  %v4008_v38 = vld [vmem:[%s4257_s29 + $0x2f4] sm:$0xf0]  ;;  %v280_v6 = vld [vmem:[%s4184_s22 + $0x128] sm:$0xff] }
 0x1d9   : > { %vm3017_vm3 = vcmp.gt.f32.partialorder %v2227_v47, 0.0  ;;  %v3081_v58 = vmul.f32 0.01, %v2227_v47  ;;  %2090 = vmatmul.bf16.gmra.mxu1 %v5119_v25  ;;  %2179 = vmatmul.bf16.gmra.mxu2 %v5121_v51  ;;  %v282_v12 = vld [vmem:[%s4184_s22 + $0x138] sm:$0xff]  ;;  %v5153_v51 = vor.u32 %v4008_v38, %v3775_v50 }
 0x1da   : > { %2305 = vmatpush.bf16.msra.mxu0 %v502_v48  ;;  %2572 = vmatpush.bf16.msra.mxu3 %v550_v34  ;;  %v518_v25 = vpack.c.bf16 %v282_v12, %v280_v6  ;;  %v4016_v6 = vld [vmem:[%s4257_s29 + $0x334] sm:$0xf0] }
 0x1db   : > { %2268 = vmatmul.bf16.gmra.mxu3 %v5123_v22  ;;  %v3145_v28 = vsel %vm3017_vm3, %v2227_v47, %v3081_v58  ;;  %v4007_v58 = vld [vmem:[%s4257_s29 + $0x2ec] sm:$0xf0] }
 0x1dc   : > { %3209 = vst [vmem:[%s5082_s12 + $0x30] sm:$0xff] %v3145_v28  ;;  %v2140_v36 = vpop.f32.mrf.mxu2  ;;  %v1964_v43 = vpop.f32.mrf.mxu0  ;;  %2394 = vmatpush.bf16.msra.mxu1 %v518_v25 }
 0x1dd   : > { %v2141_v10 = vadd.f32 %v2140_v36, %v2052_v57  ;;  %v1965_v47 = vadd.f32 %v1964_v43, %v4618_v27  ;;  %v4003_v57 = vld [vmem:[%s4257_s29 + $0x2d4] sm:$0xf]  ;;  %v5147_v43 = vor.u32 %v4007_v58, %v3767_v14 }
 0x1de   : > { %v2229_v9 = vpop.f32.mrf.mxu3  ;;  %v2053_v13 = vpop.f32.mrf.mxu1  ;;  %v3769_v36 = vld [vmem:[%s4257_s29 + $0x2f0] sm:$0xf0] }
 0x1df   : > { %v2230_v5 = vadd.f32 %v2229_v9, %v2141_v10  ;;  %v2054_v8 = vadd.f32 %v2053_v13, %v1965_v47  ;;  %v4004_v10 = vld [vmem:[%s4257_s29 + $0x2dc] sm:$0xf]  ;;  %v5151_v34 = vor.u32 %v4003_v57, %v3769_v36 }
 0x1e0   : > { %v3777_v9 = vld [vmem:[%s4257_s29 + $0x2f8] sm:$0xf0] }
 0x1e1   : > { %vm3019_vm4 = vcmp.gt.f32.partialorder %v2230_v5, 0.0  ;;  %v3083_v28 = vmul.f32 0.01, %v2230_v5 }
 0x1e3   : > { %v3147_v53 = vsel %vm3019_vm4, %v2230_v5, %v3083_v28  ;;  %v5155_v5 = vor.u32 %v4004_v10, %v3777_v9  ;;  %v4011_v9 = vld [vmem:[%s4257_s29 + $0x314] sm:$0xf] }
 0x1e4   : > { %3211 = vst [vmem:[%s5082_s12 + $0x40] sm:$0xff] %v3147_v53  ;;  %v2142_v27 = vpop.f32.mrf.mxu2  ;;  %v1967_v22 = vpop.f32.mrf.mxu0  ;;  %v3799_v53 = vld [vmem:[%s4257_s29 + $0x310] sm:$0xf] }
 0x1e5   : > { %v2143_v2 = vadd.f32 %v2142_v27, %v2054_v8  ;;  %v1968_v47 = vadd.f32 %v1967_v22, %v4628_v44  ;;  %v4015_v8 = vld [vmem:[%s4257_s29 + $0x32c] sm:$0xf0]  ;;  %v3801_v27 = vld [vmem:[%s4257_s29 + $0x330] sm:$0xf0] }
 0x1e6   : > { %v2231_v48 = vpop.f32.mrf.mxu3  ;;  %v2056_v11 = vpop.f32.mrf.mxu1 }
 0x1e7   : > { %v2232_v13 = vadd.f32 %v2231_v48, %v2143_v2  ;;  %2006 = vmatmul.bf16.gmra.mxu0 %v5147_v43  ;;  %v2057_v28 = vadd.f32 %v2056_v11, %v1968_v47  ;;  %v3807_v11 = vld [vmem:[%s4257_s29 + $0x318] sm:$0xf]  ;;  %v4012_v48 = vld [vmem:[%s4257_s29 + $0x31c] sm:$0xf] }
 0x1e9   : > { %vm3021_vm5 = vcmp.gt.f32.partialorder %v2232_v13, 0.0  ;;  %v3085_v14 = vmul.f32 0.01, %v2232_v13  ;;  %2095 = vmatmul.bf16.gmra.mxu1 %v5151_v34  ;;  %2184 = vmatmul.bf16.gmra.mxu2 %v5153_v51 }
 0x1eb   : > { %2273 = vmatmul.bf16.gmra.mxu3 %v5155_v5  ;;  %v3149_v58 = vsel %vm3021_vm5, %v2232_v13, %v3085_v14  ;;  %v3809_v13 = vld [vmem:[%s4257_s29 + $0x338] sm:$0xf0]  ;;  %v5173_v14 = vor.u32 %v4015_v8, %v3799_v53 }
 0x1ec   : > { %3213 = vst [vmem:[%s5082_s12 + $0x50] sm:$0xff] %v3149_v58  ;;  %v2145_v44 = vpop.f32.mrf.mxu2  ;;  %v1969_v57 = vpop.f32.mrf.mxu0 }
 0x1ed   : > { %v2146_v25 = vadd.f32 %v2145_v44, %v2057_v28  ;;  %v1970_v38 = vadd.f32 %v1969_v57, %v4650_v21  ;;  %5929 = vst [vmem:[#allocation129_spill] sm:$0xff] %v5173_v14  ;;  %v5175_v44 = vor.u32 %v4011_v9, %v3801_v27  ;;  %v5179_v57 = vor.u32 %v4012_v48, %v3809_v13  ;;  %v308_v9 = vld [vmem:[%s4184_s22 + $0x208] sm:$0xff]  ;;  %v246_v48 = vld [vmem:[%s4184_s22 + $0x18] sm:$0xff] }
 0x1ee   : > { %v2234_v22 = vpop.f32.mrf.mxu3  ;;  %v2058_v36 = vpop.f32.mrf.mxu1  ;;  %v244_v27 = vld [vmem:[%s4184_s22 + $0x8] sm:$0xff] }
 0x1ef   : > { %v2235_v50 = vadd.f32 %v2234_v22, %v2146_v25  ;;  %v2059_v2 = vadd.f32 %v2058_v36, %v1970_v38  ;;  %5930 = vst [vmem:[#allocation130_spill] sm:$0xff] %v5175_v44  ;;  %v5177_v25 = vor.u32 %v4016_v6, %v3807_v11  ;;  %v340_v13 = vld [vmem:[%s4184_s22 + $0x308] sm:$0xff] }
 0x1f0   : > { %5932 = vst [vmem:[#allocation132_spill] sm:$0xff] %v5179_v57 }
 0x1f1   : > { %vm3023_vm6 = vcmp.gt.f32.partialorder %v2235_v50, 0.0  ;;  %v3087_v10 = vmul.f32 0.01, %v2235_v50  ;;  %5931 = vst [vmem:[#allocation131_spill] sm:$0xff] %v5177_v25 }
 0x1f3   : > { %v3151_v12 = vsel %vm3023_vm6, %v2235_v50, %v3087_v10 }
 0x1f4   : > { %3215 = vst [vmem:[%s5082_s12 + $0x60] sm:$0xff] %v3151_v12  ;;  %v2147_v47 = vpop.f32.mrf.mxu2  ;;  %v1972_v21 = vpop.f32.mrf.mxu0 }
 0x1f5   : > { %v2148_v58 = vadd.f32 %v2147_v47, %v2059_v2  ;;  %v1973_v50 = vadd.f32 %v1972_v21, %v4666_v37  ;;  %v310_v37 = vld [vmem:[%s4184_s22 + $0x218] sm:$0xff] }
 0x1f6   : > { %v2236_v28 = vpop.f32.mrf.mxu3  ;;  %v2061_v22 = vpop.f32.mrf.mxu1  ;;  %v532_v2 = vpack.c.bf16 %v310_v37, %v308_v9  ;;  %v342_v47 = vld [vmem:[%s4184_s22 + $0x318] sm:$0xff] }
 0x1f7   : > { %v2237_v36 = vadd.f32 %v2236_v28, %v2148_v58  ;;  %2011 = vmatmul.bf16.gmra.mxu0 %v5173_v14  ;;  %v2062_v8 = vadd.f32 %v2061_v22, %v1973_v50  ;;  %v500_v28 = vpack.c.bf16 %v246_v48, %v244_v27  ;;  %v548_v21 = vpack.c.bf16 %v342_v47, %v340_v13  ;;  %v3831_v50 = vld [vmem:[%s4257_s29 + $0x350] sm:$0xf]  ;;  %v3839_v9 = vld [vmem:[%s4257_s29 + $0x358] sm:$0xf] }
 0x1f8   : > { %2484 = vmatpush.bf16.msra.mxu2 %v532_v2  ;;  %v4024_v37 = vld [vmem:[%s4257_s29 + $0x374] sm:$0xf0]  ;;  %v276_v2 = vld [vmem:[%s4184_s22 + $0x108] sm:$0xff] }
 0x1f9   : > { %vm3025_vm7 = vcmp.gt.f32.partialorder %v2237_v36, 0.0  ;;  %v3089_v38 = vmul.f32 0.01, %v2237_v36  ;;  %2100 = vmatmul.bf16.gmra.mxu1 %v5175_v44  ;;  %2189 = vmatmul.bf16.gmra.mxu2 %v5177_v25  ;;  %v278_v13 = vld [vmem:[%s4184_s22 + $0x118] sm:$0xff]  ;;  %v5209_v25 = vor.u32 %v4024_v37, %v3839_v9 }
 0x1fa   : > { %2306 = vmatpush.bf16.msra.mxu0 %v500_v28  ;;  %2573 = vmatpush.bf16.msra.mxu3 %v548_v21  ;;  %v516_v44 = vpack.c.bf16 %v278_v13, %v276_v2  ;;  %v4032_v2 = vld [vmem:[%s4257_s29 + $0x3b4] sm:$0xf0] }
 0x1fb   : > { %2278 = vmatmul.bf16.gmra.mxu3 %v5179_v57  ;;  %v3153_v53 = vsel %vm3025_vm7, %v2237_v36, %v3089_v38  ;;  %v4023_v38 = vld [vmem:[%s4257_s29 + $0x36c] sm:$0xf0] }
 0x1fc   : > { %3217 = vst [vmem:[%s5082_s12 + $0x70] sm:$0xff] %v3153_v53  ;;  %v2150_v10 = vpop.f32.mrf.mxu2  ;;  %v1974_v12 = vpop.f32.mrf.mxu0  ;;  %2395 = vmatpush.bf16.msra.mxu1 %v516_v44 }
 0x1fd   : > { %v2151_v11 = vadd.f32 %v2150_v10, %v2062_v8  ;;  %v1975_v36 = vadd.f32 %v1974_v12, %v4690_v7  ;;  %v4019_v8 = vld [vmem:[%s4257_s29 + $0x354] sm:$0xf]  ;;  %v5203_v12 = vor.u32 %v4023_v38, %v3831_v50 }
 0x1fe   : > { %v2239_v6 = vpop.f32.mrf.mxu3  ;;  %v2063_v58 = vpop.f32.mrf.mxu1  ;;  %v3833_v10 = vld [vmem:[%s4257_s29 + $0x370] sm:$0xf0] }
 0x1ff   : > { %v2240_v22 = vadd.f32 %v2239_v6, %v2151_v11  ;;  %v2064_v48 = vadd.f32 %v2063_v58, %v1975_v36  ;;  %v4020_v11 = vld [vmem:[%s4257_s29 + $0x35c] sm:$0xf]  ;;  %v5207_v21 = vor.u32 %v4019_v8, %v3833_v10 }
 0x200   : > { %v3841_v6 = vld [vmem:[%s4257_s29 + $0x378] sm:$0xf0] }
 0x201   : > { %vm3027_vm8 = vcmp.gt.f32.partialorder %v2240_v22, 0.0  ;;  %v3091_v53 = vmul.f32 0.01, %v2240_v22 }
 0x203   : > { %v3155_v27 = vsel %vm3027_vm8, %v2240_v22, %v3091_v53  ;;  %v5211_v22 = vor.u32 %v4020_v11, %v3841_v6  ;;  %v4027_v6 = vld [vmem:[%s4257_s29 + $0x394] sm:$0xf] }
 0x204   : > { %3219 = vst [vmem:[%s5082_s12 + $0x80] sm:$0xff] %v3155_v27  ;;  %v2152_v7 = vpop.f32.mrf.mxu2  ;;  %v1977_v57 = vpop.f32.mrf.mxu0  ;;  %v3863_v27 = vld [vmem:[%s4257_s29 + $0x390] sm:$0xf] }
 0x205   : > { %v2153_v47 = vadd.f32 %v2152_v7, %v2064_v48  ;;  %v1978_v36 = vadd.f32 %v1977_v57, %v4700_v35  ;;  %v4031_v48 = vld [vmem:[%s4257_s29 + $0x3ac] sm:$0xf0]  ;;  %v3865_v7 = vld [vmem:[%s4257_s29 + $0x3b0] sm:$0xf0] }
 0x206   : > { %v2241_v28 = vpop.f32.mrf.mxu3  ;;  %v2066_v14 = vpop.f32.mrf.mxu1 }
 0x207   : > { %v2242_v58 = vadd.f32 %v2241_v28, %v2153_v47  ;;  %2016 = vmatmul.bf16.gmra.mxu0 %v5203_v12  ;;  %v2067_v53 = vadd.f32 %v2066_v14, %v1978_v36  ;;  %v3871_v14 = vld [vmem:[%s4257_s29 + $0x398] sm:$0xf]  ;;  %v4028_v28 = vld [vmem:[%s4257_s29 + $0x39c] sm:$0xf] }
 0x209   : > { %vm3029_vm9 = vcmp.gt.f32.partialorder %v2242_v58, 0.0  ;;  %v3093_v50 = vmul.f32 0.01, %v2242_v58  ;;  %2105 = vmatmul.bf16.gmra.mxu1 %v5207_v21  ;;  %2194 = vmatmul.bf16.gmra.mxu2 %v5209_v25 }
 0x20b   : > { %2283 = vmatmul.bf16.gmra.mxu3 %v5211_v22  ;;  %v3157_v38 = vsel %vm3029_vm9, %v2242_v58, %v3093_v50  ;;  %v3873_v58 = vld [vmem:[%s4257_s29 + $0x3b8] sm:$0xf0]  ;;  %v5229_v50 = vor.u32 %v4031_v48, %v3863_v27 }
 0x20c   : > { %3221 = vst [vmem:[%s5082_s12 + $0x90] sm:$0xff] %v3157_v38  ;;  %v2155_v35 = vpop.f32.mrf.mxu2  ;;  %v1979_v8 = vpop.f32.mrf.mxu0 }
 0x20d   : > { %v2156_v44 = vadd.f32 %v2155_v35, %v2067_v53  ;;  %v1980_v37 = vadd.f32 %v1979_v8, %v4722_v29  ;;  %5933 = vst [vmem:[#allocation133_spill] sm:$0xff] %v5229_v50  ;;  %v5231_v35 = vor.u32 %v4027_v6, %v3865_v7  ;;  %v5235_v8 = vor.u32 %v4028_v28, %v3873_v58  ;;  %v464_v6 = vld [vmem:[%s4184_s22 + $0x6e8] sm:$0xff]  ;;  %v402_v28 = vld [vmem:[%s4184_s22 + $0x4f8] sm:$0xff] }
 0x20e   : > { %v2244_v57 = vpop.f32.mrf.mxu3  ;;  %v2068_v10 = vpop.f32.mrf.mxu1  ;;  %v400_v7 = vld [vmem:[%s4184_s22 + $0x4e8] sm:$0xff] }
 0x20f   : > { %v2245_v9 = vadd.f32 %v2244_v57, %v2156_v44  ;;  %v2069_v47 = vadd.f32 %v2068_v10, %v1980_v37  ;;  %5934 = vst [vmem:[#allocation134_spill] sm:$0xff] %v5231_v35  ;;  %v5233_v44 = vor.u32 %v4032_v2, %v3871_v14  ;;  %v496_v58 = vld [vmem:[%s4184_s22 + $0x7e8] sm:$0xff] }
 0x210   : > { %5936 = vst [vmem:[#allocation136_spill] sm:$0xff] %v5235_v8 }
 0x211   : > { %vm3031_vm10 = vcmp.gt.f32.partialorder %v2245_v9, 0.0  ;;  %v3095_v11 = vmul.f32 0.01, %v2245_v9  ;;  %5935 = vst [vmem:[#allocation135_spill] sm:$0xff] %v5233_v44 }
 0x213   : > { %v3159_v13 = vsel %vm3031_vm10, %v2245_v9, %v3095_v11 }
 0x214   : > { %3223 = vst [vmem:[%s5082_s12 + $0xa0] sm:$0xff] %v3159_v13  ;;  %v2157_v36 = vpop.f32.mrf.mxu2  ;;  %v1982_v29 = vpop.f32.mrf.mxu0 }
 0x215   : > { %v2158_v38 = vadd.f32 %v2157_v36, %v2069_v47  ;;  %v1983_v9 = vadd.f32 %v1982_v29, %v4738_v1  ;;  %v466_v1 = vld [vmem:[%s4184_s22 + $0x6f8] sm:$0xff] }
 0x216   : > { %v2246_v53 = vpop.f32.mrf.mxu3  ;;  %v2071_v57 = vpop.f32.mrf.mxu1  ;;  %v610_v47 = vpack.c.bf16 %v466_v1, %v464_v6  ;;  %v498_v36 = vld [vmem:[%s4184_s22 + $0x7f8] sm:$0xff] }
 0x217   : > { %v2247_v10 = vadd.f32 %v2246_v53, %v2158_v38  ;;  %2021 = vmatmul.bf16.gmra.mxu0 %v5229_v50  ;;  %v2072_v48 = vadd.f32 %v2071_v57, %v1983_v9  ;;  %v578_v53 = vpack.c.bf16 %v402_v28, %v400_v7  ;;  %v626_v29 = vpack.c.bf16 %v498_v36, %v496_v58  ;;  %v3895_v9 = vld [vmem:[%s4257_s29 + $0x3d0] sm:$0xf]  ;;  %v3903_v6 = vld [vmem:[%s4257_s29 + $0x3d8] sm:$0xf] }
 0x218   : > { %2833 = vmatpush.bf16.msrb.mxu2 %v610_v47  ;;  %v4040_v1 = vld [vmem:[%s4257_s29 + $0x3f4] sm:$0xf0]  ;;  %v432_v47 = vld [vmem:[%s4184_s22 + $0x5e8] sm:$0xff] }
 0x219   : > { %vm3033_vm11 = vcmp.gt.f32.partialorder %v2247_v10, 0.0  ;;  %v3097_v37 = vmul.f32 0.01, %v2247_v10  ;;  %2110 = vmatmul.bf16.gmra.mxu1 %v5231_v35  ;;  %2199 = vmatmul.bf16.gmra.mxu2 %v5233_v44  ;;  %v434_v58 = vld [vmem:[%s4184_s22 + $0x5f8] sm:$0xff]  ;;  %v5265_v44 = vor.u32 %v4040_v1, %v3903_v6 }
 0x21a   : > { %2655 = vmatpush.bf16.msrb.mxu0 %v578_v53  ;;  %2922 = vmatpush.bf16.msrb.mxu3 %v626_v29  ;;  %v594_v35 = vpack.c.bf16 %v434_v58, %v432_v47 }
 0x21b   : > { %2288 = vmatmul.bf16.gmra.mxu3 %v5235_v8  ;;  %v3161_v27 = vsel %vm3033_vm11, %v2247_v10, %v3097_v37  ;;  %v4039_v37 = vld [vmem:[%s4257_s29 + $0x3ec] sm:$0xf0] }
 0x21c   : > { %3225 = vst [vmem:[%s5082_s12 + $0xb0] sm:$0xff] %v3161_v27  ;;  %v2160_v11 = vpop.f32.mrf.mxu2  ;;  %v1984_v13 = vpop.f32.mrf.mxu0  ;;  %2744 = vmatpush.bf16.msrb.mxu1 %v594_v35 }
 0x21d   : > { %v2161_v14 = vadd.f32 %v2160_v11, %v2072_v48  ;;  %v1985_v10 = vadd.f32 %v1984_v13, %v4762_v23  ;;  %v4035_v48 = vld [vmem:[%s4257_s29 + $0x3d4] sm:$0xf]  ;;  %v5259_v13 = vor.u32 %v4039_v37, %v3895_v9 }
 0x21e   : > { %v2249_v2 = vpop.f32.mrf.mxu3  ;;  %v2073_v38 = vpop.f32.mrf.mxu1  ;;  %v3897_v11 = vld [vmem:[%s4257_s29 + $0x3f0] sm:$0xf0] }
 0x21f   : > { %v2250_v57 = vadd.f32 %v2249_v2, %v2161_v14  ;;  %v2074_v28 = vadd.f32 %v2073_v38, %v1985_v10  ;;  %v4036_v14 = vld [vmem:[%s4257_s29 + $0x3dc] sm:$0xf]  ;;  %v5263_v29 = vor.u32 %v4035_v48, %v3897_v11 }
 0x220   : > { %v3905_v2 = vld [vmem:[%s4257_s29 + $0x3f8] sm:$0xf0] }
 0x221   : > { %vm3035_vm12 = vcmp.gt.f32.partialorder %v2250_v57, 0.0  ;;  %v3099_v27 = vmul.f32 0.01, %v2250_v57 }
 0x223   : > { %v3163_v7 = vsel %vm3035_vm12, %v2250_v57, %v3099_v27  ;;  %v5267_v57 = vor.u32 %v4036_v14, %v3905_v2 }
 0x224   : > { %3227 = vst [vmem:[%s5082_s12 + $0xc0] sm:$0xff] %v3163_v7  ;;  %v2162_v23 = vpop.f32.mrf.mxu2  ;;  %v1987_v8 = vpop.f32.mrf.mxu0 }
 0x225   : > { %v2163_v36 = vadd.f32 %v2162_v23, %v2074_v28  ;;  %v1988_v10 = vadd.f32 %v1987_v8, %v4771_v16 }
 0x226   : > { %v2251_v53 = vpop.f32.mrf.mxu3  ;;  %v2076_v50 = vpop.f32.mrf.mxu1 }
 0x227   : > { %v2252_v38 = vadd.f32 %v2251_v53, %v2163_v36  ;;  %2026 = vmatmul.bf16.gmra.mxu0 %v5259_v13  ;;  %v2077_v27 = vadd.f32 %v2076_v50, %v1988_v10 }
 0x229   : > { %vm3037_vm13 = vcmp.gt.f32.partialorder %v2252_v38, 0.0  ;;  %v3101_v9 = vmul.f32 0.01, %v2252_v38  ;;  %2115 = vmatmul.bf16.gmra.mxu1 %v5263_v29  ;;  %2204 = vmatmul.bf16.gmra.mxu2 %v5265_v44 }
 0x22b   : > { %2293 = vmatmul.bf16.gmra.mxu3 %v5267_v57  ;;  %v3165_v37 = vsel %vm3037_vm13, %v2252_v38, %v3101_v9 }
 0x22c   : > { %3229 = vst [vmem:[%s5082_s12 + $0xd0] sm:$0xff] %v3165_v37  ;;  %v2165_v48 = vpop.f32.mrf.mxu2  ;;  %v1989_v1 = vpop.f32.mrf.mxu0  ;;  %v460_v37 = vld [vmem:[%s4184_s22 + $0x6c8] sm:$0xff] }
 0x22d   : > { %v2166_v11 = vadd.f32 %v2165_v48, %v2077_v27  ;;  %v1990_v8 = vadd.f32 %v1989_v1, %v4792_v40  ;;  %v462_v27 = vld [vmem:[%s4184_s22 + $0x6d8] sm:$0xff] }
 0x22e   : > { %v2254_v6 = vpop.f32.mrf.mxu3  ;;  %v2078_v16 = vpop.f32.mrf.mxu1  ;;  %v398_v1 = vld [vmem:[%s4184_s22 + $0x4d8] sm:$0xff] }
 0x22f   : > { %v2255_v35 = vadd.f32 %v2254_v6, %v2166_v11  ;;  %v2079_v14 = vadd.f32 %v2078_v16, %v1990_v8  ;;  %v608_v6 = vpack.c.bf16 %v462_v27, %v460_v37  ;;  %v492_v16 = vld [vmem:[%s4184_s22 + $0x7c8] sm:$0xff] }
 0x231   : > { %vm3039_vm14 = vcmp.gt.f32.partialorder %v2255_v35, 0.0  ;;  %v3103_v7 = vmul.f32 0.01, %v2255_v35  ;;  %2834 = vmatpush.bf16.msrb.mxu2 %v608_v6 }
 0x233   : > { %v3167_v28 = vsel %vm3039_vm14, %v2255_v35, %v3103_v7 }
 0x234   : > { %3231 = vst [vmem:[%s5082_s12 + $0xe0] sm:$0xff] %v3167_v28  ;;  %v2167_v2 = vpop.f32.mrf.mxu2  ;;  %v1992_v50 = vpop.f32.mrf.mxu0 }
 0x235   : > { %v2168_v23 = vadd.f32 %v2167_v2, %v2079_v14  ;;  %v1993_v53 = vadd.f32 %v1992_v50, %v4807_v41  ;;  %v396_v41 = vld [vmem:[%s4184_s22 + $0x4c8] sm:$0xff]  ;;  %v430_v50 = vld [vmem:[%s4184_s22 + $0x5d8] sm:$0xff] }
 0x236   : > { %v2256_v47 = vpop.f32.mrf.mxu3  ;;  %v2081_v58 = vpop.f32.mrf.mxu1  ;;  %v576_v35 = vpack.c.bf16 %v398_v1, %v396_v41 }
 0x237   : > { %v2257_v36 = vadd.f32 %v2256_v47, %v2168_v23  ;;  %2307 = vmatmul.bf16.vlgmr.msra.gmra.mxu0 %v4286_v49  ;;  %v2082_v10 = vadd.f32 %v2081_v58, %v1993_v53  ;;  %v428_v47 = vld [vmem:[%s4184_s22 + $0x5c8] sm:$0xff] }
 0x238   : > { %2656 = vmatpush.bf16.msrb.mxu0 %v576_v35 }
 0x239   : > { %vm3041_vm15 = vcmp.gt.f32.partialorder %v2257_v36, 0.0  ;;  %v3105_v40 = vmul.f32 0.01, %v2257_v36  ;;  %2396 = vmatmul.bf16.vlgmr.msra.gmra.mxu1 %v4291_v54  ;;  %2485 = vmatmul.bf16.vlgmr.msra.gmra.mxu2 %v4293_v55  ;;  %v494_v54 = vld [vmem:[%s4184_s22 + $0x7d8] sm:$0xff] }
 0x23b   : > { %2574 = vmatmul.bf16.vlgmr.msra.gmra.mxu3 %v4295_v56  ;;  %v3169_v38 = vsel %vm3041_vm15, %v2257_v36, %v3105_v40  ;;  %v624_v56 = vpack.c.bf16 %v494_v54, %v492_v16  ;;  %v592_v40 = vpack.c.bf16 %v430_v50, %v428_v47 }
 0x23c   : > { %3233 = vst [vmem:[%s5082_s12 + $0xf0] sm:$0xff] %v3169_v38  ;;  %v2170_v9 = vpop.f32.mrf.mxu2  ;;  %v1994_v11 = vpop.f32.mrf.mxu0 }
 0x23d   : > { %v2171_v48 = vadd.f32 %v2170_v9, %v2082_v10  ;;  %v1995_v7 = vadd.f32 %v1994_v11, %v4830_v15  ;;  %2923 = vmatpush.bf16.msrb.mxu3 %v624_v56  ;;  %2745 = vmatpush.bf16.msrb.mxu1 %v592_v40 }
 0x23e   : > { %v2259_v49 = vpop.f32.mrf.mxu3  ;;  %v2083_v55 = vpop.f32.mrf.mxu1 }
 0x23f   : > { %v2260_v8 = vadd.f32 %v2259_v49, %v2171_v48  ;;  %v2084_v2 = vadd.f32 %v2083_v55, %v1995_v7 }
 0x241   : > { %vm3043_vm0 = vcmp.gt.f32.partialorder %v2260_v8, 0.0  ;;  %v3107_v28 = vmul.f32 0.01, %v2260_v8 }
 0x243   : > { %v3171_v14 = vsel %vm3043_vm0, %v2260_v8, %v3107_v28 }
 0x244   : > { %3235 = vst [vmem:[%s5082_s12 + $0x100] sm:$0xff] %v3171_v14  ;;  %v2172_v23 = vpop.f32.mrf.mxu2  ;;  %v1997_v53 = vpop.f32.mrf.mxu0 }
 0x245   : > { %v2173_v58 = vadd.f32 %v2172_v23, %v2084_v2  ;;  %v1998_v15 = vadd.f32 %v1997_v53, %v4839_v26  ;;  %v456_v2 = vld [vmem:[%s4184_s22 + $0x6a8] sm:$0xff]  ;;  %v458_v23 = vld [vmem:[%s4184_s22 + $0x6b8] sm:$0xff] }
 0x246   : > { %v2261_v36 = vpop.f32.mrf.mxu3  ;;  %v2086_v38 = vpop.f32.mrf.mxu1  ;;  %v488_v53 = vld [vmem:[%s4184_s22 + $0x7a8] sm:$0xff] }
 0x247   : > { %v2262_v10 = vadd.f32 %v2261_v36, %v2173_v58  ;;  %2312 = vmatmul.bf16.gmra.mxu0 %v4319_v17  ;;  %v2087_v27 = vadd.f32 %v2086_v38, %v1998_v15  ;;  %v606_v58 = vpack.c.bf16 %v458_v23, %v456_v2  ;;  %v394_v36 = vld [vmem:[%s4184_s22 + $0x4b8] sm:$0xff]  ;;  %v5937_v23 = vld [vmem:[#allocation96_spill] sm:$0xff] }
 0x249   : > { %vm3045_vm1 = vcmp.gt.f32.partialorder %v2262_v10, 0.0  ;;  %v3109_v9 = vmul.f32 0.01, %v2262_v10  ;;  %2401 = vmatmul.bf16.gmra.mxu1 %v4321_v18  ;;  %2490 = vmatmul.bf16.gmra.mxu2 %v4323_v19 }
 0x24a   : > { %2835 = vmatpush.bf16.msrb.mxu2 %v606_v58  ;;  %v5941_v58 = vld [vmem:[#allocation5_spill] sm:$0xff] }
 0x24b   : > { %2579 = vmatmul.bf16.gmra.mxu3 %v4325_v20  ;;  %v3173_v37 = vsel %vm3045_vm1, %v2262_v10, %v3109_v9 }
 0x24c   : > { %3237 = vst [vmem:[%s5082_s12 + $0x110] sm:$0xff] %v3173_v37  ;;  %v2175_v41 = vpop.f32.mrf.mxu2  ;;  %v1999_v11 = vpop.f32.mrf.mxu0 }
 0x24d   : > { %v2176_v48 = vadd.f32 %v2175_v41, %v2087_v27  ;;  %v2000_v17 = vadd.f32 %v1999_v11, %v4860_v3  ;;  %v424_v41 = vld [vmem:[%s4184_s22 + $0x5a8] sm:$0xff] }
 0x24e   : > { %v2264_v49 = vpop.f32.mrf.mxu3  ;;  %v2088_v26 = vpop.f32.mrf.mxu1 }
 0x24f   : > { %v2265_v6 = vadd.f32 %v2264_v49, %v2176_v48  ;;  %v2089_v18 = vadd.f32 %v2088_v26, %v2000_v17  ;;  %v426_v48 = vld [vmem:[%s4184_s22 + $0x5b8] sm:$0xff] }
 0x251   : > { %vm3047_vm2 = vcmp.gt.f32.partialorder %v2265_v6, 0.0  ;;  %v3111_v1 = vmul.f32 0.01, %v2265_v6 }
 0x253   : > { %v3175_v16 = vsel %vm3047_vm2, %v2265_v6, %v3111_v1  ;;  %v590_v6 = vpack.c.bf16 %v426_v48, %v424_v41  ;;  %v486_v41 = vld [vmem:[%s4184_s22 + $0x798] sm:$0xff] }
 0x254   : > { %3239 = vst [vmem:[%s5082_s12 + $0x120] sm:$0xff] %v3175_v16  ;;  %v2177_v19 = vpop.f32.mrf.mxu2  ;;  %v2002_v55 = vpop.f32.mrf.mxu0 }
 0x255   : > { %v2178_v54 = vadd.f32 %v2177_v19, %v2089_v18  ;;  %v2003_v8 = vadd.f32 %v2002_v55, %v4875_v4  ;;  %v392_v4 = vld [vmem:[%s4184_s22 + $0x4a8] sm:$0xff]  ;;  %2746 = vmatpush.bf16.msrb.mxu1 %v590_v6  ;;  %v5942_v6 = vld [vmem:[#allocation102_spill] sm:$0xff] }
 0x256   : > { %v2266_v20 = vpop.f32.mrf.mxu3  ;;  %v2091_v35 = vpop.f32.mrf.mxu1  ;;  %v574_v40 = vpack.c.bf16 %v394_v36, %v392_v4 }
 0x257   : > { %v2267_v56 = vadd.f32 %v2266_v20, %v2178_v54  ;;  %2317 = vmatmul.bf16.gmra.mxu0 %v4340_v30  ;;  %v2092_v28 = vadd.f32 %v2091_v35, %v2003_v8 }
 0x258   : > { %2657 = vmatpush.bf16.msrb.mxu0 %v574_v40  ;;  %v454_v40 = vld [vmem:[%s4184_s22 + $0x698] sm:$0xff] }
 0x259   : > { %vm3049_vm3 = vcmp.gt.f32.partialorder %v2267_v56, 0.0  ;;  %v3113_v3 = vmul.f32 0.01, %v2267_v56  ;;  %2406 = vmatmul.bf16.gmra.mxu1 %v4342_v31  ;;  %2495 = vmatmul.bf16.gmra.mxu2 %v4344_v32  ;;  %v490_v31 = vld [vmem:[%s4184_s22 + $0x7b8] sm:$0xff] }
 0x25b   : > { %2584 = vmatmul.bf16.gmra.mxu3 %v4346_v33  ;;  %v3177_v7 = vsel %vm3049_vm3, %v2267_v56, %v3113_v3  ;;  %v622_v33 = vpack.c.bf16 %v490_v31, %v488_v53 }
 0x25c   : > { %3241 = vst [vmem:[%s5082_s12 + $0x130] sm:$0xff] %v3177_v7  ;;  %v2180_v14 = vpop.f32.mrf.mxu2  ;;  %v2004_v50 = vpop.f32.mrf.mxu0 }
 0x25d   : > { %v2181_v47 = vadd.f32 %v2180_v14, %v2092_v28  ;;  %v2005_v10 = vadd.f32 %v2004_v50, %v4898_v52  ;;  %2924 = vmatpush.bf16.msrb.mxu3 %v622_v33  ;;  %v5940_v50 = vld [vmem:[#allocation4_spill] sm:$0xff]  ;;  %v388_v33 = vld [vmem:[%s4184_s22 + $0x488] sm:$0xff] }
 0x25e   : > { %v2269_v30 = vpop.f32.mrf.mxu3  ;;  %v2093_v32 = vpop.f32.mrf.mxu1 }
 0x25f   : > { %v2270_v38 = vadd.f32 %v2269_v30, %v2181_v47  ;;  %v2094_v37 = vadd.f32 %v2093_v32, %v2005_v10  ;;  %v5938_v47 = vld [vmem:[#allocation2_spill] sm:$0xff]  ;;  %v5939_v30 = vld [vmem:[#allocation3_spill] sm:$0xff] }
 0x260   : > { %v452_v32 = vld [vmem:[%s4184_s22 + $0x688] sm:$0xff] }
 0x261   : > { %vm3051_vm4 = vcmp.gt.f32.partialorder %v2270_v38, 0.0  ;;  %v3115_v15 = vmul.f32 0.01, %v2270_v38 }
 0x263   : > { %v3179_v9 = vsel %vm3051_vm4, %v2270_v38, %v3115_v15 }
 0x264   : > { %3243 = vst [vmem:[%s5082_s12 + $0x140] sm:$0xff] %v3179_v9  ;;  %v2182_v27 = vpop.f32.mrf.mxu2  ;;  %v2007_v26 = vpop.f32.mrf.mxu0  ;;  %v604_v9 = vpack.c.bf16 %v454_v40, %v452_v32 }
 0x265   : > { %v2183_v49 = vadd.f32 %v2182_v27, %v2094_v37  ;;  %v2008_v52 = vadd.f32 %v2007_v26, %v4907_v59  ;;  %v390_v37 = vld [vmem:[%s4184_s22 + $0x498] sm:$0xff]  ;;  %v484_v27 = vld [vmem:[%s4184_s22 + $0x788] sm:$0xff] }
 0x266   : > { %v2271_v11 = vpop.f32.mrf.mxu3  ;;  %v2096_v17 = vpop.f32.mrf.mxu1  ;;  %2836 = vmatpush.bf16.msrb.mxu2 %v604_v9 }
 0x267   : > { %v2272_v1 = vadd.f32 %v2271_v11, %v2183_v49  ;;  %2322 = vmatmul.bf16.gmra.mxu0 %v4371_v61  ;;  %v2097_v19 = vadd.f32 %v2096_v17, %v2008_v52  ;;  %v572_v49 = vpack.c.bf16 %v390_v37, %v388_v33  ;;  %v620_v11 = vpack.c.bf16 %v486_v41, %v484_v27  ;;  %v5949_v37 = vld [vmem:[#allocation112_spill] sm:$0xff]  ;;  %v5950_v41 = vld [vmem:[#allocation10_spill] sm:$0xff] }
 0x269   : > { %vm3053_vm5 = vcmp.gt.f32.partialorder %v2272_v1, 0.0  ;;  %v3117_v16 = vmul.f32 0.01, %v2272_v1  ;;  %2411 = vmatmul.bf16.gmra.mxu1 %v4373_v62  ;;  %2500 = vmatmul.bf16.gmra.mxu2 %v4375_v63 }
 0x26a   : > { %2658 = vmatpush.bf16.msrb.mxu0 %v572_v49  ;;  %2925 = vmatpush.bf16.msrb.mxu3 %v620_v11  ;;  %v5951_v49 = vld [vmem:[#allocation11_spill] sm:$0xff]  ;;  %v5952_v11 = vld [vmem:[#allocation12_spill] sm:$0xff] }
 0x26b   : > { %2589 = vmatmul.bf16.gmra.mxu3 %v4377_v0  ;;  %v3181_v18 = vsel %vm3053_vm5, %v2272_v1, %v3117_v16 }
 0x26c   : > { %3245 = vst [vmem:[%s5082_s12 + $0x150] sm:$0xff] %v3181_v18  ;;  %v2185_v54 = vpop.f32.mrf.mxu2  ;;  %v2009_v35 = vpop.f32.mrf.mxu0 }
 0x26d   : > { %v2186_v20 = vadd.f32 %v2185_v54, %v2097_v19  ;;  %v2010_v61 = vadd.f32 %v2009_v35, %v4928_v45  ;;  %v420_v19 = vld [vmem:[%s4184_s22 + $0x588] sm:$0xff]  ;;  %v422_v54 = vld [vmem:[%s4184_s22 + $0x598] sm:$0xff] }
 0x26e   : > { %v2274_v55 = vpop.f32.mrf.mxu3  ;;  %v2098_v59 = vpop.f32.mrf.mxu1 }
 0x26f   : > { %v2275_v56 = vadd.f32 %v2274_v55, %v2186_v20  ;;  %v2099_v62 = vadd.f32 %v2098_v59, %v2010_v61  ;;  %v588_v59 = vpack.c.bf16 %v422_v54, %v420_v19 }
 0x271   : > { %vm3055_vm6 = vcmp.gt.f32.partialorder %v2275_v56, 0.0  ;;  %v3119_v8 = vmul.f32 0.01, %v2275_v56  ;;  %2747 = vmatpush.bf16.msrb.mxu1 %v588_v59  ;;  %v480_v59 = vld [vmem:[%s4184_s22 + $0x768] sm:$0xff] }
 0x273   : > { %v3183_v3 = vsel %vm3055_vm6, %v2275_v56, %v3119_v8  ;;  %v5943_v8 = vld [vmem:[#allocation104_spill] sm:$0xff] }
 0x274   : > { %3247 = vst [vmem:[%s5082_s12 + $0x160] sm:$0xff] %v3183_v3  ;;  %v2187_v63 = vpop.f32.mrf.mxu2  ;;  %v2012_v28 = vpop.f32.mrf.mxu0 }
 0x275   : > { %v2188_v7 = vadd.f32 %v2187_v63, %v2099_v62  ;;  %v2013_v4 = vadd.f32 %v2012_v28, %v5937_v23  ;;  %v5944_v62 = vld [vmem:[#allocation6_spill] sm:$0xff]  ;;  %v5947_v28 = vld [vmem:[#allocation9_spill] sm:$0xff] }
 0x276   : > { %v2276_v0 = vpop.f32.mrf.mxu3  ;;  %v2101_v14 = vpop.f32.mrf.mxu1 }
 0x277   : > { %v2277_v2 = vadd.f32 %v2276_v0, %v2188_v7  ;;  %2327 = vmatmul.bf16.gmra.mxu0 %v5938_v47  ;;  %v2102_v53 = vadd.f32 %v2101_v14, %v2013_v4  ;;  %v5945_v7 = vld [vmem:[#allocation7_spill] sm:$0xff]  ;;  %v5946_v0 = vld [vmem:[#allocation8_spill] sm:$0xff] }
 0x279   : > { %vm3057_vm7 = vcmp.gt.f32.partialorder %v2277_v2, 0.0  ;;  %v3121_v45 = vmul.f32 0.01, %v2277_v2  ;;  %2416 = vmatmul.bf16.gmra.mxu1 %v5939_v30  ;;  %2505 = vmatmul.bf16.gmra.mxu2 %v5940_v50 }
 0x27b   : > { %2594 = vmatmul.bf16.gmra.mxu3 %v5941_v58  ;;  %v3185_v36 = vsel %vm3057_vm7, %v2277_v2, %v3121_v45  ;;  %v5948_v58 = vld [vmem:[#allocation110_spill] sm:$0xff] }
 0x27c   : > { %3249 = vst [vmem:[%s5082_s12 + $0x170] sm:$0xff] %v3185_v36  ;;  %v2190_v31 = vpop.f32.mrf.mxu2  ;;  %v2014_v15 = vpop.f32.mrf.mxu0 }
 0x27d   : > { %v2191_v38 = vadd.f32 %v2190_v31, %v2102_v53  ;;  %v2015_v17 = vadd.f32 %v2014_v15, %v5942_v6 }
 0x27e   : > { %v2279_v10 = vpop.f32.mrf.mxu3  ;;  %v2103_v48 = vpop.f32.mrf.mxu1 }
 0x27f   : > { %v2280_v26 = vadd.f32 %v2279_v10, %v2191_v38  ;;  %v2104_v16 = vadd.f32 %v2103_v48, %v2015_v17 }
 0x281   : > { %vm3059_vm8 = vcmp.gt.f32.partialorder %v2280_v26, 0.0  ;;  %v3123_v1 = vmul.f32 0.01, %v2280_v26 }
 0x283   : > { %v3187_v52 = vsel %vm3059_vm8, %v2280_v26, %v3123_v1  ;;  %v5953_v26 = vld [vmem:[#allocation13_spill] sm:$0xff] }
 0x284   : > { %3251 = vst [vmem:[%s5082_s12 + $0x180] sm:$0xff] %v3187_v52  ;;  %v2192_v18 = vpop.f32.mrf.mxu2  ;;  %v2017_v35 = vpop.f32.mrf.mxu0  ;;  %v448_v52 = vld [vmem:[%s4184_s22 + $0x668] sm:$0xff] }
 0x285   : > { %v2193_v20 = vadd.f32 %v2192_v18, %v2104_v16  ;;  %v2018_v3 = vadd.f32 %v2017_v35, %v5943_v8  ;;  %v450_v16 = vld [vmem:[%s4184_s22 + $0x678] sm:$0xff]  ;;  %v384_v18 = vld [vmem:[%s4184_s22 + $0x468] sm:$0xff] }
 0x286   : > { %v2281_v55 = vpop.f32.mrf.mxu3  ;;  %v2106_v56 = vpop.f32.mrf.mxu1  ;;  %v386_v35 = vld [vmem:[%s4184_s22 + $0x478] sm:$0xff] }
 0x287   : > { %v2282_v61 = vadd.f32 %v2281_v55, %v2193_v20  ;;  %2332 = vmatmul.bf16.gmra.mxu0 %v5944_v62  ;;  %v2107_v2 = vadd.f32 %v2106_v56, %v2018_v3  ;;  %v602_v55 = vpack.c.bf16 %v450_v16, %v448_v52  ;;  %v482_v56 = vld [vmem:[%s4184_s22 + $0x778] sm:$0xff]  ;;  %v570_v8 = vpack.c.bf16 %v386_v35, %v384_v18 }
 0x288   : > { %v618_v3 = vpack.c.bf16 %v482_v56, %v480_v59  ;;  %v5961_v59 = vld [vmem:[#allocation19_spill] sm:$0xff] }
 0x289   : > { %vm3061_vm9 = vcmp.gt.f32.partialorder %v2282_v61, 0.0  ;;  %v3125_v63 = vmul.f32 0.01, %v2282_v61  ;;  %2421 = vmatmul.bf16.gmra.mxu1 %v5945_v7  ;;  %2510 = vmatmul.bf16.gmra.mxu2 %v5946_v0  ;;  %v416_v7 = vld [vmem:[%s4184_s22 + $0x568] sm:$0xff]  ;;  %v418_v0 = vld [vmem:[%s4184_s22 + $0x578] sm:$0xff] }
 0x28a   : > { %2837 = vmatpush.bf16.msrb.mxu2 %v602_v55  ;;  %2659 = vmatpush.bf16.msrb.mxu0 %v570_v8  ;;  %v5963_v8 = vld [vmem:[#allocation21_spill] sm:$0xff] }
 0x28b   : > { %2599 = vmatmul.bf16.gmra.mxu3 %v5947_v28  ;;  %v3189_v14 = vsel %vm3061_vm9, %v2282_v61, %v3125_v63  ;;  %v586_v28 = vpack.c.bf16 %v418_v0, %v416_v7  ;;  %v380_v7 = vld [vmem:[%s4184_s22 + $0x448] sm:$0xff] }
 0x28c   : > { %3253 = vst [vmem:[%s5082_s12 + $0x190] sm:$0xff] %v3189_v14  ;;  %v2195_v23 = vpop.f32.mrf.mxu2  ;;  %v2019_v45 = vpop.f32.mrf.mxu0  ;;  %2926 = vmatpush.bf16.msrb.mxu3 %v618_v3  ;;  %v5964_v3 = vld [vmem:[#allocation22_spill] sm:$0xff] }
 0x28d   : > { %v2196_v4 = vadd.f32 %v2195_v23, %v2107_v2  ;;  %v2020_v36 = vadd.f32 %v2019_v45, %v5948_v58  ;;  %2748 = vmatpush.bf16.msrb.mxu1 %v586_v28 }
 0x28e   : > { %v2284_v47 = vpop.f32.mrf.mxu3  ;;  %v2108_v30 = vpop.f32.mrf.mxu1 }
 0x28f   : > { %v2285_v50 = vadd.f32 %v2284_v47, %v2196_v4  ;;  %v2109_v32 = vadd.f32 %v2108_v30, %v2020_v36 }
 0x291   : > { %vm3063_vm10 = vcmp.gt.f32.partialorder %v2285_v50, 0.0  ;;  %v3127_v53 = vmul.f32 0.01, %v2285_v50 }
 0x293   : > { %v3191_v31 = vsel %vm3063_vm10, %v2285_v50, %v3127_v53  ;;  %v5955_v53 = vld [vmem:[#allocation14_spill] sm:$0xff] }
 0x294   : > { %3255 = vst [vmem:[%s5082_s12 + $0x1a0] sm:$0xff] %v3191_v31  ;;  %v2197_v40 = vpop.f32.mrf.mxu2  ;;  %v2022_v10 = vpop.f32.mrf.mxu0 }
 0x295   : > { %v2198_v33 = vadd.f32 %v2197_v40, %v2109_v32  ;;  %v2023_v27 = vadd.f32 %v2022_v10, %v5949_v37  ;;  %v5956_v32 = vld [vmem:[#allocation15_spill] sm:$0xff]  ;;  %v5957_v40 = vld [vmem:[#allocation16_spill] sm:$0xff] }
 0x296   : > { %v2286_v38 = vpop.f32.mrf.mxu3  ;;  %v2111_v15 = vpop.f32.mrf.mxu1 }
 0x297   : > { %v2287_v9 = vadd.f32 %v2286_v38, %v2198_v33  ;;  %2337 = vmatmul.bf16.gmra.mxu0 %v5950_v41  ;;  %v2112_v17 = vadd.f32 %v2111_v15, %v2023_v27  ;;  %v5958_v33 = vld [vmem:[#allocation17_spill] sm:$0xff] }
 0x299   : > { %vm3065_vm11 = vcmp.gt.f32.partialorder %v2287_v9, 0.0  ;;  %v3129_v48 = vmul.f32 0.01, %v2287_v9  ;;  %2426 = vmatmul.bf16.gmra.mxu1 %v5951_v49  ;;  %2515 = vmatmul.bf16.gmra.mxu2 %v5952_v11  ;;  %v5959_v49 = vld [vmem:[#allocation124_spill] sm:$0xff] }
 0x29b   : > { %2604 = vmatmul.bf16.gmra.mxu3 %v5953_v26  ;;  %v3193_v6 = vsel %vm3065_vm11, %v2287_v9, %v3129_v48 }
 0x29c   : > { %3257 = vst [vmem:[%s5082_s12 + $0x1b0] sm:$0xff] %v3193_v6  ;;  %v2200_v1 = vpop.f32.mrf.mxu2  ;;  %v2024_v20 = vpop.f32.mrf.mxu0 }
 0x29d   : > { %v2201_v19 = vadd.f32 %v2200_v1, %v2112_v17  ;;  %v2025_v63 = vadd.f32 %v2024_v20, %v5034_v46  ;;  %v5954_v46 = vld [vmem:[#allocation119_spill] sm:$0xff] }
 0x29e   : > { %v2289_v54 = vpop.f32.mrf.mxu3  ;;  %v2113_v61 = vpop.f32.mrf.mxu1 }
 0x29f   : > { %v2290_v62 = vadd.f32 %v2289_v54, %v2201_v19  ;;  %v2114_v23 = vadd.f32 %v2113_v61, %v2025_v63  ;;  %v5960_v19 = vld [vmem:[#allocation18_spill] sm:$0xff]  ;;  %v5962_v61 = vld [vmem:[#allocation20_spill] sm:$0xff]  ;;  %v446_v63 = vld [vmem:[%s4184_s22 + $0x658] sm:$0xff] }
 0x2a1   : > { %vm3067_vm12 = vcmp.gt.f32.partialorder %v2290_v62, 0.0  ;;  %v3131_v14 = vmul.f32 0.01, %v2290_v62 }
 0x2a3   : > { %v3195_v2 = vsel %vm3067_vm12, %v2290_v62, %v3131_v14  ;;  %v444_v62 = vld [vmem:[%s4184_s22 + $0x648] sm:$0xff]  ;;  %v382_v14 = vld [vmem:[%s4184_s22 + $0x458] sm:$0xff] }
 0x2a4   : > { %3259 = vst [vmem:[%s5082_s12 + $0x1c0] sm:$0xff] %v3195_v2  ;;  %v2202_v4 = vpop.f32.mrf.mxu2  ;;  %v2027_v30 = vpop.f32.mrf.mxu0  ;;  %v600_v28 = vpack.c.bf16 %v446_v63, %v444_v62  ;;  %v476_v2 = vld [vmem:[%s4184_s22 + $0x748] sm:$0xff]  ;;  %v5972_v62 = vld [vmem:[#allocation30_spill] sm:$0xff] }
 0x2a5   : > { %v2203_v47 = vadd.f32 %v2202_v4, %v2114_v23  ;;  %v2028_v36 = vadd.f32 %v2027_v30, %v5954_v46  ;;  %v478_v23 = vld [vmem:[%s4184_s22 + $0x758] sm:$0xff]  ;;  %v5965_v46 = vld [vmem:[#allocation23_spill] sm:$0xff] }
 0x2a6   : > { %v2291_v45 = vpop.f32.mrf.mxu3  ;;  %v2116_v50 = vpop.f32.mrf.mxu1  ;;  %2838 = vmatpush.bf16.msrb.mxu2 %v600_v28 }
 0x2a7   : > { %v2292_v58 = vadd.f32 %v2291_v45, %v2203_v47  ;;  %2342 = vmatmul.bf16.gmra.mxu0 %v5955_v53  ;;  %v2117_v10 = vadd.f32 %v2116_v50, %v2028_v36  ;;  %v568_v47 = vpack.c.bf16 %v382_v14, %v380_v7  ;;  %v616_v45 = vpack.c.bf16 %v478_v23, %v476_v2  ;;  %v5973_v14 = vld [vmem:[#allocation31_spill] sm:$0xff]  ;;  %v5974_v2 = vld [vmem:[#allocation32_spill] sm:$0xff]  ;;  %v5975_v23 = vld [vmem:[#allocation33_spill] sm:$0xff] }
 0x2a9   : > { %vm3069_vm13 = vcmp.gt.f32.partialorder %v2292_v58, 0.0  ;;  %v3133_v31 = vmul.f32 0.01, %v2292_v58  ;;  %2431 = vmatmul.bf16.gmra.mxu1 %v5956_v32  ;;  %2520 = vmatmul.bf16.gmra.mxu2 %v5957_v40  ;;  %v412_v32 = vld [vmem:[%s4184_s22 + $0x548] sm:$0xff]  ;;  %v414_v40 = vld [vmem:[%s4184_s22 + $0x558] sm:$0xff] }
 0x2aa   : > { %2660 = vmatpush.bf16.msrb.mxu0 %v568_v47  ;;  %2927 = vmatpush.bf16.msrb.mxu3 %v616_v45  ;;  %v440_v47 = vld [vmem:[%s4184_s22 + $0x628] sm:$0xff]  ;;  %v442_v45 = vld [vmem:[%s4184_s22 + $0x638] sm:$0xff] }
 0x2ab   : > { %2609 = vmatmul.bf16.gmra.mxu3 %v5958_v33  ;;  %v3197_v38 = vsel %vm3069_vm13, %v2292_v58, %v3133_v31 }
 0x2ac   : > { %3261 = vst [vmem:[%s5082_s12 + $0x1d0] sm:$0xff] %v3197_v38  ;;  %v2205_v15 = vpop.f32.mrf.mxu2  ;;  %v2029_v27 = vpop.f32.mrf.mxu0  ;;  %v584_v38 = vpack.c.bf16 %v414_v40, %v412_v32 }
 0x2ad   : > { %v2206_v9 = vadd.f32 %v2205_v15, %v2117_v10  ;;  %v2030_v11 = vadd.f32 %v2029_v27, %v5959_v49  ;;  %v5966_v27 = vld [vmem:[#allocation24_spill] sm:$0xff] }
 0x2ae   : > { %v2294_v37 = vpop.f32.mrf.mxu3  ;;  %v2118_v41 = vpop.f32.mrf.mxu1  ;;  %2749 = vmatpush.bf16.msrb.mxu1 %v584_v38 }
 0x2af   : > { %v2295_v48 = vadd.f32 %v2294_v37, %v2206_v9  ;;  %v2119_v17 = vadd.f32 %v2118_v41, %v2030_v11 }
 0x2b1   : > { %vm3071_vm14 = vcmp.gt.f32.partialorder %v2295_v48, 0.0  ;;  %v3135_v26 = vmul.f32 0.01, %v2295_v48 }
 0x2b3   : > { %v3199_v6 = vsel %vm3071_vm14, %v2295_v48, %v3135_v26  ;;  %v5967_v26 = vld [vmem:[#allocation25_spill] sm:$0xff] }
 0x2b4   : > { %3263 = vst [vmem:[%s5082_s12 + $0x1e0] sm:$0xff] %v3199_v6  ;;  %v2207_v1 = vpop.f32.mrf.mxu2  ;;  %v2308_v18 = vpop.f32.mrf.mxu0  ;;  %v5968_v6 = vld [vmem:[#allocation26_spill] sm:$0xff] }
 0x2b5   : > { %v2208_v52 = vadd.f32 %v2207_v1, %v2119_v17  ;;  %v2309_v54 = vadd.f32 %v2308_v18, %v5960_v19  ;;  %v5969_v17 = vld [vmem:[#allocation27_spill] sm:$0xff]  ;;  %v5970_v1 = vld [vmem:[#allocation28_spill] sm:$0xff] }
 0x2b6   : > { %v2296_v16 = vpop.f32.mrf.mxu3  ;;  %v2397_v20 = vpop.f32.mrf.mxu1 }
 0x2b7   : > { %v2297_v55 = vadd.f32 %v2296_v16, %v2208_v52  ;;  %v2398_v35 = vadd.f32 %v2397_v20, %v2309_v54  ;;  %2347 = vmatmul.bf16.gmra.mxu0 %v5961_v59  ;;  %v5971_v54 = vld [vmem:[#allocation29_spill] sm:$0xff] }
 0x2b9   : > { %vm3073_vm15 = vcmp.gt.f32.partialorder %v2297_v55, 0.0  ;;  %v3137_v56 = vmul.f32 0.01, %v2297_v55  ;;  %2436 = vmatmul.bf16.gmra.mxu1 %v5962_v61  ;;  %2525 = vmatmul.bf16.gmra.mxu2 %v5963_v8 }
 0x2bb   : > { %2614 = vmatmul.bf16.gmra.mxu3 %v5964_v3  ;;  %v3201_v0 = vsel %vm3073_vm15, %v2297_v55, %v3137_v56 }
 0x2bc   : > { %3265 = vst [vmem:[%s5082_s12 + $0x1f0] sm:$0xff] %v3201_v0  ;;  %v2486_v4 = vpop.f32.mrf.mxu2  ;;  %v2310_v58 = vpop.f32.mrf.mxu0 }
 0x2bd   : > { %v2487_v30 = vadd.f32 %v2486_v4, %v2398_v35  ;;  %v2311_v36 = vadd.f32 %v2310_v58, %v5965_v46  ;;  %v5976_v4 = vld [vmem:[#allocation34_spill] sm:$0xff]  ;;  %v378_v58 = vld [vmem:[%s4184_s22 + $0x438] sm:$0xff]  ;;  %v472_v46 = vld [vmem:[%s4184_s22 + $0x728] sm:$0xff] }
 0x2be   : > { %v2575_v50 = vpop.f32.mrf.mxu3  ;;  %v2399_v53 = vpop.f32.mrf.mxu1 }
 0x2bf   : > { %v5386_v31 = vadd.f32 %v2575_v50, %v2487_v30  ;;  %v2400_v33 = vadd.f32 %v2399_v53, %v2311_v36  ;;  %v376_v30 = vld [vmem:[%s4184_s22 + $0x428] sm:$0xff]  ;;  %v598_v50 = vpack.c.bf16 %v442_v45, %v440_v47  ;;  %v474_v36 = vld [vmem:[%s4184_s22 + $0x738] sm:$0xff] }
 0x2c0   : > { %v566_v32 = vpack.c.bf16 %v378_v58, %v376_v30  ;;  %v614_v40 = vpack.c.bf16 %v474_v36, %v472_v46 }
 0x2c1   : > { %2839 = vmatpush.bf16.msrb.mxu2 %v598_v50  ;;  %v5984_v50 = vld [vmem:[#allocation42_spill] sm:$0xff] }
 0x2c2   : > { %2661 = vmatpush.bf16.msrb.mxu0 %v566_v32  ;;  %2928 = vmatpush.bf16.msrb.mxu3 %v614_v40  ;;  %v5985_v32 = vld [vmem:[#allocation43_spill] sm:$0xff]  ;;  %v5986_v40 = vld [vmem:[#allocation44_spill] sm:$0xff] }
 0x2c4   : > { %v2488_v10 = vpop.f32.mrf.mxu2  ;;  %v2313_v37 = vpop.f32.mrf.mxu0 }
 0x2c5   : > { %v2489_v15 = vadd.f32 %v2488_v10, %v2400_v33  ;;  %v2314_v41 = vadd.f32 %v2313_v37, %v5966_v27 }
 0x2c6   : > { %v2577_v9 = vpop.f32.mrf.mxu3  ;;  %v2402_v48 = vpop.f32.mrf.mxu1 }
 0x2c7   : > { %v5391_v49 = vadd.f32 %v2577_v9, %v2489_v15  ;;  %v2403_v11 = vadd.f32 %v2402_v48, %v2314_v41  ;;  %2352 = vmatmul.bf16.gmra.mxu0 %v5967_v26  ;;  %v5977_v15 = vld [vmem:[#allocation35_spill] sm:$0xff]  ;;  %v410_v48 = vld [vmem:[%s4184_s22 + $0x538] sm:$0xff] }
 0x2c8   : > { %v408_v41 = vld [vmem:[%s4184_s22 + $0x528] sm:$0xff] }
 0x2c9   : > { %2441 = vmatmul.bf16.gmra.mxu1 %v5968_v6  ;;  %2530 = vmatmul.bf16.gmra.mxu2 %v5969_v17  ;;  %v582_v26 = vpack.c.bf16 %v410_v48, %v408_v41  ;;  %v374_v41 = vld [vmem:[%s4184_s22 + $0x418] sm:$0xff]  ;;  %v468_v48 = vld [vmem:[%s4184_s22 + $0x708] sm:$0xff] }
 0x2cb   : > { %2619 = vmatmul.bf16.gmra.mxu3 %v5970_v1  ;;  %2750 = vmatpush.bf16.msrb.mxu1 %v582_v26 }
 0x2cc   : > { %v2491_v52 = vpop.f32.mrf.mxu2  ;;  %v2315_v19 = vpop.f32.mrf.mxu0 }
 0x2cd   : > { %v2492_v16 = vadd.f32 %v2491_v52, %v2403_v11  ;;  %v2316_v20 = vadd.f32 %v2315_v19, %v5971_v54 }
 0x2ce   : > { %v2580_v18 = vpop.f32.mrf.mxu3  ;;  %v2404_v55 = vpop.f32.mrf.mxu1 }
 0x2cf   : > { %v5398_v35 = vadd.f32 %v2580_v18, %v2492_v16  ;;  %v2405_v59 = vadd.f32 %v2404_v55, %v2316_v20  ;;  %v5978_v16 = vld [vmem:[#allocation36_spill] sm:$0xff]  ;;  %v5979_v55 = vld [vmem:[#allocation37_spill] sm:$0xff] }
 0x2d4   : > { %v2493_v56 = vpop.f32.mrf.mxu2  ;;  %v2318_v3 = vpop.f32.mrf.mxu0 }
 0x2d5   : > { %v2494_v61 = vadd.f32 %v2493_v56, %v2405_v59  ;;  %v2319_v63 = vadd.f32 %v2318_v3, %v5972_v62  ;;  %v5980_v59 = vld [vmem:[#allocation38_spill] sm:$0xff]  ;;  %v5981_v56 = vld [vmem:[#allocation39_spill] sm:$0xff] }
 0x2d6   : > { %v2582_v8 = vpop.f32.mrf.mxu3  ;;  %v2407_v7 = vpop.f32.mrf.mxu1 }
 0x2d7   : > { %v5401_v0 = vadd.f32 %v2582_v8, %v2494_v61  ;;  %v2408_v28 = vadd.f32 %v2407_v7, %v2319_v63  ;;  %2357 = vmatmul.bf16.gmra.mxu0 %v5973_v14  ;;  %v5982_v61 = vld [vmem:[#allocation40_spill] sm:$0xff]  ;;  %v5983_v7 = vld [vmem:[#allocation41_spill] sm:$0xff] }
 0x2d9   : > { %2446 = vmatmul.bf16.gmra.mxu1 %v5974_v2  ;;  %2535 = vmatmul.bf16.gmra.mxu2 %v5975_v23 }
 0x2db   : > { %2624 = vmatmul.bf16.gmra.mxu3 %v5976_v4 }
 0x2dc   : > { %v2496_v53 = vpop.f32.mrf.mxu2  ;;  %v2320_v10 = vpop.f32.mrf.mxu0 }
 0x2dd   : > { %v2497_v33 = vadd.f32 %v2496_v53, %v2408_v28  ;;  %v2321_v9 = vadd.f32 %v2320_v10, %v5977_v15  ;;  %v436_v10 = vld [vmem:[%s4184_s22 + $0x608] sm:$0xff]  ;;  %v438_v15 = vld [vmem:[%s4184_s22 + $0x618] sm:$0xff] }
 0x2de   : > { %v2585_v38 = vpop.f32.mrf.mxu3  ;;  %v2409_v37 = vpop.f32.mrf.mxu1 }
 0x2df   : > { %v5414_v27 = vadd.f32 %v2585_v38, %v2497_v33  ;;  %v2410_v11 = vadd.f32 %v2409_v37, %v2321_v9  ;;  %v5987_v33 = vld [vmem:[#allocation45_spill] sm:$0xff]  ;;  %v5988_v38 = vld [vmem:[#allocation46_spill] sm:$0xff]  ;;  %v372_v9 = vld [vmem:[%s4184_s22 + $0x408] sm:$0xff]  ;;  %v596_v37 = vpack.c.bf16 %v438_v15, %v436_v10 }
 0x2e1   : > { %2840 = vmatpush.bf16.msrb.mxu2 %v596_v37 }
 0x2e4   : > { %v2498_v6 = vpop.f32.mrf.mxu2  ;;  %v2323_v52 = vpop.f32.mrf.mxu0 }
 0x2e5   : > { %v2499_v17 = vadd.f32 %v2498_v6, %v2410_v11  ;;  %v2324_v18 = vadd.f32 %v2323_v52, %v5978_v16  ;;  %v470_v11 = vld [vmem:[%s4184_s22 + $0x718] sm:$0xff]  ;;  %v564_v6 = vpack.c.bf16 %v374_v41, %v372_v9 }
 0x2e6   : > { %v2587_v1 = vpop.f32.mrf.mxu3  ;;  %v2412_v19 = vpop.f32.mrf.mxu1 }
 0x2e7   : > { %v5419_v54 = vadd.f32 %v2587_v1, %v2499_v17  ;;  %v2413_v20 = vadd.f32 %v2412_v19, %v2324_v18  ;;  %2362 = vmatmul.bf16.gmra.mxu0 %v5979_v55  ;;  %v612_v17 = vpack.c.bf16 %v470_v11, %v468_v48  ;;  %v5989_v18 = vld [vmem:[#allocation47_spill] sm:$0xff] }
 0x2e8   : > { %2662 = vmatpush.bf16.msrb.mxu0 %v564_v6 }
 0x2e9   : > { %2451 = vmatmul.bf16.gmra.mxu1 %v5980_v59  ;;  %2540 = vmatmul.bf16.gmra.mxu2 %v5981_v56  ;;  %v404_v59 = vld [vmem:[%s4184_s22 + $0x508] sm:$0xff]  ;;  %v406_v56 = vld [vmem:[%s4184_s22 + $0x518] sm:$0xff] }
 0x2ea   : > { %2929 = vmatpush.bf16.msrb.mxu3 %v612_v17 }
 0x2eb   : > { %2629 = vmatmul.bf16.gmra.mxu3 %v5982_v61 }
 0x2ec   : > { %v2501_v8 = vpop.f32.mrf.mxu2  ;;  %v2325_v63 = vpop.f32.mrf.mxu0 }
 0x2ed   : > { %v2502_v3 = vadd.f32 %v2501_v8, %v2413_v20  ;;  %v2326_v28 = vadd.f32 %v2325_v63, %v5983_v7  ;;  %v580_v8 = vpack.c.bf16 %v406_v56, %v404_v59 }
 0x2ee   : > { %v2590_v62 = vpop.f32.mrf.mxu3  ;;  %v2414_v14 = vpop.f32.mrf.mxu1 }
 0x2ef   : > { %v5426_v2 = vadd.f32 %v2590_v62, %v2502_v3  ;;  %v2415_v23 = vadd.f32 %v2414_v14, %v2326_v28  ;;  %2751 = vmatpush.bf16.msrb.mxu1 %v580_v8  ;;  %v5990_v28 = vld [vmem:[#allocation48_spill] sm:$0xff] }
 0x2f4   : > { %v2503_v4 = vpop.f32.mrf.mxu2  ;;  %v2328_v30 = vpop.f32.mrf.mxu0 }
 0x2f5   : > { %v2504_v47 = vadd.f32 %v2503_v4, %v2415_v23  ;;  %v2329_v58 = vadd.f32 %v2328_v30, %v5984_v50  ;;  %v5992_v30 = vld [vmem:[#allocation50_spill] sm:$0xff]  ;;  %v5993_v50 = vld [vmem:[#allocation51_spill] sm:$0xff] }
 0x2f6   : > { %v2592_v45 = vpop.f32.mrf.mxu3  ;;  %v2417_v46 = vpop.f32.mrf.mxu1 }
 0x2f7   : > { %v5429_v36 = vadd.f32 %v2592_v45, %v2504_v47  ;;  %v2418_v53 = vadd.f32 %v2417_v46, %v2329_v58  ;;  %2367 = vmatmul.bf16.gmra.mxu0 %v5985_v32  ;;  %v5991_v45 = vld [vmem:[#allocation49_spill] sm:$0xff]  ;;  %v5994_v58 = vld [vmem:[#allocation52_spill] sm:$0xff] }
 0x2f9   : > { %2456 = vmatmul.bf16.gmra.mxu1 %v5986_v40  ;;  %2545 = vmatmul.bf16.gmra.mxu2 %v5987_v33  ;;  %v5995_v33 = vld [vmem:[#allocation53_spill] sm:$0xff] }
 0x2fb   : > { %2634 = vmatmul.bf16.gmra.mxu3 %v5988_v38 }
 0x2fc   : > { %v2506_v26 = vpop.f32.mrf.mxu2  ;;  %v2330_v16 = vpop.f32.mrf.mxu0 }
 0x2fd   : > { %v2507_v1 = vadd.f32 %v2506_v26, %v2418_v53  ;;  %v2331_v19 = vadd.f32 %v2330_v16, %v5989_v18  ;;  %v5996_v26 = vld [vmem:[#allocation54_spill] sm:$0xff]  ;;  %v5997_v16 = vld [vmem:[#allocation55_spill] sm:$0xff]  ;;  %v5998_v18 = vld [vmem:[#allocation56_spill] sm:$0xff] }
 0x2fe   : > { %v2595_v52 = vpop.f32.mrf.mxu3  ;;  %v2419_v20 = vpop.f32.mrf.mxu1 }
 0x2ff   : > { %v5442_v55 = vadd.f32 %v2595_v52, %v2507_v1  ;;  %v2420_v61 = vadd.f32 %v2419_v20, %v2331_v19  ;;  %v5999_v19 = vld [vmem:[#allocation57_spill] sm:$0xff]  ;;  %v6000_v20 = vld [vmem:[#allocation58_spill] sm:$0xff] }
 0x304   : > { %v2508_v3 = vpop.f32.mrf.mxu2  ;;  %v2333_v7 = vpop.f32.mrf.mxu0 }
 0x305   : > { %v2509_v62 = vadd.f32 %v2508_v3, %v2420_v61  ;;  %v2334_v14 = vadd.f32 %v2333_v7, %v5990_v28  ;;  %v6001_v3 = vld [vmem:[#allocation59_spill] sm:$0xff] }
 0x306   : > { %v2597_v63 = vpop.f32.mrf.mxu3  ;;  %v2422_v23 = vpop.f32.mrf.mxu1 }
 0x307   : > { %v5447_v4 = vadd.f32 %v2597_v63, %v2509_v62  ;;  %v2423_v47 = vadd.f32 %v2422_v23, %v2334_v14  ;;  %2372 = vmatmul.bf16.gmra.mxu0 %v5991_v45 }
 0x309   : > { %2461 = vmatmul.bf16.gmra.mxu1 %v5992_v30  ;;  %2550 = vmatmul.bf16.gmra.mxu2 %v5993_v50  ;;  %v6002_v30 = vld [vmem:[#allocation60_spill] sm:$0xff] }
 0x30b   : > { %2639 = vmatmul.bf16.gmra.mxu3 %v5994_v58 }
 0x30c   : > { %v2511_v46 = vpop.f32.mrf.mxu2  ;;  %v2335_v40 = vpop.f32.mrf.mxu0 }
 0x30d   : > { %v2512_v53 = vadd.f32 %v2511_v46, %v2423_v47  ;;  %v2336_v38 = vadd.f32 %v2335_v40, %v5995_v33  ;;  %v6004_v40 = vld [vmem:[#allocation62_spill] sm:$0xff]  ;;  %v6005_v33 = vld [vmem:[#allocation63_spill] sm:$0xff] }
 0x30e   : > { %v2600_v32 = vpop.f32.mrf.mxu3  ;;  %v2424_v10 = vpop.f32.mrf.mxu1 }
 0x30f   : > { %v5454_v15 = vadd.f32 %v2600_v32, %v2512_v53  ;;  %v2425_v9 = vadd.f32 %v2424_v10, %v2336_v38  ;;  %v6003_v32 = vld [vmem:[#allocation61_spill] sm:$0xff]  ;;  %v6006_v38 = vld [vmem:[#allocation64_spill] sm:$0xff] }
 0x314   : > { %v2513_v37 = vpop.f32.mrf.mxu2  ;;  %v2338_v11 = vpop.f32.mrf.mxu0 }
 0x315   : > { %v2514_v41 = vadd.f32 %v2513_v37, %v2425_v9  ;;  %v2339_v6 = vadd.f32 %v2338_v11, %v5996_v26 }
 0x316   : > { %v2602_v48 = vpop.f32.mrf.mxu3  ;;  %v2427_v17 = vpop.f32.mrf.mxu1 }
 0x317   : > { %v5457_v1 = vadd.f32 %v2602_v48, %v2514_v41  ;;  %v2428_v52 = vadd.f32 %v2427_v17, %v2339_v6  ;;  %2377 = vmatmul.bf16.gmra.mxu0 %v5997_v16  ;;  %v6007_v48 = vld [vmem:[#allocation65_spill] sm:$0xff] }
 0x319   : > { %2466 = vmatmul.bf16.gmra.mxu1 %v5998_v18  ;;  %2555 = vmatmul.bf16.gmra.mxu2 %v5999_v19 }
 0x31b   : > { %2644 = vmatmul.bf16.gmra.mxu3 %v6000_v20  ;;  %v6008_v20 = vld [vmem:[#allocation66_spill] sm:$0xff] }
 0x31c   : > { %v2516_v59 = vpop.f32.mrf.mxu2  ;;  %v2340_v8 = vpop.f32.mrf.mxu0 }
 0x31d   : > { %v2517_v56 = vadd.f32 %v2516_v59, %v2428_v52  ;;  %v2341_v62 = vadd.f32 %v2340_v8, %v6001_v3  ;;  %v6009_v3 = vld [vmem:[#allocation67_spill] sm:$0xff] }
 0x31e   : > { %v2605_v61 = vpop.f32.mrf.mxu3  ;;  %v2429_v63 = vpop.f32.mrf.mxu1 }
 0x31f   : > { %v5464_v7 = vadd.f32 %v2605_v61, %v2517_v56  ;;  %v2430_v28 = vadd.f32 %v2429_v63, %v2341_v62  ;;  %v6010_v62 = vld [vmem:[#allocation68_spill] sm:$0xff]  ;;  %v6011_v63 = vld [vmem:[#allocation69_spill] sm:$0xff] }
 0x324   : > { %v2518_v14 = vpop.f32.mrf.mxu2  ;;  %v2343_v45 = vpop.f32.mrf.mxu0 }
 0x325   : > { %v2519_v23 = vadd.f32 %v2518_v14, %v2430_v28  ;;  %v2344_v50 = vadd.f32 %v2343_v45, %v6002_v30  ;;  %v6012_v28 = vld [vmem:[#allocation70_spill] sm:$0xff]  ;;  %v6013_v30 = vld [vmem:[#allocation71_spill] sm:$0xff] }
 0x326   : > { %v2607_v47 = vpop.f32.mrf.mxu3  ;;  %v2432_v58 = vpop.f32.mrf.mxu1 }
 0x327   : > { %v5467_v46 = vadd.f32 %v2607_v47, %v2519_v23  ;;  %v2433_v53 = vadd.f32 %v2432_v58, %v2344_v50  ;;  %2382 = vmatmul.bf16.gmra.mxu0 %v6003_v32 }
 0x329   : > { %2471 = vmatmul.bf16.gmra.mxu1 %v6004_v40  ;;  %2560 = vmatmul.bf16.gmra.mxu2 %v6005_v33 }
 0x32b   : > { %2649 = vmatmul.bf16.gmra.mxu3 %v6006_v38 }
 0x32c   : > { %v2521_v10 = vpop.f32.mrf.mxu2  ;;  %v2345_v41 = vpop.f32.mrf.mxu0 }
 0x32d   : > { %v2522_v9 = vadd.f32 %v2521_v10, %v2433_v53  ;;  %v2346_v11 = vadd.f32 %v2345_v41, %v6007_v48 }
 0x32e   : > { %v2610_v37 = vpop.f32.mrf.mxu3  ;;  %v2434_v26 = vpop.f32.mrf.mxu1 }
 0x32f   : > { %v5474_v6 = vadd.f32 %v2610_v37, %v2522_v9  ;;  %v2435_v17 = vadd.f32 %v2434_v26, %v2346_v11  ;;  %v6014_v9 = vld [vmem:[#allocation72_spill] sm:$0xff]  ;;  %v6015_v26 = vld [vmem:[#allocation73_spill] sm:$0xff] }
 0x334   : > { %v2523_v52 = vpop.f32.mrf.mxu2  ;;  %v2348_v19 = vpop.f32.mrf.mxu0 }
 0x335   : > { %v2524_v16 = vadd.f32 %v2523_v52, %v2435_v17  ;;  %v2349_v59 = vadd.f32 %v2348_v19, %v6008_v20  ;;  %v6016_v17 = vld [vmem:[#allocation74_spill] sm:$0xff]  ;;  %v6017_v52 = vld [vmem:[#allocation75_spill] sm:$0xff] }
 0x336   : > { %v2612_v18 = vpop.f32.mrf.mxu3  ;;  %v2437_v56 = vpop.f32.mrf.mxu1 }
 0x337   : > { %v5477_v61 = vadd.f32 %v2612_v18, %v2524_v16  ;;  %v2438_v8 = vadd.f32 %v2437_v56, %v2349_v59  ;;  %2663 = vmatmul.bf16.vlgmr.msrb.gmra.mxu0 %v6009_v3  ;;  %v6018_v16 = vld [vmem:[#allocation76_spill] sm:$0xff]  ;;  %v6019_v56 = vld [vmem:[#allocation77_spill] sm:$0xff] }
 0x339   : > { %2752 = vmatmul.bf16.vlgmr.msrb.gmra.mxu1 %v6010_v62  ;;  %2841 = vmatmul.bf16.vlgmr.msrb.gmra.mxu2 %v6011_v63 }
 0x33b   : > { %2930 = vmatmul.bf16.vlgmr.msrb.gmra.mxu3 %v6012_v28 }
 0x33c   : > { %v2526_v14 = vpop.f32.mrf.mxu2  ;;  %v2350_v45 = vpop.f32.mrf.mxu0 }
 0x33d   : > { %v2527_v23 = vadd.f32 %v2526_v14, %v2438_v8  ;;  %v2351_v50 = vadd.f32 %v2350_v45, %v6013_v30  ;;  %v6020_v45 = vld [vmem:[#allocation78_spill] sm:$0xff] }
 0x33e   : > { %v2615_v47 = vpop.f32.mrf.mxu3  ;;  %v2439_v58 = vpop.f32.mrf.mxu1 }
 0x33f   : > { %v5484_v53 = vadd.f32 %v2615_v47, %v2527_v23  ;;  %v2440_v32 = vadd.f32 %v2439_v58, %v2351_v50 }
 0x344   : > { %v2528_v40 = vpop.f32.mrf.mxu2  ;;  %v2353_v10 = vpop.f32.mrf.mxu0 }
 0x345   : > { %v2529_v33 = vadd.f32 %v2528_v40, %v2440_v32  ;;  %v2354_v37 = vadd.f32 %v2353_v10, %v6014_v9  ;;  %v6021_v40 = vld [vmem:[#allocation79_spill] sm:$0xff]  ;;  %v6024_v10 = vld [vmem:[#allocation82_spill] sm:$0xff] }
 0x346   : > { %v2617_v38 = vpop.f32.mrf.mxu3  ;;  %v2442_v41 = vpop.f32.mrf.mxu1 }
 0x347   : > { %v5487_v48 = vadd.f32 %v2617_v38, %v2529_v33  ;;  %v2443_v11 = vadd.f32 %v2442_v41, %v2354_v37  ;;  %2668 = vmatmul.bf16.gmra.mxu0 %v6015_v26  ;;  %v6022_v33 = vld [vmem:[#allocation80_spill] sm:$0xff]  ;;  %v6023_v38 = vld [vmem:[#allocation81_spill] sm:$0xff]  ;;  %v6025_v26 = vld [vmem:[#allocation83_spill] sm:$0xff] }
 0x349   : > { %2757 = vmatmul.bf16.gmra.mxu1 %v6016_v17  ;;  %2846 = vmatmul.bf16.gmra.mxu2 %v6017_v52 }
 0x34b   : > { %2935 = vmatmul.bf16.gmra.mxu3 %v6018_v16 }
 0x34c   : > { %v2531_v18 = vpop.f32.mrf.mxu2  ;;  %v2355_v59 = vpop.f32.mrf.mxu0 }
 0x34d   : > { %v2532_v19 = vadd.f32 %v2531_v18, %v2443_v11  ;;  %v2356_v8 = vadd.f32 %v2355_v59, %v6019_v56 }
 0x34e   : > { %v2620_v20 = vpop.f32.mrf.mxu3  ;;  %v2444_v3 = vpop.f32.mrf.mxu1 }
 0x34f   : > { %v5494_v62 = vadd.f32 %v2620_v20, %v2532_v19  ;;  %v2445_v63 = vadd.f32 %v2444_v3, %v2356_v8  ;;  %v6026_v8 = vld [vmem:[#allocation84_spill] sm:$0xff] }
 0x354   : > { %v2533_v28 = vpop.f32.mrf.mxu2  ;;  %v2358_v47 = vpop.f32.mrf.mxu0 }
 0x355   : > { %v2534_v14 = vadd.f32 %v2533_v28, %v2445_v63  ;;  %v2359_v30 = vadd.f32 %v2358_v47, %v6020_v45  ;;  %v6028_v47 = vld [vmem:[#allocation86_spill] sm:$0xff]  ;;  %v6029_v45 = vld [vmem:[#allocation87_spill] sm:$0xff] }
 0x356   : > { %v2622_v23 = vpop.f32.mrf.mxu3  ;;  %v2447_v50 = vpop.f32.mrf.mxu1 }
 0x357   : > { %v5497_v58 = vadd.f32 %v2622_v23, %v2534_v14  ;;  %v2448_v32 = vadd.f32 %v2447_v50, %v2359_v30  ;;  %2673 = vmatmul.bf16.gmra.mxu0 %v6021_v40  ;;  %v6027_v23 = vld [vmem:[#allocation85_spill] sm:$0xff]  ;;  %v6030_v30 = vld [vmem:[#allocation88_spill] sm:$0xff] }
 0x359   : > { %2762 = vmatmul.bf16.gmra.mxu1 %v6022_v33  ;;  %2851 = vmatmul.bf16.gmra.mxu2 %v6023_v38  ;;  %v6031_v38 = vld [vmem:[#allocation89_spill] sm:$0xff] }
 0x35b   : > { %2940 = vmatmul.bf16.gmra.mxu3 %v6024_v10 }
 0x35c   : > { %v2536_v9 = vpop.f32.mrf.mxu2  ;;  %v2360_v11 = vpop.f32.mrf.mxu0 }
 0x35d   : > { %v2537_v37 = vadd.f32 %v2536_v9, %v2448_v32  ;;  %v2361_v17 = vadd.f32 %v2360_v11, %v6025_v26 }
 0x35e   : > { %v2625_v41 = vpop.f32.mrf.mxu3  ;;  %v2449_v52 = vpop.f32.mrf.mxu1 }
 0x35f   : > { %v5504_v16 = vadd.f32 %v2625_v41, %v2537_v37  ;;  %v2450_v18 = vadd.f32 %v2449_v52, %v2361_v17 }
 0x364   : > { %v2538_v19 = vpop.f32.mrf.mxu2  ;;  %v2363_v56 = vpop.f32.mrf.mxu0 }
 0x365   : > { %v2539_v20 = vadd.f32 %v2538_v19, %v2450_v18  ;;  %v2364_v3 = vadd.f32 %v2363_v56, %v6026_v8  ;;  %v6032_v18 = vld [vmem:[#allocation90_spill] sm:$0xff]  ;;  %v6033_v8 = vld [vmem:[#allocation91_spill] sm:$0xff] }
 0x366   : > { %v2627_v59 = vpop.f32.mrf.mxu3  ;;  %v2452_v63 = vpop.f32.mrf.mxu1 }
 0x367   : > { %v5507_v28 = vadd.f32 %v2627_v59, %v2539_v20  ;;  %v2453_v14 = vadd.f32 %v2452_v63, %v2364_v3  ;;  %2678 = vmatmul.bf16.gmra.mxu0 %v6027_v23  ;;  %v6034_v3 = vld [vmem:[#allocation92_spill] sm:$0xff]  ;;  %v6035_v63 = vld [vmem:[#allocation93_spill] sm:$0xff] }
 0x369   : > { %2767 = vmatmul.bf16.gmra.mxu1 %v6028_v47  ;;  %2856 = vmatmul.bf16.gmra.mxu2 %v6029_v45 }
 0x36b   : > { %2945 = vmatmul.bf16.gmra.mxu3 %v6030_v30 }
 0x36c   : > { %v2541_v50 = vpop.f32.mrf.mxu2  ;;  %v2365_v33 = vpop.f32.mrf.mxu0 }
 0x36d   : > { %v2542_v32 = vadd.f32 %v2541_v50, %v2453_v14  ;;  %v2366_v10 = vadd.f32 %v2365_v33, %v6031_v38  ;;  %v6036_v14 = vld [vmem:[#allocation94_spill] sm:$0xff]  ;;  %v6037_v50 = vld [vmem:[#allocation95_spill] sm:$0xff] }
 0x36e   : > { %v2630_v40 = vpop.f32.mrf.mxu3  ;;  %v2454_v9 = vpop.f32.mrf.mxu1 }
 0x36f   : > { %v5514_v37 = vadd.f32 %v2630_v40, %v2542_v32  ;;  %v2455_v41 = vadd.f32 %v2454_v9, %v2366_v10 }
 0x374   : > { %v2543_v11 = vpop.f32.mrf.mxu2  ;;  %v2368_v52 = vpop.f32.mrf.mxu0 }
 0x375   : > { %v2544_v26 = vadd.f32 %v2543_v11, %v2455_v41  ;;  %v2369_v19 = vadd.f32 %v2368_v52, %v6032_v18 }
 0x376   : > { %v2632_v17 = vpop.f32.mrf.mxu3  ;;  %v2457_v20 = vpop.f32.mrf.mxu1 }
 0x377   : > { %v5517_v59 = vadd.f32 %v2632_v17, %v2544_v26  ;;  %v2458_v56 = vadd.f32 %v2457_v20, %v2369_v19  ;;  %2683 = vmatmul.bf16.gmra.mxu0 %v6033_v8  ;;  %v6038_v26 = vld [vmem:[#allocation97_spill] sm:$0xff]  ;;  %v6039_v20 = vld [vmem:[#allocation98_spill] sm:$0xff]  ;;  %v6041_v8 = vld [vmem:[#allocation100_spill] sm:$0xff] }
 0x379   : > { %2772 = vmatmul.bf16.gmra.mxu1 %v6034_v3  ;;  %2861 = vmatmul.bf16.gmra.mxu2 %v6035_v63  ;;  %v6042_v3 = vld [vmem:[#allocation101_spill] sm:$0xff] }
 0x37b   : > { %2950 = vmatmul.bf16.gmra.mxu3 %v6036_v14 }
 0x37c   : > { %v2546_v23 = vpop.f32.mrf.mxu2  ;;  %v2370_v30 = vpop.f32.mrf.mxu0 }
 0x37d   : > { %v2547_v47 = vadd.f32 %v2546_v23, %v2458_v56  ;;  %v2371_v32 = vadd.f32 %v2370_v30, %v6037_v50  ;;  %v6040_v56 = vld [vmem:[#allocation99_spill] sm:$0xff] }
 0x37e   : > { %v2635_v45 = vpop.f32.mrf.mxu3  ;;  %v2459_v40 = vpop.f32.mrf.mxu1 }
 0x37f   : > { %v5524_v33 = vadd.f32 %v2635_v45, %v2547_v47  ;;  %v2460_v38 = vadd.f32 %v2459_v40, %v2371_v32  ;;  %v6043_v45 = vld [vmem:[#allocation103_spill] sm:$0xff] }
 0x384   : > { %v2548_v10 = vpop.f32.mrf.mxu2  ;;  %v2373_v11 = vpop.f32.mrf.mxu0 }
 0x385   : > { %v2549_v9 = vadd.f32 %v2548_v10, %v2460_v38  ;;  %v2374_v17 = vadd.f32 %v2373_v11, %v6038_v26  ;;  %v6044_v11 = vld [vmem:[#allocation105_spill] sm:$0xff] }
 0x386   : > { %v2637_v41 = vpop.f32.mrf.mxu3  ;;  %v2462_v52 = vpop.f32.mrf.mxu1 }
 0x387   : > { %v5527_v18 = vadd.f32 %v2637_v41, %v2549_v9  ;;  %v2463_v19 = vadd.f32 %v2462_v52, %v2374_v17  ;;  %2688 = vmatmul.bf16.gmra.mxu0 %v6039_v20 }
 0x389   : > { %2777 = vmatmul.bf16.gmra.mxu1 %v6040_v56  ;;  %2866 = vmatmul.bf16.gmra.mxu2 %v6041_v8  ;;  %v6045_v56 = vld [vmem:[#allocation106_spill] sm:$0xff]  ;;  %v6047_v8 = vld [vmem:[#allocation108_spill] sm:$0xff] }
 0x38b   : > { %2955 = vmatmul.bf16.gmra.mxu3 %v6042_v3  ;;  %v6048_v3 = vld [vmem:[#allocation109_spill] sm:$0xff] }
 0x38c   : > { %v2551_v63 = vpop.f32.mrf.mxu2  ;;  %v2375_v47 = vpop.f32.mrf.mxu0 }
 0x38d   : > { %v2552_v14 = vadd.f32 %v2551_v63, %v2463_v19  ;;  %v2376_v30 = vadd.f32 %v2375_v47, %v6043_v45  ;;  %v6046_v19 = vld [vmem:[#allocation107_spill] sm:$0xff] }
 0x38e   : > { %v2640_v23 = vpop.f32.mrf.mxu3  ;;  %v2464_v50 = vpop.f32.mrf.mxu1  ;;  %v6049_v45 = vld [vmem:[#allocation111_spill] sm:$0xff] }
 0x38f   : > { %v5534_v32 = vadd.f32 %v2640_v23, %v2552_v14  ;;  %v2465_v40 = vadd.f32 %v2464_v50, %v2376_v30 }
 0x394   : > { %v2553_v38 = vpop.f32.mrf.mxu2  ;;  %v2378_v41 = vpop.f32.mrf.mxu0 }
 0x395   : > { %v2554_v10 = vadd.f32 %v2553_v38, %v2465_v40  ;;  %v2379_v26 = vadd.f32 %v2378_v41, %v6044_v11 }
 0x396   : > { %v2642_v9 = vpop.f32.mrf.mxu3  ;;  %v2467_v17 = vpop.f32.mrf.mxu1 }
 0x397   : > { %v5537_v52 = vadd.f32 %v2642_v9, %v2554_v10  ;;  %v2468_v20 = vadd.f32 %v2467_v17, %v2379_v26  ;;  %2693 = vmatmul.bf16.gmra.mxu0 %v6045_v56  ;;  %v6050_v26 = vld [vmem:[#allocation113_spill] sm:$0xff] }
 0x399   : > { %2782 = vmatmul.bf16.gmra.mxu1 %v6046_v19  ;;  %2871 = vmatmul.bf16.gmra.mxu2 %v6047_v8 }
 0x39b   : > { %2960 = vmatmul.bf16.gmra.mxu3 %v6048_v3  ;;  %v6051_v3 = vld [vmem:[#allocation114_spill] sm:$0xff] }
 0x39c   : > { %v2556_v63 = vpop.f32.mrf.mxu2  ;;  %v2380_v47 = vpop.f32.mrf.mxu0 }
 0x39d   : > { %v2557_v14 = vadd.f32 %v2556_v63, %v2468_v20  ;;  %v2381_v30 = vadd.f32 %v2380_v47, %v6049_v45  ;;  %v6052_v20 = vld [vmem:[#allocation115_spill] sm:$0xff]  ;;  %v6053_v63 = vld [vmem:[#allocation116_spill] sm:$0xff]  ;;  %v6054_v47 = vld [vmem:[#allocation117_spill] sm:$0xff] }
 0x39e   : > { %v2645_v23 = vpop.f32.mrf.mxu3  ;;  %v2469_v50 = vpop.f32.mrf.mxu1 }
 0x39f   : > { %v5544_v40 = vadd.f32 %v2645_v23, %v2557_v14  ;;  %v2470_v38 = vadd.f32 %v2469_v50, %v2381_v30  ;;  %v6055_v50 = vld [vmem:[#allocation118_spill] sm:$0xff] }
 0x3a4   : > { %v2558_v10 = vpop.f32.mrf.mxu2  ;;  %v2383_v11 = vpop.f32.mrf.mxu0 }
 0x3a5   : > { %v2559_v9 = vadd.f32 %v2558_v10, %v2470_v38  ;;  %v2384_v17 = vadd.f32 %v2383_v11, %v6050_v26 }
 0x3a6   : > { %v2647_v41 = vpop.f32.mrf.mxu3  ;;  %v2472_v56 = vpop.f32.mrf.mxu1 }
 0x3a7   : > { %v5547_v19 = vadd.f32 %v2647_v41, %v2559_v9  ;;  %v2473_v8 = vadd.f32 %v2472_v56, %v2384_v17  ;;  %2698 = vmatmul.bf16.gmra.mxu0 %v6051_v3 }
 0x3a9   : > { %2787 = vmatmul.bf16.gmra.mxu1 %v6052_v20  ;;  %2876 = vmatmul.bf16.gmra.mxu2 %v6053_v63 }
 0x3ab   : > { %2965 = vmatmul.bf16.gmra.mxu3 %v6054_v47  ;;  %v6057_v47 = vld [vmem:[#allocation120_spill] sm:$0xff] }
 0x3ac   : > { %v2561_v14 = vpop.f32.mrf.mxu2  ;;  %v2385_v30 = vpop.f32.mrf.mxu0 }
 0x3ad   : > { %v2562_v23 = vadd.f32 %v2561_v14, %v2473_v8  ;;  %v2386_v38 = vadd.f32 %v2385_v30, %v6055_v50  ;;  %v6058_v8 = vld [vmem:[#allocation121_spill] sm:$0xff]  ;;  %v6059_v14 = vld [vmem:[#allocation122_spill] sm:$0xff]  ;;  %v6060_v30 = vld [vmem:[#allocation123_spill] sm:$0xff] }
 0x3ae   : > { %v2650_v45 = vpop.f32.mrf.mxu3  ;;  %v2474_v10 = vpop.f32.mrf.mxu1 }
 0x3af   : > { %v5554_v11 = vadd.f32 %v2650_v45, %v2562_v23  ;;  %v2475_v9 = vadd.f32 %v2474_v10, %v2386_v38 }
 0x3b4   : > { %v2563_v41 = vpop.f32.mrf.mxu2  ;;  %v2664_v56 = vpop.f32.mrf.mxu0 }
 0x3b5   : > { %v2564_v26 = vadd.f32 %v2563_v41, %v2475_v9  ;;  %v2665_v63 = vadd.f32 %v2664_v56, %v5386_v31 }
 0x3b6   : > { %v2652_v17 = vpop.f32.mrf.mxu3  ;;  %v2753_v3 = vpop.f32.mrf.mxu1 }
 0x3b7   : > { %v5556_v20 = vadd.f32 %v2652_v17, %v2564_v26  ;;  %2703 = vmatmul.bf16.gmra.mxu0 %v6057_v47  ;;  %v2754_v23 = vadd.f32 %v2753_v3, %v2665_v63 }
 0x3b9   : > { %6056 = vst [vmem:[#allocation96_spill] sm:$0xff] %v5556_v20  ;;  %2792 = vmatmul.bf16.gmra.mxu1 %v6058_v8  ;;  %2881 = vmatmul.bf16.gmra.mxu2 %v6059_v14 }
 0x3bb   : > { %2970 = vmatmul.bf16.gmra.mxu3 %v6060_v30 }
 0x3bc   : > { %v2842_v45 = vpop.f32.mrf.mxu2  ;;  %v2666_v10 = vpop.f32.mrf.mxu0 }
 0x3bd   : > { %v2843_v50 = vadd.f32 %v2842_v45, %v2754_v23  ;;  %v2667_v26 = vadd.f32 %v2666_v10, %v5391_v49 }
 0x3be   : > { %v2931_v38 = vpop.f32.mrf.mxu3  ;;  %v2755_v9 = vpop.f32.mrf.mxu1 }
 0x3bf   : > { %v2932_v41 = vadd.f32 %v2931_v38, %v2843_v50  ;;  %v2756_v56 = vadd.f32 %v2755_v9, %v2667_v26 }
 0x3c1   : > { %vm3012_vm0 = vcmp.gt.f32.partialorder %v2932_v41, 0.0  ;;  %v3076_v31 = vmul.f32 0.01, %v2932_v41 }
 0x3c3   : > { %v3140_v17 = vsel %vm3012_vm0, %v2932_v41, %v3076_v31 }
 0x3c4   : > { %3204 = vst [vmem:[%s5082_s12 + $0x8] sm:$0xff] %v3140_v17  ;;  %v2844_v47 = vpop.f32.mrf.mxu2  ;;  %v2669_v20 = vpop.f32.mrf.mxu0 }
 0x3c5   : > { %v2845_v8 = vadd.f32 %v2844_v47, %v2756_v56  ;;  %v2670_v63 = vadd.f32 %v2669_v20, %v5398_v35 }
 0x3c6   : > { %v2933_v14 = vpop.f32.mrf.mxu3  ;;  %v2758_v30 = vpop.f32.mrf.mxu1 }
 0x3c7   : > { %v2934_v3 = vadd.f32 %v2933_v14, %v2845_v8  ;;  %2708 = vmatmul.bf16.gmra.mxu0 %v5091_v42  ;;  %v2759_v45 = vadd.f32 %v2758_v30, %v2670_v63  ;;  %v6061_v14 = vld [vmem:[#allocation125_spill] sm:$0xff]  ;;  %v6064_v63 = vld [vmem:[#allocation128_spill] sm:$0xff] }
 0x3c9   : > { %vm3014_vm1 = vcmp.gt.f32.partialorder %v2934_v3, 0.0  ;;  %v3078_v23 = vmul.f32 0.01, %v2934_v3  ;;  %2797 = vmatmul.bf16.gmra.mxu1 %v5095_v60  ;;  %2886 = vmatmul.bf16.gmra.mxu2 %v5097_v24 }
 0x3cb   : > { %2975 = vmatmul.bf16.gmra.mxu3 %v5099_v39  ;;  %v3142_v49 = vsel %vm3014_vm1, %v2934_v3, %v3078_v23  ;;  %v6062_v3 = vld [vmem:[#allocation126_spill] sm:$0xff] }
 0x3cc   : > { %3206 = vst [vmem:[%s5082_s12 + $0x18] sm:$0xff] %v3142_v49  ;;  %v2847_v50 = vpop.f32.mrf.mxu2  ;;  %v2671_v9 = vpop.f32.mrf.mxu0 }
 0x3cd   : > { %v2848_v38 = vadd.f32 %v2847_v50, %v2759_v45  ;;  %v2672_v42 = vadd.f32 %v2671_v9, %v5401_v0  ;;  %v6063_v0 = vld [vmem:[#allocation127_spill] sm:$0xff] }
 0x3ce   : > { %v2936_v10 = vpop.f32.mrf.mxu3  ;;  %v2760_v41 = vpop.f32.mrf.mxu1 }
 0x3cf   : > { %v2937_v35 = vadd.f32 %v2936_v10, %v2848_v38  ;;  %v2761_v60 = vadd.f32 %v2760_v41, %v2672_v42 }
 0x3d1   : > { %vm3016_vm2 = vcmp.gt.f32.partialorder %v2937_v35, 0.0  ;;  %v3080_v20 = vmul.f32 0.01, %v2937_v35 }
 0x3d3   : > { %v3144_v26 = vsel %vm3016_vm2, %v2937_v35, %v3080_v20 }
 0x3d4   : > { %3208 = vst [vmem:[%s5082_s12 + $0x28] sm:$0xff] %v3144_v26  ;;  %v2849_v24 = vpop.f32.mrf.mxu2  ;;  %v2674_v17 = vpop.f32.mrf.mxu0 }
 0x3d5   : > { %v2850_v31 = vadd.f32 %v2849_v24, %v2761_v60  ;;  %v2675_v8 = vadd.f32 %v2674_v17, %v5414_v27 }
 0x3d6   : > { %v2938_v39 = vpop.f32.mrf.mxu3  ;;  %v2763_v56 = vpop.f32.mrf.mxu1 }
 0x3d7   : > { %v2939_v47 = vadd.f32 %v2938_v39, %v2850_v31  ;;  %2713 = vmatmul.bf16.gmra.mxu0 %v6061_v14  ;;  %v2764_v49 = vadd.f32 %v2763_v56, %v2675_v8 }
 0x3d9   : > { %vm3018_vm3 = vcmp.gt.f32.partialorder %v2939_v47, 0.0  ;;  %v3082_v30 = vmul.f32 0.01, %v2939_v47  ;;  %2802 = vmatmul.bf16.gmra.mxu1 %v6062_v3  ;;  %2891 = vmatmul.bf16.gmra.mxu2 %v6063_v0 }
 0x3db   : > { %2980 = vmatmul.bf16.gmra.mxu3 %v6064_v63  ;;  %v3146_v23 = vsel %vm3018_vm3, %v2939_v47, %v3082_v30 }
 0x3dc   : > { %3210 = vst [vmem:[%s5082_s12 + $0x38] sm:$0xff] %v3146_v23  ;;  %v2852_v45 = vpop.f32.mrf.mxu2  ;;  %v2676_v10 = vpop.f32.mrf.mxu0 }
 0x3dd   : > { %v2853_v50 = vadd.f32 %v2852_v45, %v2764_v49  ;;  %v2677_v41 = vadd.f32 %v2676_v10, %v5419_v54 }
 0x3de   : > { %v2941_v38 = vpop.f32.mrf.mxu3  ;;  %v2765_v9 = vpop.f32.mrf.mxu1 }
 0x3df   : > { %v2942_v27 = vadd.f32 %v2941_v38, %v2853_v50  ;;  %v2766_v20 = vadd.f32 %v2765_v9, %v2677_v41 }
 0x3e1   : > { %vm3020_vm4 = vcmp.gt.f32.partialorder %v2942_v27, 0.0  ;;  %v3084_v35 = vmul.f32 0.01, %v2942_v27 }
 0x3e3   : > { %v3148_v42 = vsel %vm3020_vm4, %v2942_v27, %v3084_v35  ;;  %v6065_v27 = vld [vmem:[#allocation129_spill] sm:$0xff]  ;;  %v6066_v35 = vld [vmem:[#allocation130_spill] sm:$0xff] }
 0x3e4   : > { %3212 = vst [vmem:[%s5082_s12 + $0x48] sm:$0xff] %v3148_v42  ;;  %v2854_v26 = vpop.f32.mrf.mxu2  ;;  %v2679_v31 = vpop.f32.mrf.mxu0  ;;  %v6068_v42 = vld [vmem:[#allocation132_spill] sm:$0xff] }
 0x3e5   : > { %v2855_v60 = vadd.f32 %v2854_v26, %v2766_v20  ;;  %v2680_v56 = vadd.f32 %v2679_v31, %v5426_v2 }
 0x3e6   : > { %v2943_v24 = vpop.f32.mrf.mxu3  ;;  %v2768_v39 = vpop.f32.mrf.mxu1 }
 0x3e7   : > { %v2944_v17 = vadd.f32 %v2943_v24, %v2855_v60  ;;  %2718 = vmatmul.bf16.gmra.mxu0 %v5147_v43  ;;  %v2769_v8 = vadd.f32 %v2768_v39, %v2680_v56 }
 0x3e9   : > { %vm3022_vm5 = vcmp.gt.f32.partialorder %v2944_v17, 0.0  ;;  %v3086_v47 = vmul.f32 0.01, %v2944_v17  ;;  %2807 = vmatmul.bf16.gmra.mxu1 %v5151_v34  ;;  %2896 = vmatmul.bf16.gmra.mxu2 %v5153_v51 }
 0x3eb   : > { %2985 = vmatmul.bf16.gmra.mxu3 %v5155_v5  ;;  %v3150_v54 = vsel %vm3022_vm5, %v2944_v17, %v3086_v47 }
 0x3ec   : > { %3214 = vst [vmem:[%s5082_s12 + $0x58] sm:$0xff] %v3150_v54  ;;  %v2857_v14 = vpop.f32.mrf.mxu2  ;;  %v2681_v0 = vpop.f32.mrf.mxu0 }
 0x3ed   : > { %v2858_v30 = vadd.f32 %v2857_v14, %v2769_v8  ;;  %v2682_v43 = vadd.f32 %v2681_v0, %v5429_v36  ;;  %v6067_v36 = vld [vmem:[#allocation131_spill] sm:$0xff] }
 0x3ee   : > { %v2946_v3 = vpop.f32.mrf.mxu3  ;;  %v2770_v63 = vpop.f32.mrf.mxu1 }
 0x3ef   : > { %v2947_v2 = vadd.f32 %v2946_v3, %v2858_v30  ;;  %v2771_v34 = vadd.f32 %v2770_v63, %v2682_v43 }
 0x3f1   : > { %vm3024_vm6 = vcmp.gt.f32.partialorder %v2947_v2, 0.0  ;;  %v3088_v23 = vmul.f32 0.01, %v2947_v2 }
 0x3f3   : > { %v3152_v49 = vsel %vm3024_vm6, %v2947_v2, %v3088_v23 }
 0x3f4   : > { %3216 = vst [vmem:[%s5082_s12 + $0x68] sm:$0xff] %v3152_v49  ;;  %v2859_v51 = vpop.f32.mrf.mxu2  ;;  %v2684_v50 = vpop.f32.mrf.mxu0 }
 0x3f5   : > { %v2860_v45 = vadd.f32 %v2859_v51, %v2771_v34  ;;  %v2685_v9 = vadd.f32 %v2684_v50, %v5442_v55 }
 0x3f6   : > { %v2948_v5 = vpop.f32.mrf.mxu3  ;;  %v2773_v38 = vpop.f32.mrf.mxu1 }
 0x3f7   : > { %v2949_v10 = vadd.f32 %v2948_v5, %v2860_v45  ;;  %2723 = vmatmul.bf16.gmra.mxu0 %v6065_v27  ;;  %v2774_v26 = vadd.f32 %v2773_v38, %v2685_v9 }
 0x3f9   : > { %vm3026_vm7 = vcmp.gt.f32.partialorder %v2949_v10, 0.0  ;;  %v3090_v41 = vmul.f32 0.01, %v2949_v10  ;;  %2812 = vmatmul.bf16.gmra.mxu1 %v6066_v35  ;;  %2901 = vmatmul.bf16.gmra.mxu2 %v6067_v36 }
 0x3fb   : > { %2990 = vmatmul.bf16.gmra.mxu3 %v6068_v42  ;;  %v3154_v20 = vsel %vm3026_vm7, %v2949_v10, %v3090_v41  ;;  %v6069_v42 = vld [vmem:[#allocation133_spill] sm:$0xff] }
 0x3fc   : > { %3218 = vst [vmem:[%s5082_s12 + $0x78] sm:$0xff] %v3154_v20  ;;  %v2862_v60 = vpop.f32.mrf.mxu2  ;;  %v2686_v39 = vpop.f32.mrf.mxu0 }
 0x3fd   : > { %v2863_v24 = vadd.f32 %v2862_v60, %v2774_v26  ;;  %v2687_v56 = vadd.f32 %v2686_v39, %v5447_v4  ;;  %v6070_v26 = vld [vmem:[#allocation134_spill] sm:$0xff]  ;;  %v6072_v60 = vld [vmem:[#allocation136_spill] sm:$0xff] }
 0x3fe   : > { %v2951_v31 = vpop.f32.mrf.mxu3  ;;  %v2775_v17 = vpop.f32.mrf.mxu1 }
 0x3ff   : > { %v2952_v55 = vadd.f32 %v2951_v31, %v2863_v24  ;;  %v2776_v8 = vadd.f32 %v2775_v17, %v2687_v56 }
 0x401   : > { %vm3028_vm8 = vcmp.gt.f32.partialorder %v2952_v55, 0.0  ;;  %v3092_v47 = vmul.f32 0.01, %v2952_v55 }
 0x403   : > { %v3156_v54 = vsel %vm3028_vm8, %v2952_v55, %v3092_v47 }
 0x404   : > { %3220 = vst [vmem:[%s5082_s12 + $0x88] sm:$0xff] %v3156_v54  ;;  %v2864_v14 = vpop.f32.mrf.mxu2  ;;  %v2689_v0 = vpop.f32.mrf.mxu0 }
 0x405   : > { %v2865_v30 = vadd.f32 %v2864_v14, %v2776_v8  ;;  %v2690_v43 = vadd.f32 %v2689_v0, %v5454_v15 }
 0x406   : > { %v2953_v3 = vpop.f32.mrf.mxu3  ;;  %v2778_v63 = vpop.f32.mrf.mxu1 }
 0x407   : > { %v2954_v2 = vadd.f32 %v2953_v3, %v2865_v30  ;;  %2728 = vmatmul.bf16.gmra.mxu0 %v5203_v12  ;;  %v2779_v49 = vadd.f32 %v2778_v63, %v2690_v43 }
 0x409   : > { %vm3030_vm9 = vcmp.gt.f32.partialorder %v2954_v2, 0.0  ;;  %v3094_v23 = vmul.f32 0.01, %v2954_v2  ;;  %2817 = vmatmul.bf16.gmra.mxu1 %v5207_v21  ;;  %2906 = vmatmul.bf16.gmra.mxu2 %v5209_v25 }
 0x40b   : > { %2995 = vmatmul.bf16.gmra.mxu3 %v5211_v22  ;;  %v3158_v4 = vsel %vm3030_vm9, %v2954_v2, %v3094_v23 }
 0x40c   : > { %3222 = vst [vmem:[%s5082_s12 + $0x98] sm:$0xff] %v3158_v4  ;;  %v2867_v34 = vpop.f32.mrf.mxu2  ;;  %v2691_v5 = vpop.f32.mrf.mxu0 }
 0x40d   : > { %v2868_v51 = vadd.f32 %v2867_v34, %v2779_v49  ;;  %v2692_v12 = vadd.f32 %v2691_v5, %v5457_v1  ;;  %v6071_v1 = vld [vmem:[#allocation135_spill] sm:$0xff] }
 0x40e   : > { %v2956_v45 = vpop.f32.mrf.mxu3  ;;  %v2780_v50 = vpop.f32.mrf.mxu1 }
 0x40f   : > { %v2957_v15 = vadd.f32 %v2956_v45, %v2868_v51  ;;  %v2781_v21 = vadd.f32 %v2780_v50, %v2692_v12 }
 0x411   : > { %vm3032_vm10 = vcmp.gt.f32.partialorder %v2957_v15, 0.0  ;;  %v3096_v38 = vmul.f32 0.01, %v2957_v15 }
 0x413   : > { %v3160_v10 = vsel %vm3032_vm10, %v2957_v15, %v3096_v38 }
 0x414   : > { %3224 = vst [vmem:[%s5082_s12 + $0xa8] sm:$0xff] %v3160_v10  ;;  %v2869_v25 = vpop.f32.mrf.mxu2  ;;  %v2694_v27 = vpop.f32.mrf.mxu0 }
 0x415   : > { %v2870_v9 = vadd.f32 %v2869_v25, %v2781_v21  ;;  %v2695_v36 = vadd.f32 %v2694_v27, %v5464_v7 }
 0x416   : > { %v2958_v22 = vpop.f32.mrf.mxu3  ;;  %v2783_v41 = vpop.f32.mrf.mxu1 }
 0x417   : > { %v2959_v35 = vadd.f32 %v2958_v22, %v2870_v9  ;;  %2733 = vmatmul.bf16.gmra.mxu0 %v6069_v42  ;;  %v2784_v31 = vadd.f32 %v2783_v41, %v2695_v36 }
 0x419   : > { %vm3034_vm11 = vcmp.gt.f32.partialorder %v2959_v35, 0.0  ;;  %v3098_v20 = vmul.f32 0.01, %v2959_v35  ;;  %2822 = vmatmul.bf16.gmra.mxu1 %v6070_v26  ;;  %2911 = vmatmul.bf16.gmra.mxu2 %v6071_v1 }
 0x41b   : > { %3000 = vmatmul.bf16.gmra.mxu3 %v6072_v60  ;;  %v3162_v24 = vsel %vm3034_vm11, %v2959_v35, %v3098_v20 }
 0x41c   : > { %3226 = vst [vmem:[%s5082_s12 + $0xb8] sm:$0xff] %v3162_v24  ;;  %v2872_v39 = vpop.f32.mrf.mxu2  ;;  %v2696_v56 = vpop.f32.mrf.mxu0 }
 0x41d   : > { %v2873_v17 = vadd.f32 %v2872_v39, %v2784_v31  ;;  %v2697_v54 = vadd.f32 %v2696_v56, %v5467_v46 }
 0x41e   : > { %v2961_v55 = vpop.f32.mrf.mxu3  ;;  %v2785_v47 = vpop.f32.mrf.mxu1 }
 0x41f   : > { %v2962_v7 = vadd.f32 %v2961_v55, %v2873_v17  ;;  %v2786_v30 = vadd.f32 %v2785_v47, %v2697_v54 }
 0x421   : > { %vm3036_vm12 = vcmp.gt.f32.partialorder %v2962_v7, 0.0  ;;  %v3100_v8 = vmul.f32 0.01, %v2962_v7 }
 0x423   : > { %v3164_v14 = vsel %vm3036_vm12, %v2962_v7, %v3100_v8 }
 0x424   : > { %3228 = vst [vmem:[%s5082_s12 + $0xc8] sm:$0xff] %v3164_v14  ;;  %v2874_v3 = vpop.f32.mrf.mxu2  ;;  %v2699_v2 = vpop.f32.mrf.mxu0 }
 0x425   : > { %v2875_v0 = vadd.f32 %v2874_v3, %v2786_v30  ;;  %v2700_v4 = vadd.f32 %v2699_v2, %v5474_v6 }
 0x426   : > { %v2963_v63 = vpop.f32.mrf.mxu3  ;;  %v2788_v43 = vpop.f32.mrf.mxu1 }
 0x427   : > { %v2964_v23 = vadd.f32 %v2963_v63, %v2875_v0  ;;  %2738 = vmatmul.bf16.gmra.mxu0 %v5259_v13  ;;  %v2789_v34 = vadd.f32 %v2788_v43, %v2700_v4 }
 0x429   : > { %vm3038_vm13 = vcmp.gt.f32.partialorder %v2964_v23, 0.0  ;;  %v3102_v49 = vmul.f32 0.01, %v2964_v23  ;;  %2827 = vmatmul.bf16.gmra.mxu1 %v5263_v29  ;;  %2916 = vmatmul.bf16.gmra.mxu2 %v5265_v44 }
 0x42b   : > { %3005 = vmatmul.bf16.gmra.mxu3 %v5267_v57  ;;  %v3166_v46 = vsel %vm3038_vm13, %v2964_v23, %v3102_v49 }
 0x42c   : > { %3230 = vst [vmem:[%s5082_s12 + $0xd8] sm:$0xff] %v3166_v46  ;;  %v2877_v51 = vpop.f32.mrf.mxu2  ;;  %v2701_v50 = vpop.f32.mrf.mxu0 }
 0x42d   : > { %v2878_v45 = vadd.f32 %v2877_v51, %v2789_v34  ;;  %v2702_v13 = vadd.f32 %v2701_v50, %v5477_v61 }
 0x42e   : > { %v2966_v5 = vpop.f32.mrf.mxu3  ;;  %v2790_v15 = vpop.f32.mrf.mxu1 }
 0x42f   : > { %v2967_v6 = vadd.f32 %v2966_v5, %v2878_v45  ;;  %v2791_v38 = vadd.f32 %v2790_v15, %v2702_v13 }
 0x431   : > { %vm3040_vm14 = vcmp.gt.f32.partialorder %v2967_v6, 0.0  ;;  %v3104_v12 = vmul.f32 0.01, %v2967_v6 }
 0x433   : > { %v3168_v29 = vsel %vm3040_vm14, %v2967_v6, %v3104_v12 }
 0x434   : > { %3232 = vst [vmem:[%s5082_s12 + $0xe8] sm:$0xff] %v3168_v29  ;;  %v2879_v44 = vpop.f32.mrf.mxu2  ;;  %v2704_v21 = vpop.f32.mrf.mxu0 }
 0x435   : > { %v2880_v10 = vadd.f32 %v2879_v44, %v2791_v38  ;;  %v2705_v22 = vadd.f32 %v2704_v21, %v5484_v53 }
 0x436   : > { %v2968_v57 = vpop.f32.mrf.mxu3  ;;  %v2793_v25 = vpop.f32.mrf.mxu1 }
 0x437   : > { %v2969_v9 = vadd.f32 %v2968_v57, %v2880_v10  ;;  %v2794_v35 = vadd.f32 %v2793_v25, %v2705_v22 }
 0x439   : > { %vm3042_vm15 = vcmp.gt.f32.partialorder %v2969_v9, 0.0  ;;  %v3106_v27 = vmul.f32 0.01, %v2969_v9 }
 0x43b   : > { %v3170_v41 = vsel %vm3042_vm15, %v2969_v9, %v3106_v27 }
 0x43c   : > { %3234 = vst [vmem:[%s5082_s12 + $0xf8] sm:$0xff] %v3170_v41  ;;  %v2882_v61 = vpop.f32.mrf.mxu2  ;;  %v2706_v20 = vpop.f32.mrf.mxu0 }
 0x43d   : > { %v2883_v36 = vadd.f32 %v2882_v61, %v2794_v35  ;;  %v2707_v60 = vadd.f32 %v2706_v20, %v5487_v48 }
 0x43e   : > { %v2971_v42 = vpop.f32.mrf.mxu3  ;;  %v2795_v26 = vpop.f32.mrf.mxu1 }
 0x43f   : > { %v2972_v1 = vadd.f32 %v2971_v42, %v2883_v36  ;;  %v2796_v39 = vadd.f32 %v2795_v26, %v2707_v60 }
 0x441   : > { %vm3044_vm0 = vcmp.gt.f32.partialorder %v2972_v1, 0.0  ;;  %v3108_v24 = vmul.f32 0.01, %v2972_v1 }
 0x443   : > { %v3172_v31 = vsel %vm3044_vm0, %v2972_v1, %v3108_v24 }
 0x444   : > { %3236 = vst [vmem:[%s5082_s12 + $0x108] sm:$0xff] %v3172_v31  ;;  %v2884_v53 = vpop.f32.mrf.mxu2  ;;  %v2709_v56 = vpop.f32.mrf.mxu0 }
 0x445   : > { %v2885_v17 = vadd.f32 %v2884_v53, %v2796_v39  ;;  %v2710_v54 = vadd.f32 %v2709_v56, %v5494_v62 }
 0x446   : > { %v2973_v55 = vpop.f32.mrf.mxu3  ;;  %v2798_v47 = vpop.f32.mrf.mxu1 }
 0x447   : > { %v2974_v7 = vadd.f32 %v2973_v55, %v2885_v17  ;;  %v2799_v30 = vadd.f32 %v2798_v47, %v2710_v54 }
 0x449   : > { %vm3046_vm1 = vcmp.gt.f32.partialorder %v2974_v7, 0.0  ;;  %v3110_v8 = vmul.f32 0.01, %v2974_v7 }
 0x44b   : > { %v3174_v14 = vsel %vm3046_vm1, %v2974_v7, %v3110_v8 }
 0x44c   : > { %3238 = vst [vmem:[%s5082_s12 + $0x118] sm:$0xff] %v3174_v14  ;;  %v2887_v48 = vpop.f32.mrf.mxu2  ;;  %v2711_v63 = vpop.f32.mrf.mxu0 }
 0x44d   : > { %v2888_v3 = vadd.f32 %v2887_v48, %v2799_v30  ;;  %v2712_v23 = vadd.f32 %v2711_v63, %v5497_v58 }
 0x44e   : > { %v2976_v0 = vpop.f32.mrf.mxu3  ;;  %v2800_v2 = vpop.f32.mrf.mxu1 }
 0x44f   : > { %v2977_v43 = vadd.f32 %v2976_v0, %v2888_v3  ;;  %v2801_v46 = vadd.f32 %v2800_v2, %v2712_v23 }
 0x451   : > { %vm3048_vm2 = vcmp.gt.f32.partialorder %v2977_v43, 0.0  ;;  %v3112_v4 = vmul.f32 0.01, %v2977_v43 }
 0x453   : > { %v3176_v49 = vsel %vm3048_vm2, %v2977_v43, %v3112_v4 }
 0x454   : > { %3240 = vst [vmem:[%s5082_s12 + $0x128] sm:$0xff] %v3176_v49  ;;  %v2889_v62 = vpop.f32.mrf.mxu2  ;;  %v2714_v45 = vpop.f32.mrf.mxu0 }
 0x455   : > { %v2890_v34 = vadd.f32 %v2889_v62, %v2801_v46  ;;  %v2715_v15 = vadd.f32 %v2714_v45, %v5504_v16 }
 0x456   : > { %v2978_v51 = vpop.f32.mrf.mxu3  ;;  %v2803_v5 = vpop.f32.mrf.mxu1 }
 0x457   : > { %v2979_v50 = vadd.f32 %v2978_v51, %v2890_v34  ;;  %v2804_v12 = vadd.f32 %v2803_v5, %v2715_v15 }
 0x459   : > { %vm3050_vm3 = vcmp.gt.f32.partialorder %v2979_v50, 0.0  ;;  %v3114_v6 = vmul.f32 0.01, %v2979_v50 }
 0x45b   : > { %v3178_v13 = vsel %vm3050_vm3, %v2979_v50, %v3114_v6 }
 0x45c   : > { %3242 = vst [vmem:[%s5082_s12 + $0x138] sm:$0xff] %v3178_v13  ;;  %v2892_v58 = vpop.f32.mrf.mxu2  ;;  %v2716_v44 = vpop.f32.mrf.mxu0 }
 0x45d   : > { %v2893_v29 = vadd.f32 %v2892_v58, %v2804_v12  ;;  %v2717_v21 = vadd.f32 %v2716_v44, %v5507_v28 }
 0x45e   : > { %v2981_v38 = vpop.f32.mrf.mxu3  ;;  %v2805_v10 = vpop.f32.mrf.mxu1 }
 0x45f   : > { %v2982_v57 = vadd.f32 %v2981_v38, %v2893_v29  ;;  %v2806_v22 = vadd.f32 %v2805_v10, %v2717_v21 }
 0x461   : > { %vm3052_vm4 = vcmp.gt.f32.partialorder %v2982_v57, 0.0  ;;  %v3116_v25 = vmul.f32 0.01, %v2982_v57 }
 0x463   : > { %v3180_v9 = vsel %vm3052_vm4, %v2982_v57, %v3116_v25 }
 0x464   : > { %3244 = vst [vmem:[%s5082_s12 + $0x148] sm:$0xff] %v3180_v9  ;;  %v2894_v16 = vpop.f32.mrf.mxu2  ;;  %v2719_v35 = vpop.f32.mrf.mxu0 }
 0x465   : > { %v2895_v27 = vadd.f32 %v2894_v16, %v2806_v22  ;;  %v2720_v42 = vadd.f32 %v2719_v35, %v5514_v37 }
 0x466   : > { %v2983_v41 = vpop.f32.mrf.mxu3  ;;  %v2808_v61 = vpop.f32.mrf.mxu1 }
 0x467   : > { %v2984_v36 = vadd.f32 %v2983_v41, %v2895_v27  ;;  %v2809_v1 = vadd.f32 %v2808_v61, %v2720_v42 }
 0x469   : > { %vm3054_vm5 = vcmp.gt.f32.partialorder %v2984_v36, 0.0  ;;  %v3118_v20 = vmul.f32 0.01, %v2984_v36 }
 0x46b   : > { %v3182_v26 = vsel %vm3054_vm5, %v2984_v36, %v3118_v20 }
 0x46c   : > { %3246 = vst [vmem:[%s5082_s12 + $0x158] sm:$0xff] %v3182_v26  ;;  %v2897_v28 = vpop.f32.mrf.mxu2  ;;  %v2721_v31 = vpop.f32.mrf.mxu0 }
 0x46d   : > { %v2898_v60 = vadd.f32 %v2897_v28, %v2809_v1  ;;  %v2722_v17 = vadd.f32 %v2721_v31, %v5517_v59 }
 0x46e   : > { %v2986_v24 = vpop.f32.mrf.mxu3  ;;  %v2810_v39 = vpop.f32.mrf.mxu1 }
 0x46f   : > { %v2987_v53 = vadd.f32 %v2986_v24, %v2898_v60  ;;  %v2811_v47 = vadd.f32 %v2810_v39, %v2722_v17 }
 0x471   : > { %vm3056_vm6 = vcmp.gt.f32.partialorder %v2987_v53, 0.0  ;;  %v3120_v55 = vmul.f32 0.01, %v2987_v53 }
 0x473   : > { %v3184_v56 = vsel %vm3056_vm6, %v2987_v53, %v3120_v55 }
 0x474   : > { %3248 = vst [vmem:[%s5082_s12 + $0x168] sm:$0xff] %v3184_v56  ;;  %v2899_v37 = vpop.f32.mrf.mxu2  ;;  %v2724_v8 = vpop.f32.mrf.mxu0 }
 0x475   : > { %v2900_v7 = vadd.f32 %v2899_v37, %v2811_v47  ;;  %v2725_v48 = vadd.f32 %v2724_v8, %v5524_v33 }
 0x476   : > { %v2988_v54 = vpop.f32.mrf.mxu3  ;;  %v2813_v14 = vpop.f32.mrf.mxu1 }
 0x477   : > { %v2989_v30 = vadd.f32 %v2988_v54, %v2900_v7  ;;  %v2814_v63 = vadd.f32 %v2813_v14, %v2725_v48 }
 0x479   : > { %vm3058_vm7 = vcmp.gt.f32.partialorder %v2989_v30, 0.0  ;;  %v3122_v3 = vmul.f32 0.01, %v2989_v30 }
 0x47b   : > { %v3186_v0 = vsel %vm3058_vm7, %v2989_v30, %v3122_v3 }
 0x47c   : > { %3250 = vst [vmem:[%s5082_s12 + $0x178] sm:$0xff] %v3186_v0  ;;  %v2902_v59 = vpop.f32.mrf.mxu2  ;;  %v2726_v23 = vpop.f32.mrf.mxu0 }
 0x47d   : > { %v2903_v2 = vadd.f32 %v2902_v59, %v2814_v63  ;;  %v2727_v46 = vadd.f32 %v2726_v23, %v5527_v18 }
 0x47e   : > { %v2991_v43 = vpop.f32.mrf.mxu3  ;;  %v2815_v4 = vpop.f32.mrf.mxu1 }
 0x47f   : > { %v2992_v49 = vadd.f32 %v2991_v43, %v2903_v2  ;;  %v2816_v51 = vadd.f32 %v2815_v4, %v2727_v46  ;;  %v6073_v43 = vld [vmem:[#allocation96_spill] sm:$0xff] }
 0x481   : > { %vm3060_vm8 = vcmp.gt.f32.partialorder %v2992_v49, 0.0  ;;  %v3124_v62 = vmul.f32 0.01, %v2992_v49 }
 0x483   : > { %v3188_v34 = vsel %vm3060_vm8, %v2992_v49, %v3124_v62 }
 0x484   : > { %3252 = vst [vmem:[%s5082_s12 + $0x188] sm:$0xff] %v3188_v34  ;;  %v2904_v33 = vpop.f32.mrf.mxu2  ;;  %v2729_v50 = vpop.f32.mrf.mxu0 }
 0x485   : > { %v2905_v45 = vadd.f32 %v2904_v33, %v2816_v51  ;;  %v2730_v13 = vadd.f32 %v2729_v50, %v5534_v32 }
 0x486   : > { %v2993_v5 = vpop.f32.mrf.mxu3  ;;  %v2818_v15 = vpop.f32.mrf.mxu1 }
 0x487   : > { %v2994_v6 = vadd.f32 %v2993_v5, %v2905_v45  ;;  %v2819_v29 = vadd.f32 %v2818_v15, %v2730_v13 }
 0x489   : > { %vm3062_vm9 = vcmp.gt.f32.partialorder %v2994_v6, 0.0  ;;  %v3126_v12 = vmul.f32 0.01, %v2994_v6 }
 0x48b   : > { %v3190_v58 = vsel %vm3062_vm9, %v2994_v6, %v3126_v12 }
 0x48c   : > { %3254 = vst [vmem:[%s5082_s12 + $0x198] sm:$0xff] %v3190_v58  ;;  %v2907_v18 = vpop.f32.mrf.mxu2  ;;  %v2731_v10 = vpop.f32.mrf.mxu0 }
 0x48d   : > { %v2908_v38 = vadd.f32 %v2907_v18, %v2819_v29  ;;  %v2732_v25 = vadd.f32 %v2731_v10, %v5537_v52 }
 0x48e   : > { %v2996_v44 = vpop.f32.mrf.mxu3  ;;  %v2820_v57 = vpop.f32.mrf.mxu1 }
 0x48f   : > { %v2997_v21 = vadd.f32 %v2996_v44, %v2908_v38  ;;  %v2821_v16 = vadd.f32 %v2820_v57, %v2732_v25 }
 0x491   : > { %vm3064_vm10 = vcmp.gt.f32.partialorder %v2997_v21, 0.0  ;;  %v3128_v9 = vmul.f32 0.01, %v2997_v21 }
 0x493   : > { %v3192_v22 = vsel %vm3064_vm10, %v2997_v21, %v3128_v9 }
 0x494   : > { %3256 = vst [vmem:[%s5082_s12 + $0x1a8] sm:$0xff] %v3192_v22  ;;  %v2909_v32 = vpop.f32.mrf.mxu2  ;;  %v2734_v35 = vpop.f32.mrf.mxu0 }
 0x495   : > { %v2910_v27 = vadd.f32 %v2909_v32, %v2821_v16  ;;  %v2735_v42 = vadd.f32 %v2734_v35, %v5544_v40 }
 0x496   : > { %v2998_v41 = vpop.f32.mrf.mxu3  ;;  %v2823_v61 = vpop.f32.mrf.mxu1 }
 0x497   : > { %v2999_v36 = vadd.f32 %v2998_v41, %v2910_v27  ;;  %v2824_v1 = vadd.f32 %v2823_v61, %v2735_v42 }
 0x499   : > { %vm3066_vm11 = vcmp.gt.f32.partialorder %v2999_v36, 0.0  ;;  %v3130_v20 = vmul.f32 0.01, %v2999_v36 }
 0x49b   : > { %v3194_v26 = vsel %vm3066_vm11, %v2999_v36, %v3130_v20 }
 0x49c   : > { %3258 = vst [vmem:[%s5082_s12 + $0x1b8] sm:$0xff] %v3194_v26  ;;  %v2912_v52 = vpop.f32.mrf.mxu2  ;;  %v2736_v24 = vpop.f32.mrf.mxu0 }
 0x49d   : > { %v2913_v28 = vadd.f32 %v2912_v52, %v2824_v1  ;;  %v2737_v53 = vadd.f32 %v2736_v24, %v5547_v19 }
 0x49e   : > { %v3001_v60 = vpop.f32.mrf.mxu3  ;;  %v2825_v31 = vpop.f32.mrf.mxu1 }
 0x49f   : > { %v3002_v39 = vadd.f32 %v3001_v60, %v2913_v28  ;;  %v2826_v56 = vadd.f32 %v2825_v31, %v2737_v53 }
 0x4a1   : > { %vm3068_vm12 = vcmp.gt.f32.partialorder %v3002_v39, 0.0  ;;  %v3132_v17 = vmul.f32 0.01, %v3002_v39 }
 0x4a3   : > { %v3196_v55 = vsel %vm3068_vm12, %v3002_v39, %v3132_v17 }
 0x4a4   : > { %3260 = vst [vmem:[%s5082_s12 + $0x1c8] sm:$0xff] %v3196_v55  ;;  %v2914_v40 = vpop.f32.mrf.mxu2  ;;  %v2739_v7 = vpop.f32.mrf.mxu0 }
 0x4a5   : > { %v2915_v47 = vadd.f32 %v2914_v40, %v2826_v56  ;;  %v2740_v8 = vadd.f32 %v2739_v7, %v5554_v11 }
 0x4a6   : > { %v3003_v37 = vpop.f32.mrf.mxu3  ;;  %v2828_v14 = vpop.f32.mrf.mxu1 }
 0x4a7   : > { %v3004_v54 = vadd.f32 %v3003_v37, %v2915_v47  ;;  %v2829_v3 = vadd.f32 %v2828_v14, %v2740_v8 }
 0x4a9   : > { %vm3070_vm13 = vcmp.gt.f32.partialorder %v3004_v54, 0.0  ;;  %v3134_v30 = vmul.f32 0.01, %v3004_v54 }
 0x4ab   : > { %v3198_v48 = vsel %vm3070_vm13, %v3004_v54, %v3134_v30 }
 0x4ac   : > { %3262 = vst [vmem:[%s5082_s12 + $0x1d8] sm:$0xff] %v3198_v48  ;;  %v2917_v19 = vpop.f32.mrf.mxu2  ;;  %v2741_v59 = vpop.f32.mrf.mxu0 }
 0x4ad   : > { %v2918_v0 = vadd.f32 %v2917_v19, %v2829_v3  ;;  %v2742_v23 = vadd.f32 %v2741_v59, %v6073_v43 }
 0x4ae   : > { %v3006_v63 = vpop.f32.mrf.mxu3  ;;  %v2830_v49 = vpop.f32.mrf.mxu1 }
 0x4af   : > { %v3007_v2 = vadd.f32 %v3006_v63, %v2918_v0  ;;  %v2831_v11 = vadd.f32 %v2830_v49, %v2742_v23 }
 0x4b1   : > { %vm3072_vm14 = vcmp.gt.f32.partialorder %v3007_v2, 0.0  ;;  %v3136_v4 = vmul.f32 0.01, %v3007_v2 }
 0x4b3   : > { %v3200_v46 = vsel %vm3072_vm14, %v3007_v2, %v3136_v4 }
 0x4b4   : > { %3264 = vst [vmem:[%s5082_s12 + $0x1e8] sm:$0xff] %v3200_v46  ;;  %v2919_v62 = vpop.f32.mrf.mxu2 }
 0x4b5   : > { %v2920_v34 = vadd.f32 %v2919_v62, %v2831_v11 }
 0x4b6   : > { %v3008_v51 = vpop.f32.mrf.mxu3 }
 0x4b7   : > { %v3009_v33 = vadd.f32 %v3008_v51, %v2920_v34 }
 0x4b9   : > { %vm3074_vm15 = vcmp.gt.f32.partialorder %v3009_v33, 0.0  ;;  %v3138_v45 = vmul.f32 0.01, %v3009_v33 }
 0x4bb   : > { %v3202_v5 = vsel %vm3074_vm15, %v3009_v33, %v3138_v45 }
 0x4bc   : > { %3266 = vst [vmem:[%s5082_s12 + $0x1f8] sm:$0xff] %v3202_v5 }
 0x4bd PF: > { %s13_s16 = sadd.s32 1, %s4123_s16   ;;  %s6074_s12 = smov %s4115_s14 }
 0x4be   : > { %p10_p7 = scmp.ge.s32.totalorder %s13_s16, 10   ;;  %s6075_s13 = smov %s4119_s15 }
 0x4bf   : > { %s6076_s14 = smov %s6079_s17  ;;  %s6077_s15 = smov %s6083_s18 }
 0x4c0   :  { %12 = sbr.rel (!%p10_p7) target bundleno = 3 (0x3), region = 68 }

</bundles_post_ra>
